<compile_context>
chip_gen: v5e
topology: v5e:2x2
jax: 0.10.0
libtpu: 0.0.40
codegen_flags: <defaults>
</compile_context>

<pallas_src>
import functools
import math

import jax
import jax.numpy as jnp
from jax.experimental import pallas as pl
from jax.experimental.pallas import tpu as pltpu

SUBLANES = 8     # f32 sublane width -> batch padding target
LANES = 128      # lane width -> weight-slab packing width


# ----------------------------------------------------------------------------
# Single fused Pallas kernel
# ----------------------------------------------------------------------------
def fused_forward_kernel(x_ref, w_ref, o_ref, of_s, or_s, *,
                         layout, T, Bp, hidden):
    f32 = jnp.float32

    def W(name):
        r0, r, c = layout[name]                  # static Python ints (closure)
        return w_ref[r0:r0 + r, 0:c]

    def sigmoid(v):
        # One EUP tanh + free VPU scale/add instead of exp + divide.
        return 0.5 * jnp.tanh(0.5 * v) + 0.5

    def swish(v):
        return v * sigmoid(v)

    def mm(a, b):
        # f32 operands; MXU runs bf16 passes at default precision, f32 accum.
        return jnp.dot(a, b, preferred_element_type=f32)

    # ---- dense + Swish on all T*Bp rows at once (rows are t*Bp + b) ---------
    y = swish(mm(x_ref[...], W("w_dense")) + W("b_dense"))        # (T*Bp, Dd)

    # ---- one fused bidirectional LSTM layer ---------------------------------
    # Combined gate-column layout (width 8H):
    #   [ i_f | i_r | f_f | f_r | o_f | o_r | g_f | g_r ]
    # h = [h_f | h_r], c = [c_f | c_r]  (both (Bp, 2H)).
    def run_layer(idx, H, gx_f, gx_r):
        # gx_f: (T*Bp, 8H) forward-gate inputs (+ both biases), time order.
        # gx_r: (T*Bp, 8H) reverse-gate inputs, time order (consumed reversed).
        Whh = W(f"l{idx}_whh")                   # (2H, 8H) block-diagonal
        h = jnp.zeros((Bp, 2 * H), f32)
        c = jnp.zeros((Bp, 2 * H), f32)
        for s in range(T):                       # fully unrolled, static slices
            g = (gx_f[s * Bp:(s + 1) * Bp, :]
                 + gx_r[(T - 1 - s) * Bp:(T - s) * Bp, :]
                 + mm(h, Whh))                   # (Bp, 8H)
            sg = sigmoid(g[:, :6 * H])           # i/f/o, both directions
            tg = jnp.tanh(g[:, 6 * H:])          # g, both directions
            c = sg[:, 2 * H:4 * H] * c + sg[:, 0:2 * H] * tg
            h = sg[:, 4 * H:6 * H] * jnp.tanh(c)
            # Store straight into time-ordered scratch (sublane-aligned rows).
            of_s[s * Bp:(s + 1) * Bp, 0:H] = h[:, :H]             # h_f(t = s)
            or_s[(T - 1 - s) * Bp:(T - s) * Bp, 0:H] = h[:, H:]   # h_r(t = T-1-s)
        return of_s[:, 0:H], or_s[:, 0:H]        # both in time order

    H1, H2, H3 = hidden

    # Layer 1 — hoisted input projections (off the recurrent chain).
    gx_f = mm(y, W("l1_wF")) + W("l1_bias")
    gx_r = mm(y, W("l1_wR"))
    f1, r1 = run_layer(1, H1, gx_f, gx_r)

    # Layer 2 — consumer weight split along input dim (no lane concat).
    gx_f = mm(f1, W("l2_wF_top")) + mm(r1, W("l2_wF_bot")) + W("l2_bias")
    gx_r = mm(f1, W("l2_wR_top")) + mm(r1, W("l2_wR_bot"))
    f2, r2 = run_layer(2, H2, gx_f, gx_r)

    # Layer 3
    gx_f = mm(f2, W("l3_wF_top")) + mm(r2, W("l3_wF_bot")) + W("l3_bias")
    gx_r = mm(f2, W("l3_wR_top")) + mm(r2, W("l3_wR_bot"))
    f3, r3 = run_layer(3, H3, gx_f, gx_r)

    # ---- output head: two stacked Linear layers (no activation) -------------
    z = mm(f3, W("out1_top")) + mm(r3, W("out1_bot")) + W("b_out1")
    z = mm(z, W("w_out2")) + W("b_out2")
    o_ref[...] = z.astype(o_ref.dtype)


# ----------------------------------------------------------------------------
# Host-side parameter re-layout: one (R, 128) f32 weight slab + static layout
# ----------------------------------------------------------------------------
def prepare_params(p):
    f32 = jnp.float32

    def split4(m, H):
        return m[..., 0:H], m[..., H:2 * H], m[..., 2 * H:3 * H], m[..., 3 * H:4 * H]

    def combine(mf, mr, H):
        # mf/mr: (..., 4H) in PyTorch gate order [i,f,g,o]; either may be zero.
        i_f, f_f, g_f, o_f = split4(mf, H)
        i_r, f_r, g_r, o_r = split4(mr, H)
        return jnp.concatenate([i_f, i_r, f_f, f_r, o_f, o_r, g_f, g_r], axis=-1)

    mats = []

    def add(name, m):
        mats.append((name, jnp.asarray(m, f32)))

    add("w_dense", p["w_dense"])
    add("b_dense", p["b_dense"])

    def add_lstm(idx, pf, pr, split_rows):
        wih_f, whh_f, b_f = pf
        wih_r, whh_r, b_r = pr
        H = whh_f.shape[0]
        z_hh = jnp.zeros_like(whh_f)
        # Block-diagonal recurrent weight: fwd rows feed fwd gate cols only.
        add(f"l{idx}_whh", jnp.concatenate([combine(whh_f, z_hh, H),
                                            combine(z_hh, whh_r, H)], axis=0))
        add(f"l{idx}_bias", combine(b_f, b_r, H))          # (1, 8H)
        z_ih = jnp.zeros_like(wih_f)
        wF = combine(wih_f, z_ih, H)                       # rev cols zero
        wR = combine(z_ih, wih_r, H)                       # fwd cols zero
        if split_rows is None:
            add(f"l{idx}_wF", wF)
            add(f"l{idx}_wR", wR)
        else:                                              # split along input dim
            Hp = split_rows
            add(f"l{idx}_wF_top", wF[:Hp]); add(f"l{idx}_wF_bot", wF[Hp:])
            add(f"l{idx}_wR_top", wR[:Hp]); add(f"l{idx}_wR_bot", wR[Hp:])
        return H

    H1 = add_lstm(1, p["lstm1_f"], p["lstm1_r"], None)
    H2 = add_lstm(2, p["lstm2_f"], p["lstm2_r"], H1)
    H3 = add_lstm(3, p["lstm3_f"], p["lstm3_r"], H2)

    add("out1_top", p["w_out1"][:H3])
    add("out1_bot", p["w_out1"][H3:])
    add("b_out1", p["b_out1"])
    add("w_out2", p["w_out2"])
    add("b_out2", p["b_out2"])

    layout = {}
    parts = []
    off = 0
    for name, m in mats:
        r, c = m.shape
        assert c <= LANES, name
        layout[name] = (off, r, c)
        pad_r = (-r) % SUBLANES                 # keep every block sublane-aligned
        parts.append(jnp.pad(m, ((0, pad_r), (0, LANES - c))))
        off += r + pad_r
    slab = jnp.concatenate(parts, axis=0)       # (R, 128) f32 — one DMA
    dims = dict(hidden=(H1, H2, H3), num_classes=int(p["w_out2"].shape[1]))
    return slab, layout, dims


# ----------------------------------------------------------------------------
# Wrapper factory: one pallas_call for the whole forward pass
# ----------------------------------------------------------------------------
def make_forward(layout, dims, T, B):
    Bp = ((B + SUBLANES - 1) // SUBLANES) * SUBLANES
    hidden = dims["hidden"]
    C = dims["num_classes"]
    Hmax = max(hidden)

    kernel = functools.partial(fused_forward_kernel,
                               layout=layout, T=T, Bp=Bp, hidden=hidden)

    def forward(x, slab):
        # batch-first (B,T,F) -> time-major rows with batch padded to Bp.
        x_t = jnp.transpose(x, (1, 0, 2))                    # (T, B, F)
        x_t = jnp.pad(x_t, ((0, 0), (0, Bp - B), (0, 0)))    # (T, Bp, F)
        x_tm = x_t.reshape(T * Bp, x.shape[-1])              # row = t*Bp + b
        out2d = pl.pallas_call(
            kernel,
            out_shape=jax.ShapeDtypeStruct((T * Bp, C), x.dtype),
            scratch_shapes=[pltpu.VMEM((T * Bp, Hmax), jnp.float32),
                            pltpu.VMEM((T * Bp, Hmax), jnp.float32)],
            # No grid / BlockSpecs: every operand is a full-array VMEM block;
            # working set is ~200 KB, far under any generation's VMEM limit.
        )(x_tm, slab)
        out = out2d.reshape(T, Bp, C)[:, :B, :]              # drop batch padding
        return jnp.transpose(out, (1, 0, 2))                 # (B, T, C)
        # NOTE: self.dropout is defined in __init__ but never used in forward().

    return forward


# ----------------------------------------------------------------------------
# Deterministic parameter init (mirrors PyTorch shapes; uniform(-1/sqrt(fan), +))
# Weights stored pre-transposed as (in, out); LSTM gate order [i, f, g, o].
# ----------------------------------------------------------------------------
def init_params(key, input_dim, lstm_dim, dense_dim, logit_dim, num_classes):
    keys = iter(jax.random.split(key, 40))

    def unif(shape, bound):
        return jax.random.uniform(next(keys), shape, jnp.float32, -bound, bound)

    p = {}
    bnd = 1.0 / math.sqrt(input_dim)
    p["w_dense"] = unif((input_dim, dense_dim), bnd)
    p["b_dense"] = unif((1, dense_dim), bnd)

    def lstm_params(din, H):
        b = 1.0 / math.sqrt(H)
        wih = unif((din, 4 * H), b)                         # == W_ih^T
        whh = unif((H, 4 * H), b)                           # == W_hh^T
        bias = unif((1, 4 * H), b) + unif((1, 4 * H), b)    # b_ih + b_hh pre-summed
        return (wih, whh, bias)

    p["lstm1_f"] = lstm_params(dense_dim, lstm_dim // 2)
    p["lstm1_r"] = lstm_params(dense_dim, lstm_dim // 2)
    p["lstm2_f"] = lstm_params(lstm_dim, lstm_dim // 4)
    p["lstm2_r"] = lstm_params(lstm_dim, lstm_dim // 4)
    p["lstm3_f"] = lstm_params(lstm_dim // 2, lstm_dim // 8)
    p["lstm3_r"] = lstm_params(lstm_dim // 2, lstm_dim // 8)

    b1 = 1.0 / math.sqrt(lstm_dim // 4)
    p["w_out1"] = unif((lstm_dim // 4, logit_dim), b1)
    p["b_out1"] = unif((1, logit_dim), b1)
    b2 = 1.0 / math.sqrt(logit_dim)
    p["w_out2"] = unif((logit_dim, num_classes), b2)
    p["b_out2"] = unif((1, num_classes), b2)
    return p


# ----------------------------------------------------------------------------
# Pure-JAX reference (numerical sanity check, raw PyTorch-layout params)
# ----------------------------------------------------------------------------
def ref_forward(x, p):
    def swish(v):
        return v * jax.nn.sigmoid(v)

    def lstm_dir_ref(xt, wih, whh, b):
        T, B, _ = xt.shape
        H = whh.shape[0]

        def step(carry, x_t):
            h, c = carry
            gates = x_t @ wih + h @ whh + b[0]
            i = jax.nn.sigmoid(gates[:, :H])
            f = jax.nn.sigmoid(gates[:, H:2 * H])
            g = jnp.tanh(gates[:, 2 * H:3 * H])
            o = jax.nn.sigmoid(gates[:, 3 * H:])
            c = f * c + i * g
            h = o * jnp.tanh(c)
            return (h, c), h

        init = (jnp.zeros((B, H), jnp.float32), jnp.zeros((B, H), jnp.float32))
        _, hs = jax.lax.scan(step, init, xt)
        return hs

    def bilstm_ref(xb, pf, pr):
        xt = jnp.transpose(xb, (1, 0, 2))
        hf = lstm_dir_ref(xt, *pf)
        hr = lstm_dir_ref(xt[::-1], *pr)[::-1]
        return jnp.transpose(jnp.concatenate([hf, hr], axis=-1), (1, 0, 2))

    y = swish(x @ p["w_dense"] + p["b_dense"][0])
    y = bilstm_ref(y, p["lstm1_f"], p["lstm1_r"])
    y = bilstm_ref(y, p["lstm2_f"], p["lstm2_r"])
    y = bilstm_ref(y, p["lstm3_f"], p["lstm3_r"])
    y = y @ p["w_out1"] + p["b_out1"][0]
    y = y @ p["w_out2"] + p["b_out2"][0]
    return y


# ----------------------------------------------------------------------------
if __name__ == "__main__":
    B, T = 2, 8
    input_dim, lstm_dim, dense_dim, logit_dim, num_classes = 16, 32, 32, 16, 1

    key = jax.random.PRNGKey(0)
    kx, kp = jax.random.split(key)
    x = jax.random.normal(kx, (B, T, input_dim), jnp.float32)
    params = init_params(kp, input_dim, lstm_dim, dense_dim, logit_dim, num_classes)

    slab, layout, dims = prepare_params(params)      # host-side, once
    fwd = jax.jit(make_forward(layout, dims, T, B))

    out = jax.block_until_ready(fwd(x, slab))
    assert out.shape == (B, T, num_classes)

    ref = ref_forward(x, params)
    assert jnp.allclose(out, ref, atol=1e-3, rtol=1e-3), "mismatch vs JAX reference"

    print("KERNEL_OK")
</pallas_src>

<mosaic_0001>
module attributes {stable_mosaic.version = 11 : i64} {
  func.func @fused_forward_kernel(%arg0: memref<64x16xf32, #tpu.memory_space<vmem>>, %arg1: memref<312x128xf32, #tpu.memory_space<vmem>>, %arg2: memref<64x1xf32, #tpu.memory_space<vmem>>, %arg3: memref<64x16xf32, #tpu.memory_space<vmem>>, %arg4: memref<64x16xf32, #tpu.memory_space<vmem>>) attributes {dimension_semantics = [], scalar_prefetch = 0 : i64, scratch_operands = 2 : i64, tpu.core_type = #tpu.core_type<tc>} {
    %c0 = arith.constant 0 : index
    %c0_0 = arith.constant 0 : index
    %0 = vector.load %arg0[%c0, %c0_0] : memref<64x16xf32, #tpu.memory_space<vmem>>, vector<64x16xf32>
    %c0_1 = arith.constant 0 : index
    %c0_2 = arith.constant 0 : index
    %1 = vector.load %arg1[%c0_1, %c0_2] : memref<312x128xf32, #tpu.memory_space<vmem>>, vector<16x32xf32>
    %cst = arith.constant dense<0.000000e+00> : vector<64x32xf32>
    %2 = tpu.matmul %0, %1, %cst {dimension_numbers = #tpu.dot_dimension_numbers<[1], [0], [0], [1], [0, 0, 1, 1], [], []>} : vector<64x16xf32>, vector<16x32xf32>, vector<64x32xf32> -> vector<64x32xf32>
    %c16 = arith.constant 16 : index
    %c0_3 = arith.constant 0 : index
    %3 = vector.load %arg1[%c16, %c0_3] : memref<312x128xf32, #tpu.memory_space<vmem>>, vector<1x32xf32>
    %4 = vector.broadcast %3 : vector<1x32xf32> to vector<64x32xf32>
    %5 = arith.addf %2, %4 : vector<64x32xf32>
    %cst_4 = arith.constant 5.000000e-01 : f32
    %6 = vector.broadcast %cst_4 : f32 to vector<64x32xf32>
    %7 = arith.mulf %6, %5 : vector<64x32xf32>
    %8 = math.tanh %7 : vector<64x32xf32>
    %cst_5 = arith.constant 5.000000e-01 : f32
    %9 = vector.broadcast %cst_5 : f32 to vector<64x32xf32>
    %10 = arith.mulf %9, %8 : vector<64x32xf32>
    %cst_6 = arith.constant 5.000000e-01 : f32
    %11 = vector.broadcast %cst_6 : f32 to vector<64x32xf32>
    %12 = arith.addf %10, %11 : vector<64x32xf32>
    %13 = arith.mulf %5, %12 : vector<64x32xf32>
    %c64 = arith.constant 64 : index
    %c0_7 = arith.constant 0 : index
    %14 = vector.load %arg1[%c64, %c0_7] : memref<312x128xf32, #tpu.memory_space<vmem>>, vector<32x128xf32>
    %cst_8 = arith.constant dense<0.000000e+00> : vector<64x128xf32>
    %15 = tpu.matmul %13, %14, %cst_8 {dimension_numbers = #tpu.dot_dimension_numbers<[1], [0], [0], [1], [0, 0, 1, 1], [], []>} : vector<64x32xf32>, vector<32x128xf32>, vector<64x128xf32> -> vector<64x128xf32>
    %c56 = arith.constant 56 : index
    %c0_9 = arith.constant 0 : index
    %16 = vector.load %arg1[%c56, %c0_9] : memref<312x128xf32, #tpu.memory_space<vmem>>, vector<1x128xf32>
    %17 = vector.broadcast %16 : vector<1x128xf32> to vector<64x128xf32>
    %18 = arith.addf %15, %17 : vector<64x128xf32>
    %c96 = arith.constant 96 : index
    %c0_10 = arith.constant 0 : index
    %19 = vector.load %arg1[%c96, %c0_10] : memref<312x128xf32, #tpu.memory_space<vmem>>, vector<32x128xf32>
    %cst_11 = arith.constant dense<0.000000e+00> : vector<64x128xf32>
    %20 = tpu.matmul %13, %19, %cst_11 {dimension_numbers = #tpu.dot_dimension_numbers<[1], [0], [0], [1], [0, 0, 1, 1], [], []>} : vector<64x32xf32>, vector<32x128xf32>, vector<64x128xf32> -> vector<64x128xf32>
    %c24 = arith.constant 24 : index
    %c0_12 = arith.constant 0 : index
    %21 = vector.load %arg1[%c24, %c0_12] : memref<312x128xf32, #tpu.memory_space<vmem>>, vector<32x128xf32>
    %cst_13 = arith.constant 0.000000e+00 : f32
    %22 = vector.broadcast %cst_13 : f32 to vector<8x32xf32>
    %cst_14 = arith.constant 0.000000e+00 : f32
    %23 = vector.broadcast %cst_14 : f32 to vector<8x32xf32>
    %24 = vector.extract_strided_slice %18 {offsets = [0, 0], sizes = [8, 128], strides = [1, 1]} : vector<64x128xf32> to vector<8x128xf32>
    %25 = vector.extract_strided_slice %20 {offsets = [56, 0], sizes = [8, 128], strides = [1, 1]} : vector<64x128xf32> to vector<8x128xf32>
    %26 = arith.addf %24, %25 : vector<8x128xf32>
    %cst_15 = arith.constant dense<0.000000e+00> : vector<8x128xf32>
    %27 = tpu.matmul %22, %21, %cst_15 {dimension_numbers = #tpu.dot_dimension_numbers<[1], [0], [0], [1], [0, 0, 1, 1], [], []>} : vector<8x32xf32>, vector<32x128xf32>, vector<8x128xf32> -> vector<8x128xf32>
    %28 = arith.addf %26, %27 : vector<8x128xf32>
    %29 = vector.extract_strided_slice %28 {offsets = [0, 0], sizes = [8, 96], strides = [1, 1]} : vector<8x128xf32> to vector<8x96xf32>
    %cst_16 = arith.constant 5.000000e-01 : f32
    %30 = vector.broadcast %cst_16 : f32 to vector<8x96xf32>
    %31 = arith.mulf %30, %29 : vector<8x96xf32>
    %32 = math.tanh %31 : vector<8x96xf32>
    %cst_17 = arith.constant 5.000000e-01 : f32
    %33 = vector.broadcast %cst_17 : f32 to vector<8x96xf32>
    %34 = arith.mulf %33, %32 : vector<8x96xf32>
    %cst_18 = arith.constant 5.000000e-01 : f32
    %35 = vector.broadcast %cst_18 : f32 to vector<8x96xf32>
    %36 = arith.addf %34, %35 : vector<8x96xf32>
    %37 = vector.extract_strided_slice %28 {offsets = [0, 96], sizes = [8, 32], strides = [1, 1]} : vector<8x128xf32> to vector<8x32xf32>
    %38 = math.tanh %37 : vector<8x32xf32>
    %39 = vector.extract_strided_slice %36 {offsets = [0, 32], sizes = [8, 32], strides = [1, 1]} : vector<8x96xf32> to vector<8x32xf32>
    %40 = arith.mulf %39, %23 : vector<8x32xf32>
    %41 = vector.extract_strided_slice %36 {offsets = [0, 0], sizes = [8, 32], strides = [1, 1]} : vector<8x96xf32> to vector<8x32xf32>
    %42 = arith.mulf %41, %38 : vector<8x32xf32>
    %43 = arith.addf %40, %42 : vector<8x32xf32>
    %44 = vector.extract_strided_slice %36 {offsets = [0, 64], sizes = [8, 32], strides = [1, 1]} : vector<8x96xf32> to vector<8x32xf32>
    %45 = math.tanh %43 : vector<8x32xf32>
    %46 = arith.mulf %44, %45 : vector<8x32xf32>
    %47 = vector.extract_strided_slice %46 {offsets = [0, 0], sizes = [8, 16], strides = [1, 1]} : vector<8x32xf32> to vector<8x16xf32>
    %c0_19 = arith.constant 0 : index
    %c0_20 = arith.constant 0 : index
    %48 = vector.load %arg3[%c0_19, %c0_20] : memref<64x16xf32, #tpu.memory_space<vmem>>, vector<8x16xf32>
    tpu.vector_store %arg3[%c0_19, %c0_20], %47 {strides = array<i32>} : memref<64x16xf32, #tpu.memory_space<vmem>>, vector<8x16xf32>,
    %49 = vector.extract_strided_slice %46 {offsets = [0, 16], sizes = [8, 16], strides = [1, 1]} : vector<8x32xf32> to vector<8x16xf32>
    %c56_21 = arith.constant 56 : index
    %c0_22 = arith.constant 0 : index
    %50 = vector.load %arg4[%c56_21, %c0_22] : memref<64x16xf32, #tpu.memory_space<vmem>>, vector<8x16xf32>
    tpu.vector_store %arg4[%c56_21, %c0_22], %49 {strides = array<i32>} : memref<64x16xf32, #tpu.memory_space<vmem>>, vector<8x16xf32>,
    %51 = vector.extract_strided_slice %18 {offsets = [8, 0], sizes = [8, 128], strides = [1, 1]} : vector<64x128xf32> to vector<8x128xf32>
    %52 = vector.extract_strided_slice %20 {offsets = [48, 0], sizes = [8, 128], strides = [1, 1]} : vector<64x128xf32> to vector<8x128xf32>
    %53 = arith.addf %51, %52 : vector<8x128xf32>
    %cst_23 = arith.constant dense<0.000000e+00> : vector<8x128xf32>
    %54 = tpu.matmul %46, %21, %cst_23 {dimension_numbers = #tpu.dot_dimension_numbers<[1], [0], [0], [1], [0, 0, 1, 1], [], []>} : vector<8x32xf32>, vector<32x128xf32>, vector<8x128xf32> -> vector<8x128xf32>
    %55 = arith.addf %53, %54 : vector<8x128xf32>
    %56 = vector.extract_strided_slice %55 {offsets = [0, 0], sizes = [8, 96], strides = [1, 1]} : vector<8x128xf32> to vector<8x96xf32>
    %cst_24 = arith.constant 5.000000e-01 : f32
    %57 = vector.broadcast %cst_24 : f32 to vector<8x96xf32>
    %58 = arith.mulf %57, %56 : vector<8x96xf32>
    %59 = math.tanh %58 : vector<8x96xf32>
    %cst_25 = arith.constant 5.000000e-01 : f32
    %60 = vector.broadcast %cst_25 : f32 to vector<8x96xf32>
    %61 = arith.mulf %60, %59 : vector<8x96xf32>
    %cst_26 = arith.constant 5.000000e-01 : f32
    %62 = vector.broadcast %cst_26 : f32 to vector<8x96xf32>
    %63 = arith.addf %61, %62 : vector<8x96xf32>
    %64 = vector.extract_strided_slice %55 {offsets = [0, 96], sizes = [8, 32], strides = [1, 1]} : vector<8x128xf32> to vector<8x32xf32>
    %65 = math.tanh %64 : vector<8x32xf32>
    %66 = vector.extract_strided_slice %63 {offsets = [0, 32], sizes = [8, 32], strides = [1, 1]} : vector<8x96xf32> to vector<8x32xf32>
    %67 = arith.mulf %66, %43 : vector<8x32xf32>
    %68 = vector.extract_strided_slice %63 {offsets = [0, 0], sizes = [8, 32], strides = [1, 1]} : vector<8x96xf32> to vector<8x32xf32>
    %69 = arith.mulf %68, %65 : vector<8x32xf32>
    %70 = arith.addf %67, %69 : vector<8x32xf32>
    %71 = vector.extract_strided_slice %63 {offsets = [0, 64], sizes = [8, 32], strides = [1, 1]} : vector<8x96xf32> to vector<8x32xf32>
    %72 = math.tanh %70 : vector<8x32xf32>
    %73 = arith.mulf %71, %72 : vector<8x32xf32>
    %74 = vector.extract_strided_slice %73 {offsets = [0, 0], sizes = [8, 16], strides = [1, 1]} : vector<8x32xf32> to vector<8x16xf32>
    %c8 = arith.constant 8 : index
    %c0_27 = arith.constant 0 : index
    %75 = vector.load %arg3[%c8, %c0_27] : memref<64x16xf32, #tpu.memory_space<vmem>>, vector<8x16xf32>
    tpu.vector_store %arg3[%c8, %c0_27], %74 {strides = array<i32>} : memref<64x16xf32, #tpu.memory_space<vmem>>, vector<8x16xf32>,
    %76 = vector.extract_strided_slice %73 {offsets = [0, 16], sizes = [8, 16], strides = [1, 1]} : vector<8x32xf32> to vector<8x16xf32>
    %c48 = arith.constant 48 : index
    %c0_28 = arith.constant 0 : index
    %77 = vector.load %arg4[%c48, %c0_28] : memref<64x16xf32, #tpu.memory_space<vmem>>, vector<8x16xf32>
    tpu.vector_store %arg4[%c48, %c0_28], %76 {strides = array<i32>} : memref<64x16xf32, #tpu.memory_space<vmem>>, vector<8x16xf32>,
    %78 = vector.extract_strided_slice %18 {offsets = [16, 0], sizes = [8, 128], strides = [1, 1]} : vector<64x128xf32> to vector<8x128xf32>
    %79 = vector.extract_strided_slice %20 {offsets = [40, 0], sizes = [8, 128], strides = [1, 1]} : vector<64x128xf32> to vector<8x128xf32>
    %80 = arith.addf %78, %79 : vector<8x128xf32>
    %cst_29 = arith.constant dense<0.000000e+00> : vector<8x128xf32>
    %81 = tpu.matmul %73, %21, %cst_29 {dimension_numbers = #tpu.dot_dimension_numbers<[1], [0], [0], [1], [0, 0, 1, 1], [], []>} : vector<8x32xf32>, vector<32x128xf32>, vector<8x128xf32> -> vector<8x128xf32>
    %82 = arith.addf %80, %81 : vector<8x128xf32>
    %83 = vector.extract_strided_slice %82 {offsets = [0, 0], sizes = [8, 96], strides = [1, 1]} : vector<8x128xf32> to vector<8x96xf32>
    %cst_30 = arith.constant 5.000000e-01 : f32
    %84 = vector.broadcast %cst_30 : f32 to vector<8x96xf32>
    %85 = arith.mulf %84, %83 : vector<8x96xf32>
    %86 = math.tanh %85 : vector<8x96xf32>
    %cst_31 = arith.constant 5.000000e-01 : f32
    %87 = vector.broadcast %cst_31 : f32 to vector<8x96xf32>
    %88 = arith.mulf %87, %86 : vector<8x96xf32>
    %cst_32 = arith.constant 5.000000e-01 : f32
    %89 = vector.broadcast %cst_32 : f32 to vector<8x96xf32>
    %90 = arith.addf %88, %89 : vector<8x96xf32>
    %91 = vector.extract_strided_slice %82 {offsets = [0, 96], sizes = [8, 32], strides = [1, 1]} : vector<8x128xf32> to vector<8x32xf32>
    %92 = math.tanh %91 : vector<8x32xf32>
    %93 = vector.extract_strided_slice %90 {offsets = [0, 32], sizes = [8, 32], strides = [1, 1]} : vector<8x96xf32> to vector<8x32xf32>
    %94 = arith.mulf %93, %70 : vector<8x32xf32>
    %95 = vector.extract_strided_slice %90 {offsets = [0, 0], sizes = [8, 32], strides = [1, 1]} : vector<8x96xf32> to vector<8x32xf32>
    %96 = arith.mulf %95, %92 : vector<8x32xf32>
    %97 = arith.addf %94, %96 : vector<8x32xf32>
    %98 = vector.extract_strided_slice %90 {offsets = [0, 64], sizes = [8, 32], strides = [1, 1]} : vector<8x96xf32> to vector<8x32xf32>
    %99 = math.tanh %97 : vector<8x32xf32>
    %100 = arith.mulf %98, %99 : vector<8x32xf32>
    %101 = vector.extract_strided_slice %100 {offsets = [0, 0], sizes = [8, 16], strides = [1, 1]} : vector<8x32xf32> to vector<8x16xf32>
    %c16_33 = arith.constant 16 : index
    %c0_34 = arith.constant 0 : index
    %102 = vector.load %arg3[%c16_33, %c0_34] : memref<64x16xf32, #tpu.memory_space<vmem>>, vector<8x16xf32>
    tpu.vector_store %arg3[%c16_33, %c0_34], %101 {strides = array<i32>} : memref<64x16xf32, #tpu.memory_space<vmem>>, vector<8x16xf32>,
    %103 = vector.extract_strided_slice %100 {offsets = [0, 16], sizes = [8, 16], strides = [1, 1]} : vector<8x32xf32> to vector<8x16xf32>
    %c40 = arith.constant 40 : index
    %c0_35 = arith.constant 0 : index
    %104 = vector.load %arg4[%c40, %c0_35] : memref<64x16xf32, #tpu.memory_space<vmem>>, vector<8x16xf32>
    tpu.vector_store %arg4[%c40, %c0_35], %103 {strides = array<i32>} : memref<64x16xf32, #tpu.memory_space<vmem>>, vector<8x16xf32>,
    %105 = vector.extract_strided_slice %18 {offsets = [24, 0], sizes = [8, 128], strides = [1, 1]} : vector<64x128xf32> to vector<8x128xf32>
    %106 = vector.extract_strided_slice %20 {offsets = [32, 0], sizes = [8, 128], strides = [1, 1]} : vector<64x128xf32> to vector<8x128xf32>
    %107 = arith.addf %105, %106 : vector<8x128xf32>
    %cst_36 = arith.constant dense<0.000000e+00> : vector<8x128xf32>
    %108 = tpu.matmul %100, %21, %cst_36 {dimension_numbers = #tpu.dot_dimension_numbers<[1], [0], [0], [1], [0, 0, 1, 1], [], []>} : vector<8x32xf32>, vector<32x128xf32>, vector<8x128xf32> -> vector<8x128xf32>
    %109 = arith.addf %107, %108 : vector<8x128xf32>
    %110 = vector.extract_strided_slice %109 {offsets = [0, 0], sizes = [8, 96], strides = [1, 1]} : vector<8x128xf32> to vector<8x96xf32>
    %cst_37 = arith.constant 5.000000e-01 : f32
    %111 = vector.broadcast %cst_37 : f32 to vector<8x96xf32>
    %112 = arith.mulf %111, %110 : vector<8x96xf32>
    %113 = math.tanh %112 : vector<8x96xf32>
    %cst_38 = arith.constant 5.000000e-01 : f32
    %114 = vector.broadcast %cst_38 : f32 to vector<8x96xf32>
    %115 = arith.mulf %114, %113 : vector<8x96xf32>
    %cst_39 = arith.constant 5.000000e-01 : f32
    %116 = vector.broadcast %cst_39 : f32 to vector<8x96xf32>
    %117 = arith.addf %115, %116 : vector<8x96xf32>
    %118 = vector.extract_strided_slice %109 {offsets = [0, 96], sizes = [8, 32], strides = [1, 1]} : vector<8x128xf32> to vector<8x32xf32>
    %119 = math.tanh %118 : vector<8x32xf32>
    %120 = vector.extract_strided_slice %117 {offsets = [0, 32], sizes = [8, 32], strides = [1, 1]} : vector<8x96xf32> to vector<8x32xf32>
    %121 = arith.mulf %120, %97 : vector<8x32xf32>
    %122 = vector.extract_strided_slice %117 {offsets = [0, 0], sizes = [8, 32], strides = [1, 1]} : vector<8x96xf32> to vector<8x32xf32>
    %123 = arith.mulf %122, %119 : vector<8x32xf32>
    %124 = arith.addf %121, %123 : vector<8x32xf32>
    %125 = vector.extract_strided_slice %117 {offsets = [0, 64], sizes = [8, 32], strides = [1, 1]} : vector<8x96xf32> to vector<8x32xf32>
    %126 = math.tanh %124 : vector<8x32xf32>
    %127 = arith.mulf %125, %126 : vector<8x32xf32>
    %128 = vector.extract_strided_slice %127 {offsets = [0, 0], sizes = [8, 16], strides = [1, 1]} : vector<8x32xf32> to vector<8x16xf32>
    %c24_40 = arith.constant 24 : index
    %c0_41 = arith.constant 0 : index
    %129 = vector.load %arg3[%c24_40, %c0_41] : memref<64x16xf32, #tpu.memory_space<vmem>>, vector<8x16xf32>
    tpu.vector_store %arg3[%c24_40, %c0_41], %128 {strides = array<i32>} : memref<64x16xf32, #tpu.memory_space<vmem>>, vector<8x16xf32>,
    %130 = vector.extract_strided_slice %127 {offsets = [0, 16], sizes = [8, 16], strides = [1, 1]} : vector<8x32xf32> to vector<8x16xf32>
    %c32 = arith.constant 32 : index
    %c0_42 = arith.constant 0 : index
    %131 = vector.load %arg4[%c32, %c0_42] : memref<64x16xf32, #tpu.memory_space<vmem>>, vector<8x16xf32>
    tpu.vector_store %arg4[%c32, %c0_42], %130 {strides = array<i32>} : memref<64x16xf32, #tpu.memory_space<vmem>>, vector<8x16xf32>,
    %132 = vector.extract_strided_slice %18 {offsets = [32, 0], sizes = [8, 128], strides = [1, 1]} : vector<64x128xf32> to vector<8x128xf32>
    %133 = vector.extract_strided_slice %20 {offsets = [24, 0], sizes = [8, 128], strides = [1, 1]} : vector<64x128xf32> to vector<8x128xf32>
    %134 = arith.addf %132, %133 : vector<8x128xf32>
    %cst_43 = arith.constant dense<0.000000e+00> : vector<8x128xf32>
    %135 = tpu.matmul %127, %21, %cst_43 {dimension_numbers = #tpu.dot_dimension_numbers<[1], [0], [0], [1], [0, 0, 1, 1], [], []>} : vector<8x32xf32>, vector<32x128xf32>, vector<8x128xf32> -> vector<8x128xf32>
    %136 = arith.addf %134, %135 : vector<8x128xf32>
    %137 = vector.extract_strided_slice %136 {offsets = [0, 0], sizes = [8, 96], strides = [1, 1]} : vector<8x128xf32> to vector<8x96xf32>
    %cst_44 = arith.constant 5.000000e-01 : f32
    %138 = vector.broadcast %cst_44 : f32 to vector<8x96xf32>
    %139 = arith.mulf %138, %137 : vector<8x96xf32>
    %140 = math.tanh %139 : vector<8x96xf32>
    %cst_45 = arith.constant 5.000000e-01 : f32
    %141 = vector.broadcast %cst_45 : f32 to vector<8x96xf32>
    %142 = arith.mulf %141, %140 : vector<8x96xf32>
    %cst_46 = arith.constant 5.000000e-01 : f32
    %143 = vector.broadcast %cst_46 : f32 to vector<8x96xf32>
    %144 = arith.addf %142, %143 : vector<8x96xf32>
    %145 = vector.extract_strided_slice %136 {offsets = [0, 96], sizes = [8, 32], strides = [1, 1]} : vector<8x128xf32> to vector<8x32xf32>
    %146 = math.tanh %145 : vector<8x32xf32>
    %147 = vector.extract_strided_slice %144 {offsets = [0, 32], sizes = [8, 32], strides = [1, 1]} : vector<8x96xf32> to vector<8x32xf32>
    %148 = arith.mulf %147, %124 : vector<8x32xf32>
    %149 = vector.extract_strided_slice %144 {offsets = [0, 0], sizes = [8, 32], strides = [1, 1]} : vector<8x96xf32> to vector<8x32xf32>
    %150 = arith.mulf %149, %146 : vector<8x32xf32>
    %151 = arith.addf %148, %150 : vector<8x32xf32>
    %152 = vector.extract_strided_slice %144 {offsets = [0, 64], sizes = [8, 32], strides = [1, 1]} : vector<8x96xf32> to vector<8x32xf32>
    %153 = math.tanh %151 : vector<8x32xf32>
    %154 = arith.mulf %152, %153 : vector<8x32xf32>
    %155 = vector.extract_strided_slice %154 {offsets = [0, 0], sizes = [8, 16], strides = [1, 1]} : vector<8x32xf32> to vector<8x16xf32>
    %c32_47 = arith.constant 32 : index
    %c0_48 = arith.constant 0 : index
    %156 = vector.load %arg3[%c32_47, %c0_48] : memref<64x16xf32, #tpu.memory_space<vmem>>, vector<8x16xf32>
    tpu.vector_store %arg3[%c32_47, %c0_48], %155 {strides = array<i32>} : memref<64x16xf32, #tpu.memory_space<vmem>>, vector<8x16xf32>,
    %157 = vector.extract_strided_slice %154 {offsets = [0, 16], sizes = [8, 16], strides = [1, 1]} : vector<8x32xf32> to vector<8x16xf32>
    %c24_49 = arith.constant 24 : index
    %c0_50 = arith.constant 0 : index
    %158 = vector.load %arg4[%c24_49, %c0_50] : memref<64x16xf32, #tpu.memory_space<vmem>>, vector<8x16xf32>
    tpu.vector_store %arg4[%c24_49, %c0_50], %157 {strides = array<i32>} : memref<64x16xf32, #tpu.memory_space<vmem>>, vector<8x16xf32>,
    %159 = vector.extract_strided_slice %18 {offsets = [40, 0], sizes = [8, 128], strides = [1, 1]} : vector<64x128xf32> to vector<8x128xf32>
    %160 = vector.extract_strided_slice %20 {offsets = [16, 0], sizes = [8, 128], strides = [1, 1]} : vector<64x128xf32> to vector<8x128xf32>
    %161 = arith.addf %159, %160 : vector<8x128xf32>
    %cst_51 = arith.constant dense<0.000000e+00> : vector<8x128xf32>
    %162 = tpu.matmul %154, %21, %cst_51 {dimension_numbers = #tpu.dot_dimension_numbers<[1], [0], [0], [1], [0, 0, 1, 1], [], []>} : vector<8x32xf32>, vector<32x128xf32>, vector<8x128xf32> -> vector<8x128xf32>
    %163 = arith.addf %161, %162 : vector<8x128xf32>
    %164 = vector.extract_strided_slice %163 {offsets = [0, 0], sizes = [8, 96], strides = [1, 1]} : vector<8x128xf32> to vector<8x96xf32>
    %cst_52 = arith.constant 5.000000e-01 : f32
    %165 = vector.broadcast %cst_52 : f32 to vector<8x96xf32>
    %166 = arith.mulf %165, %164 : vector<8x96xf32>
    %167 = math.tanh %166 : vector<8x96xf32>
    %cst_53 = arith.constant 5.000000e-01 : f32
    %168 = vector.broadcast %cst_53 : f32 to vector<8x96xf32>
    %169 = arith.mulf %168, %167 : vector<8x96xf32>
    %cst_54 = arith.constant 5.000000e-01 : f32
    %170 = vector.broadcast %cst_54 : f32 to vector<8x96xf32>
    %171 = arith.addf %169, %170 : vector<8x96xf32>
    %172 = vector.extract_strided_slice %163 {offsets = [0, 96], sizes = [8, 32], strides = [1, 1]} : vector<8x128xf32> to vector<8x32xf32>
    %173 = math.tanh %172 : vector<8x32xf32>
    %174 = vector.extract_strided_slice %171 {offsets = [0, 32], sizes = [8, 32], strides = [1, 1]} : vector<8x96xf32> to vector<8x32xf32>
    %175 = arith.mulf %174, %151 : vector<8x32xf32>
    %176 = vector.extract_strided_slice %171 {offsets = [0, 0], sizes = [8, 32], strides = [1, 1]} : vector<8x96xf32> to vector<8x32xf32>
    %177 = arith.mulf %176, %173 : vector<8x32xf32>
    %178 = arith.addf %175, %177 : vector<8x32xf32>
    %179 = vector.extract_strided_slice %171 {offsets = [0, 64], sizes = [8, 32], strides = [1, 1]} : vector<8x96xf32> to vector<8x32xf32>
    %180 = math.tanh %178 : vector<8x32xf32>
    %181 = arith.mulf %179, %180 : vector<8x32xf32>
    %182 = vector.extract_strided_slice %181 {offsets = [0, 0], sizes = [8, 16], strides = [1, 1]} : vector<8x32xf32> to vector<8x16xf32>
    %c40_55 = arith.constant 40 : index
    %c0_56 = arith.constant 0 : index
    %183 = vector.load %arg3[%c40_55, %c0_56] : memref<64x16xf32, #tpu.memory_space<vmem>>, vector<8x16xf32>
    tpu.vector_store %arg3[%c40_55, %c0_56], %182 {strides = array<i32>} : memref<64x16xf32, #tpu.memory_space<vmem>>, vector<8x16xf32>,
    %184 = vector.extract_strided_slice %181 {offsets = [0, 16], sizes = [8, 16], strides = [1, 1]} : vector<8x32xf32> to vector<8x16xf32>
    %c16_57 = arith.constant 16 : index
    %c0_58 = arith.constant 0 : index
    %185 = vector.load %arg4[%c16_57, %c0_58] : memref<64x16xf32, #tpu.memory_space<vmem>>, vector<8x16xf32>
    tpu.vector_store %arg4[%c16_57, %c0_58], %184 {strides = array<i32>} : memref<64x16xf32, #tpu.memory_space<vmem>>, vector<8x16xf32>,
    %186 = vector.extract_strided_slice %18 {offsets = [48, 0], sizes = [8, 128], strides = [1, 1]} : vector<64x128xf32> to vector<8x128xf32>
    %187 = vector.extract_strided_slice %20 {offsets = [8, 0], sizes = [8, 128], strides = [1, 1]} : vector<64x128xf32> to vector<8x128xf32>
    %188 = arith.addf %186, %187 : vector<8x128xf32>
    %cst_59 = arith.constant dense<0.000000e+00> : vector<8x128xf32>
    %189 = tpu.matmul %181, %21, %cst_59 {dimension_numbers = #tpu.dot_dimension_numbers<[1], [0], [0], [1], [0, 0, 1, 1], [], []>} : vector<8x32xf32>, vector<32x128xf32>, vector<8x128xf32> -> vector<8x128xf32>
    %190 = arith.addf %188, %189 : vector<8x128xf32>
    %191 = vector.extract_strided_slice %190 {offsets = [0, 0], sizes = [8, 96], strides = [1, 1]} : vector<8x128xf32> to vector<8x96xf32>
    %cst_60 = arith.constant 5.000000e-01 : f32
    %192 = vector.broadcast %cst_60 : f32 to vector<8x96xf32>
    %193 = arith.mulf %192, %191 : vector<8x96xf32>
    %194 = math.tanh %193 : vector<8x96xf32>
    %cst_61 = arith.constant 5.000000e-01 : f32
    %195 = vector.broadcast %cst_61 : f32 to vector<8x96xf32>
    %196 = arith.mulf %195, %194 : vector<8x96xf32>
    %cst_62 = arith.constant 5.000000e-01 : f32
    %197 = vector.broadcast %cst_62 : f32 to vector<8x96xf32>
    %198 = arith.addf %196, %197 : vector<8x96xf32>
    %199 = vector.extract_strided_slice %190 {offsets = [0, 96], sizes = [8, 32], strides = [1, 1]} : vector<8x128xf32> to vector<8x32xf32>
    %200 = math.tanh %199 : vector<8x32xf32>
    %201 = vector.extract_strided_slice %198 {offsets = [0, 32], sizes = [8, 32], strides = [1, 1]} : vector<8x96xf32> to vector<8x32xf32>
    %202 = arith.mulf %201, %178 : vector<8x32xf32>
    %203 = vector.extract_strided_slice %198 {offsets = [0, 0], sizes = [8, 32], strides = [1, 1]} : vector<8x96xf32> to vector<8x32xf32>
    %204 = arith.mulf %203, %200 : vector<8x32xf32>
    %205 = arith.addf %202, %204 : vector<8x32xf32>
    %206 = vector.extract_strided_slice %198 {offsets = [0, 64], sizes = [8, 32], strides = [1, 1]} : vector<8x96xf32> to vector<8x32xf32>
    %207 = math.tanh %205 : vector<8x32xf32>
    %208 = arith.mulf %206, %207 : vector<8x32xf32>
    %209 = vector.extract_strided_slice %208 {offsets = [0, 0], sizes = [8, 16], strides = [1, 1]} : vector<8x32xf32> to vector<8x16xf32>
    %c48_63 = arith.constant 48 : index
    %c0_64 = arith.constant 0 : index
    %210 = vector.load %arg3[%c48_63, %c0_64] : memref<64x16xf32, #tpu.memory_space<vmem>>, vector<8x16xf32>
    tpu.vector_store %arg3[%c48_63, %c0_64], %209 {strides = array<i32>} : memref<64x16xf32, #tpu.memory_space<vmem>>, vector<8x16xf32>,
    %211 = vector.extract_strided_slice %208 {offsets = [0, 16], sizes = [8, 16], strides = [1, 1]} : vector<8x32xf32> to vector<8x16xf32>
    %c8_65 = arith.constant 8 : index
    %c0_66 = arith.constant 0 : index
    %212 = vector.load %arg4[%c8_65, %c0_66] : memref<64x16xf32, #tpu.memory_space<vmem>>, vector<8x16xf32>
    tpu.vector_store %arg4[%c8_65, %c0_66], %211 {strides = array<i32>} : memref<64x16xf32, #tpu.memory_space<vmem>>, vector<8x16xf32>,
    %213 = vector.extract_strided_slice %18 {offsets = [56, 0], sizes = [8, 128], strides = [1, 1]} : vector<64x128xf32> to vector<8x128xf32>
    %214 = vector.extract_strided_slice %20 {offsets = [0, 0], sizes = [8, 128], strides = [1, 1]} : vector<64x128xf32> to vector<8x128xf32>
    %215 = arith.addf %213, %214 : vector<8x128xf32>
    %cst_67 = arith.constant dense<0.000000e+00> : vector<8x128xf32>
    %216 = tpu.matmul %208, %21, %cst_67 {dimension_numbers = #tpu.dot_dimension_numbers<[1], [0], [0], [1], [0, 0, 1, 1], [], []>} : vector<8x32xf32>, vector<32x128xf32>, vector<8x128xf32> -> vector<8x128xf32>
    %217 = arith.addf %215, %216 : vector<8x128xf32>
    %218 = vector.extract_strided_slice %217 {offsets = [0, 0], sizes = [8, 96], strides = [1, 1]} : vector<8x128xf32> to vector<8x96xf32>
    %cst_68 = arith.constant 5.000000e-01 : f32
    %219 = vector.broadcast %cst_68 : f32 to vector<8x96xf32>
    %220 = arith.mulf %219, %218 : vector<8x96xf32>
    %221 = math.tanh %220 : vector<8x96xf32>
    %cst_69 = arith.constant 5.000000e-01 : f32
    %222 = vector.broadcast %cst_69 : f32 to vector<8x96xf32>
    %223 = arith.mulf %222, %221 : vector<8x96xf32>
    %cst_70 = arith.constant 5.000000e-01 : f32
    %224 = vector.broadcast %cst_70 : f32 to vector<8x96xf32>
    %225 = arith.addf %223, %224 : vector<8x96xf32>
    %226 = vector.extract_strided_slice %217 {offsets = [0, 96], sizes = [8, 32], strides = [1, 1]} : vector<8x128xf32> to vector<8x32xf32>
    %227 = math.tanh %226 : vector<8x32xf32>
    %228 = vector.extract_strided_slice %225 {offsets = [0, 32], sizes = [8, 32], strides = [1, 1]} : vector<8x96xf32> to vector<8x32xf32>
    %229 = arith.mulf %228, %205 : vector<8x32xf32>
    %230 = vector.extract_strided_slice %225 {offsets = [0, 0], sizes = [8, 32], strides = [1, 1]} : vector<8x96xf32> to vector<8x32xf32>
    %231 = arith.mulf %230, %227 : vector<8x32xf32>
    %232 = arith.addf %229, %231 : vector<8x32xf32>
    %233 = vector.extract_strided_slice %225 {offsets = [0, 64], sizes = [8, 32], strides = [1, 1]} : vector<8x96xf32> to vector<8x32xf32>
    %234 = math.tanh %232 : vector<8x32xf32>
    %235 = arith.mulf %233, %234 : vector<8x32xf32>
    %236 = vector.extract_strided_slice %235 {offsets = [0, 0], sizes = [8, 16], strides = [1, 1]} : vector<8x32xf32> to vector<8x16xf32>
    %c56_71 = arith.constant 56 : index
    %c0_72 = arith.constant 0 : index
    %237 = vector.load %arg3[%c56_71, %c0_72] : memref<64x16xf32, #tpu.memory_space<vmem>>, vector<8x16xf32>
    tpu.vector_store %arg3[%c56_71, %c0_72], %236 {strides = array<i32>} : memref<64x16xf32, #tpu.memory_space<vmem>>, vector<8x16xf32>,
    %238 = vector.extract_strided_slice %235 {offsets = [0, 16], sizes = [8, 16], strides = [1, 1]} : vector<8x32xf32> to vector<8x16xf32>
    %c0_73 = arith.constant 0 : index
    %c0_74 = arith.constant 0 : index
    %239 = vector.load %arg4[%c0_73, %c0_74] : memref<64x16xf32, #tpu.memory_space<vmem>>, vector<8x16xf32>
    tpu.vector_store %arg4[%c0_73, %c0_74], %238 {strides = array<i32>} : memref<64x16xf32, #tpu.memory_space<vmem>>, vector<8x16xf32>,
    %c0_75 = arith.constant 0 : index
    %c0_76 = arith.constant 0 : index
    %240 = vector.load %arg3[%c0_75, %c0_76] : memref<64x16xf32, #tpu.memory_space<vmem>>, vector<64x16xf32>
    %c0_77 = arith.constant 0 : index
    %c0_78 = arith.constant 0 : index
    %241 = vector.load %arg4[%c0_77, %c0_78] : memref<64x16xf32, #tpu.memory_space<vmem>>, vector<64x16xf32>
    %c152 = arith.constant 152 : index
    %c0_79 = arith.constant 0 : index
    %242 = vector.load %arg1[%c152, %c0_79] : memref<312x128xf32, #tpu.memory_space<vmem>>, vector<16x64xf32>
    %cst_80 = arith.constant dense<0.000000e+00> : vector<64x64xf32>
    %243 = tpu.matmul %240, %242, %cst_80 {dimension_numbers = #tpu.dot_dimension_numbers<[1], [0], [0], [1], [0, 0, 1, 1], [], []>} : vector<64x16xf32>, vector<16x64xf32>, vector<64x64xf32> -> vector<64x64xf32>
    %c168 = arith.constant 168 : index
    %c0_81 = arith.constant 0 : index
    %244 = vector.load %arg1[%c168, %c0_81] : memref<312x128xf32, #tpu.memory_space<vmem>>, vector<16x64xf32>
    %cst_82 = arith.constant dense<0.000000e+00> : vector<64x64xf32>
    %245 = tpu.matmul %241, %244, %cst_82 {dimension_numbers = #tpu.dot_dimension_numbers<[1], [0], [0], [1], [0, 0, 1, 1], [], []>} : vector<64x16xf32>, vector<16x64xf32>, vector<64x64xf32> -> vector<64x64xf32>
    %246 = arith.addf %243, %245 : vector<64x64xf32>
    %c144 = arith.constant 144 : index
    %c0_83 = arith.constant 0 : index
    %247 = vector.load %arg1[%c144, %c0_83] : memref<312x128xf32, #tpu.memory_space<vmem>>, vector<1x64xf32>
    %248 = vector.broadcast %247 : vector<1x64xf32> to vector<64x64xf32>
    %249 = arith.addf %246, %248 : vector<64x64xf32>
    %c184 = arith.constant 184 : index
    %c0_84 = arith.constant 0 : index
    %250 = vector.load %arg1[%c184, %c0_84] : memref<312x128xf32, #tpu.memory_space<vmem>>, vector<16x64xf32>
    %cst_85 = arith.constant dense<0.000000e+00> : vector<64x64xf32>
    %251 = tpu.matmul %240, %250, %cst_85 {dimension_numbers = #tpu.dot_dimension_numbers<[1], [0], [0], [1], [0, 0, 1, 1], [], []>} : vector<64x16xf32>, vector<16x64xf32>, vector<64x64xf32> -> vector<64x64xf32>
    %c200 = arith.constant 200 : index
    %c0_86 = arith.constant 0 : index
    %252 = vector.load %arg1[%c200, %c0_86] : memref<312x128xf32, #tpu.memory_space<vmem>>, vector<16x64xf32>
    %cst_87 = arith.constant dense<0.000000e+00> : vector<64x64xf32>
    %253 = tpu.matmul %241, %252, %cst_87 {dimension_numbers = #tpu.dot_dimension_numbers<[1], [0], [0], [1], [0, 0, 1, 1], [], []>} : vector<64x16xf32>, vector<16x64xf32>, vector<64x64xf32> -> vector<64x64xf32>
    %254 = arith.addf %251, %253 : vector<64x64xf32>
    %c128 = arith.constant 128 : index
    %c0_88 = arith.constant 0 : index
    %255 = vector.load %arg1[%c128, %c0_88] : memref<312x128xf32, #tpu.memory_space<vmem>>, vector<16x64xf32>
    %cst_89 = arith.constant 0.000000e+00 : f32
    %256 = vector.broadcast %cst_89 : f32 to vector<8x16xf32>
    %cst_90 = arith.constant 0.000000e+00 : f32
    %257 = vector.broadcast %cst_90 : f32 to vector<8x16xf32>
    %258 = vector.extract_strided_slice %249 {offsets = [0, 0], sizes = [8, 64], strides = [1, 1]} : vector<64x64xf32> to vector<8x64xf32>
    %259 = vector.extract_strided_slice %254 {offsets = [56, 0], sizes = [8, 64], strides = [1, 1]} : vector<64x64xf32> to vector<8x64xf32>
    %260 = arith.addf %258, %259 : vector<8x64xf32>
    %cst_91 = arith.constant dense<0.000000e+00> : vector<8x64xf32>
    %261 = tpu.matmul %256, %255, %cst_91 {dimension_numbers = #tpu.dot_dimension_numbers<[1], [0], [0], [1], [0, 0, 1, 1], [], []>} : vector<8x16xf32>, vector<16x64xf32>, vector<8x64xf32> -> vector<8x64xf32>
    %262 = arith.addf %260, %261 : vector<8x64xf32>
    %263 = vector.extract_strided_slice %262 {offsets = [0, 0], sizes = [8, 48], strides = [1, 1]} : vector<8x64xf32> to vector<8x48xf32>
    %cst_92 = arith.constant 5.000000e-01 : f32
    %264 = vector.broadcast %cst_92 : f32 to vector<8x48xf32>
    %265 = arith.mulf %264, %263 : vector<8x48xf32>
    %266 = math.tanh %265 : vector<8x48xf32>
    %cst_93 = arith.constant 5.000000e-01 : f32
    %267 = vector.broadcast %cst_93 : f32 to vector<8x48xf32>
    %268 = arith.mulf %267, %266 : vector<8x48xf32>
    %cst_94 = arith.constant 5.000000e-01 : f32
    %269 = vector.broadcast %cst_94 : f32 to vector<8x48xf32>
    %270 = arith.addf %268, %269 : vector<8x48xf32>
    %271 = vector.extract_strided_slice %262 {offsets = [0, 48], sizes = [8, 16], strides = [1, 1]} : vector<8x64xf32> to vector<8x16xf32>
    %272 = math.tanh %271 : vector<8x16xf32>
    %273 = vector.extract_strided_slice %270 {offsets = [0, 16], sizes = [8, 16], strides = [1, 1]} : vector<8x48xf32> to vector<8x16xf32>
    %274 = arith.mulf %273, %257 : vector<8x16xf32>
    %275 = vector.extract_strided_slice %270 {offsets = [0, 0], sizes = [8, 16], strides = [1, 1]} : vector<8x48xf32> to vector<8x16xf32>
    %276 = arith.mulf %275, %272 : vector<8x16xf32>
    %277 = arith.addf %274, %276 : vector<8x16xf32>
    %278 = vector.extract_strided_slice %270 {offsets = [0, 32], sizes = [8, 16], strides = [1, 1]} : vector<8x48xf32> to vector<8x16xf32>
    %279 = math.tanh %277 : vector<8x16xf32>
    %280 = arith.mulf %278, %279 : vector<8x16xf32>
    %281 = vector.extract_strided_slice %280 {offsets = [0, 0], sizes = [8, 8], strides = [1, 1]} : vector<8x16xf32> to vector<8x8xf32>
    %c0_95 = arith.constant 0 : index
    %c0_96 = arith.constant 0 : index
    %282 = vector.load %arg3[%c0_95, %c0_96] : memref<64x16xf32, #tpu.memory_space<vmem>>, vector<8x8xf32>
    tpu.vector_store %arg3[%c0_95, %c0_96], %281 {strides = array<i32>} : memref<64x16xf32, #tpu.memory_space<vmem>>, vector<8x8xf32>,
    %283 = vector.extract_strided_slice %280 {offsets = [0, 8], sizes = [8, 8], strides = [1, 1]} : vector<8x16xf32> to vector<8x8xf32>
    %c56_97 = arith.constant 56 : index
    %c0_98 = arith.constant 0 : index
    %284 = vector.load %arg4[%c56_97, %c0_98] : memref<64x16xf32, #tpu.memory_space<vmem>>, vector<8x8xf32>
    tpu.vector_store %arg4[%c56_97, %c0_98], %283 {strides = array<i32>} : memref<64x16xf32, #tpu.memory_space<vmem>>, vector<8x8xf32>,
    %285 = vector.extract_strided_slice %249 {offsets = [8, 0], sizes = [8, 64], strides = [1, 1]} : vector<64x64xf32> to vector<8x64xf32>
    %286 = vector.extract_strided_slice %254 {offsets = [48, 0], sizes = [8, 64], strides = [1, 1]} : vector<64x64xf32> to vector<8x64xf32>
    %287 = arith.addf %285, %286 : vector<8x64xf32>
    %cst_99 = arith.constant dense<0.000000e+00> : vector<8x64xf32>
    %288 = tpu.matmul %280, %255, %cst_99 {dimension_numbers = #tpu.dot_dimension_numbers<[1], [0], [0], [1], [0, 0, 1, 1], [], []>} : vector<8x16xf32>, vector<16x64xf32>, vector<8x64xf32> -> vector<8x64xf32>
    %289 = arith.addf %287, %288 : vector<8x64xf32>
    %290 = vector.extract_strided_slice %289 {offsets = [0, 0], sizes = [8, 48], strides = [1, 1]} : vector<8x64xf32> to vector<8x48xf32>
    %cst_100 = arith.constant 5.000000e-01 : f32
    %291 = vector.broadcast %cst_100 : f32 to vector<8x48xf32>
    %292 = arith.mulf %291, %290 : vector<8x48xf32>
    %293 = math.tanh %292 : vector<8x48xf32>
    %cst_101 = arith.constant 5.000000e-01 : f32
    %294 = vector.broadcast %cst_101 : f32 to vector<8x48xf32>
    %295 = arith.mulf %294, %293 : vector<8x48xf32>
    %cst_102 = arith.constant 5.000000e-01 : f32
    %296 = vector.broadcast %cst_102 : f32 to vector<8x48xf32>
    %297 = arith.addf %295, %296 : vector<8x48xf32>
    %298 = vector.extract_strided_slice %289 {offsets = [0, 48], sizes = [8, 16], strides = [1, 1]} : vector<8x64xf32> to vector<8x16xf32>
    %299 = math.tanh %298 : vector<8x16xf32>
    %300 = vector.extract_strided_slice %297 {offsets = [0, 16], sizes = [8, 16], strides = [1, 1]} : vector<8x48xf32> to vector<8x16xf32>
    %301 = arith.mulf %300, %277 : vector<8x16xf32>
    %302 = vector.extract_strided_slice %297 {offsets = [0, 0], sizes = [8, 16], strides = [1, 1]} : vector<8x48xf32> to vector<8x16xf32>
    %303 = arith.mulf %302, %299 : vector<8x16xf32>
    %304 = arith.addf %301, %303 : vector<8x16xf32>
    %305 = vector.extract_strided_slice %297 {offsets = [0, 32], sizes = [8, 16], strides = [1, 1]} : vector<8x48xf32> to vector<8x16xf32>
    %306 = math.tanh %304 : vector<8x16xf32>
    %307 = arith.mulf %305, %306 : vector<8x16xf32>
    %308 = vector.extract_strided_slice %307 {offsets = [0, 0], sizes = [8, 8], strides = [1, 1]} : vector<8x16xf32> to vector<8x8xf32>
    %c8_103 = arith.constant 8 : index
    %c0_104 = arith.constant 0 : index
    %309 = vector.load %arg3[%c8_103, %c0_104] : memref<64x16xf32, #tpu.memory_space<vmem>>, vector<8x8xf32>
    tpu.vector_store %arg3[%c8_103, %c0_104], %308 {strides = array<i32>} : memref<64x16xf32, #tpu.memory_space<vmem>>, vector<8x8xf32>,
    %310 = vector.extract_strided_slice %307 {offsets = [0, 8], sizes = [8, 8], strides = [1, 1]} : vector<8x16xf32> to vector<8x8xf32>
    %c48_105 = arith.constant 48 : index
    %c0_106 = arith.constant 0 : index
    %311 = vector.load %arg4[%c48_105, %c0_106] : memref<64x16xf32, #tpu.memory_space<vmem>>, vector<8x8xf32>
    tpu.vector_store %arg4[%c48_105, %c0_106], %310 {strides = array<i32>} : memref<64x16xf32, #tpu.memory_space<vmem>>, vector<8x8xf32>,
    %312 = vector.extract_strided_slice %249 {offsets = [16, 0], sizes = [8, 64], strides = [1, 1]} : vector<64x64xf32> to vector<8x64xf32>
    %313 = vector.extract_strided_slice %254 {offsets = [40, 0], sizes = [8, 64], strides = [1, 1]} : vector<64x64xf32> to vector<8x64xf32>
    %314 = arith.addf %312, %313 : vector<8x64xf32>
    %cst_107 = arith.constant dense<0.000000e+00> : vector<8x64xf32>
    %315 = tpu.matmul %307, %255, %cst_107 {dimension_numbers = #tpu.dot_dimension_numbers<[1], [0], [0], [1], [0, 0, 1, 1], [], []>} : vector<8x16xf32>, vector<16x64xf32>, vector<8x64xf32> -> vector<8x64xf32>
    %316 = arith.addf %314, %315 : vector<8x64xf32>
    %317 = vector.extract_strided_slice %316 {offsets = [0, 0], sizes = [8, 48], strides = [1, 1]} : vector<8x64xf32> to vector<8x48xf32>
    %cst_108 = arith.constant 5.000000e-01 : f32
    %318 = vector.broadcast %cst_108 : f32 to vector<8x48xf32>
    %319 = arith.mulf %318, %317 : vector<8x48xf32>
    %320 = math.tanh %319 : vector<8x48xf32>
    %cst_109 = arith.constant 5.000000e-01 : f32
    %321 = vector.broadcast %cst_109 : f32 to vector<8x48xf32>
    %322 = arith.mulf %321, %320 : vector<8x48xf32>
    %cst_110 = arith.constant 5.000000e-01 : f32
    %323 = vector.broadcast %cst_110 : f32 to vector<8x48xf32>
    %324 = arith.addf %322, %323 : vector<8x48xf32>
    %325 = vector.extract_strided_slice %316 {offsets = [0, 48], sizes = [8, 16], strides = [1, 1]} : vector<8x64xf32> to vector<8x16xf32>
    %326 = math.tanh %325 : vector<8x16xf32>
    %327 = vector.extract_strided_slice %324 {offsets = [0, 16], sizes = [8, 16], strides = [1, 1]} : vector<8x48xf32> to vector<8x16xf32>
    %328 = arith.mulf %327, %304 : vector<8x16xf32>
    %329 = vector.extract_strided_slice %324 {offsets = [0, 0], sizes = [8, 16], strides = [1, 1]} : vector<8x48xf32> to vector<8x16xf32>
    %330 = arith.mulf %329, %326 : vector<8x16xf32>
    %331 = arith.addf %328, %330 : vector<8x16xf32>
    %332 = vector.extract_strided_slice %324 {offsets = [0, 32], sizes = [8, 16], strides = [1, 1]} : vector<8x48xf32> to vector<8x16xf32>
    %333 = math.tanh %331 : vector<8x16xf32>
    %334 = arith.mulf %332, %333 : vector<8x16xf32>
    %335 = vector.extract_strided_slice %334 {offsets = [0, 0], sizes = [8, 8], strides = [1, 1]} : vector<8x16xf32> to vector<8x8xf32>
    %c16_111 = arith.constant 16 : index
    %c0_112 = arith.constant 0 : index
    %336 = vector.load %arg3[%c16_111, %c0_112] : memref<64x16xf32, #tpu.memory_space<vmem>>, vector<8x8xf32>
    tpu.vector_store %arg3[%c16_111, %c0_112], %335 {strides = array<i32>} : memref<64x16xf32, #tpu.memory_space<vmem>>, vector<8x8xf32>,
    %337 = vector.extract_strided_slice %334 {offsets = [0, 8], sizes = [8, 8], strides = [1, 1]} : vector<8x16xf32> to vector<8x8xf32>
    %c40_113 = arith.constant 40 : index
    %c0_114 = arith.constant 0 : index
    %338 = vector.load %arg4[%c40_113, %c0_114] : memref<64x16xf32, #tpu.memory_space<vmem>>, vector<8x8xf32>
    tpu.vector_store %arg4[%c40_113, %c0_114], %337 {strides = array<i32>} : memref<64x16xf32, #tpu.memory_space<vmem>>, vector<8x8xf32>,
    %339 = vector.extract_strided_slice %249 {offsets = [24, 0], sizes = [8, 64], strides = [1, 1]} : vector<64x64xf32> to vector<8x64xf32>
    %340 = vector.extract_strided_slice %254 {offsets = [32, 0], sizes = [8, 64], strides = [1, 1]} : vector<64x64xf32> to vector<8x64xf32>
    %341 = arith.addf %339, %340 : vector<8x64xf32>
    %cst_115 = arith.constant dense<0.000000e+00> : vector<8x64xf32>
    %342 = tpu.matmul %334, %255, %cst_115 {dimension_numbers = #tpu.dot_dimension_numbers<[1], [0], [0], [1], [0, 0, 1, 1], [], []>} : vector<8x16xf32>, vector<16x64xf32>, vector<8x64xf32> -> vector<8x64xf32>
    %343 = arith.addf %341, %342 : vector<8x64xf32>
    %344 = vector.extract_strided_slice %343 {offsets = [0, 0], sizes = [8, 48], strides = [1, 1]} : vector<8x64xf32> to vector<8x48xf32>
    %cst_116 = arith.constant 5.000000e-01 : f32
    %345 = vector.broadcast %cst_116 : f32 to vector<8x48xf32>
    %346 = arith.mulf %345, %344 : vector<8x48xf32>
    %347 = math.tanh %346 : vector<8x48xf32>
    %cst_117 = arith.constant 5.000000e-01 : f32
    %348 = vector.broadcast %cst_117 : f32 to vector<8x48xf32>
    %349 = arith.mulf %348, %347 : vector<8x48xf32>
    %cst_118 = arith.constant 5.000000e-01 : f32
    %350 = vector.broadcast %cst_118 : f32 to vector<8x48xf32>
    %351 = arith.addf %349, %350 : vector<8x48xf32>
    %352 = vector.extract_strided_slice %343 {offsets = [0, 48], sizes = [8, 16], strides = [1, 1]} : vector<8x64xf32> to vector<8x16xf32>
    %353 = math.tanh %352 : vector<8x16xf32>
    %354 = vector.extract_strided_slice %351 {offsets = [0, 16], sizes = [8, 16], strides = [1, 1]} : vector<8x48xf32> to vector<8x16xf32>
    %355 = arith.mulf %354, %331 : vector<8x16xf32>
    %356 = vector.extract_strided_slice %351 {offsets = [0, 0], sizes = [8, 16], strides = [1, 1]} : vector<8x48xf32> to vector<8x16xf32>
    %357 = arith.mulf %356, %353 : vector<8x16xf32>
    %358 = arith.addf %355, %357 : vector<8x16xf32>
    %359 = vector.extract_strided_slice %351 {offsets = [0, 32], sizes = [8, 16], strides = [1, 1]} : vector<8x48xf32> to vector<8x16xf32>
    %360 = math.tanh %358 : vector<8x16xf32>
    %361 = arith.mulf %359, %360 : vector<8x16xf32>
    %362 = vector.extract_strided_slice %361 {offsets = [0, 0], sizes = [8, 8], strides = [1, 1]} : vector<8x16xf32> to vector<8x8xf32>
    %c24_119 = arith.constant 24 : index
    %c0_120 = arith.constant 0 : index
    %363 = vector.load %arg3[%c24_119, %c0_120] : memref<64x16xf32, #tpu.memory_space<vmem>>, vector<8x8xf32>
    tpu.vector_store %arg3[%c24_119, %c0_120], %362 {strides = array<i32>} : memref<64x16xf32, #tpu.memory_space<vmem>>, vector<8x8xf32>,
    %364 = vector.extract_strided_slice %361 {offsets = [0, 8], sizes = [8, 8], strides = [1, 1]} : vector<8x16xf32> to vector<8x8xf32>
    %c32_121 = arith.constant 32 : index
    %c0_122 = arith.constant 0 : index
    %365 = vector.load %arg4[%c32_121, %c0_122] : memref<64x16xf32, #tpu.memory_space<vmem>>, vector<8x8xf32>
    tpu.vector_store %arg4[%c32_121, %c0_122], %364 {strides = array<i32>} : memref<64x16xf32, #tpu.memory_space<vmem>>, vector<8x8xf32>,
    %366 = vector.extract_strided_slice %249 {offsets = [32, 0], sizes = [8, 64], strides = [1, 1]} : vector<64x64xf32> to vector<8x64xf32>
    %367 = vector.extract_strided_slice %254 {offsets = [24, 0], sizes = [8, 64], strides = [1, 1]} : vector<64x64xf32> to vector<8x64xf32>
    %368 = arith.addf %366, %367 : vector<8x64xf32>
    %cst_123 = arith.constant dense<0.000000e+00> : vector<8x64xf32>
    %369 = tpu.matmul %361, %255, %cst_123 {dimension_numbers = #tpu.dot_dimension_numbers<[1], [0], [0], [1], [0, 0, 1, 1], [], []>} : vector<8x16xf32>, vector<16x64xf32>, vector<8x64xf32> -> vector<8x64xf32>
    %370 = arith.addf %368, %369 : vector<8x64xf32>
    %371 = vector.extract_strided_slice %370 {offsets = [0, 0], sizes = [8, 48], strides = [1, 1]} : vector<8x64xf32> to vector<8x48xf32>
    %cst_124 = arith.constant 5.000000e-01 : f32
    %372 = vector.broadcast %cst_124 : f32 to vector<8x48xf32>
    %373 = arith.mulf %372, %371 : vector<8x48xf32>
    %374 = math.tanh %373 : vector<8x48xf32>
    %cst_125 = arith.constant 5.000000e-01 : f32
    %375 = vector.broadcast %cst_125 : f32 to vector<8x48xf32>
    %376 = arith.mulf %375, %374 : vector<8x48xf32>
    %cst_126 = arith.constant 5.000000e-01 : f32
    %377 = vector.broadcast %cst_126 : f32 to vector<8x48xf32>
    %378 = arith.addf %376, %377 : vector<8x48xf32>
    %379 = vector.extract_strided_slice %370 {offsets = [0, 48], sizes = [8, 16], strides = [1, 1]} : vector<8x64xf32> to vector<8x16xf32>
    %380 = math.tanh %379 : vector<8x16xf32>
    %381 = vector.extract_strided_slice %378 {offsets = [0, 16], sizes = [8, 16], strides = [1, 1]} : vector<8x48xf32> to vector<8x16xf32>
    %382 = arith.mulf %381, %358 : vector<8x16xf32>
    %383 = vector.extract_strided_slice %378 {offsets = [0, 0], sizes = [8, 16], strides = [1, 1]} : vector<8x48xf32> to vector<8x16xf32>
    %384 = arith.mulf %383, %380 : vector<8x16xf32>
    %385 = arith.addf %382, %384 : vector<8x16xf32>
    %386 = vector.extract_strided_slice %378 {offsets = [0, 32], sizes = [8, 16], strides = [1, 1]} : vector<8x48xf32> to vector<8x16xf32>
    %387 = math.tanh %385 : vector<8x16xf32>
    %388 = arith.mulf %386, %387 : vector<8x16xf32>
    %389 = vector.extract_strided_slice %388 {offsets = [0, 0], sizes = [8, 8], strides = [1, 1]} : vector<8x16xf32> to vector<8x8xf32>
    %c32_127 = arith.constant 32 : index
    %c0_128 = arith.constant 0 : index
    %390 = vector.load %arg3[%c32_127, %c0_128] : memref<64x16xf32, #tpu.memory_space<vmem>>, vector<8x8xf32>
    tpu.vector_store %arg3[%c32_127, %c0_128], %389 {strides = array<i32>} : memref<64x16xf32, #tpu.memory_space<vmem>>, vector<8x8xf32>,
    %391 = vector.extract_strided_slice %388 {offsets = [0, 8], sizes = [8, 8], strides = [1, 1]} : vector<8x16xf32> to vector<8x8xf32>
    %c24_129 = arith.constant 24 : index
    %c0_130 = arith.constant 0 : index
    %392 = vector.load %arg4[%c24_129, %c0_130] : memref<64x16xf32, #tpu.memory_space<vmem>>, vector<8x8xf32>
    tpu.vector_store %arg4[%c24_129, %c0_130], %391 {strides = array<i32>} : memref<64x16xf32, #tpu.memory_space<vmem>>, vector<8x8xf32>,
    %393 = vector.extract_strided_slice %249 {offsets = [40, 0], sizes = [8, 64], strides = [1, 1]} : vector<64x64xf32> to vector<8x64xf32>
    %394 = vector.extract_strided_slice %254 {offsets = [16, 0], sizes = [8, 64], strides = [1, 1]} : vector<64x64xf32> to vector<8x64xf32>
    %395 = arith.addf %393, %394 : vector<8x64xf32>
    %cst_131 = arith.constant dense<0.000000e+00> : vector<8x64xf32>
    %396 = tpu.matmul %388, %255, %cst_131 {dimension_numbers = #tpu.dot_dimension_numbers<[1], [0], [0], [1], [0, 0, 1, 1], [], []>} : vector<8x16xf32>, vector<16x64xf32>, vector<8x64xf32> -> vector<8x64xf32>
    %397 = arith.addf %395, %396 : vector<8x64xf32>
    %398 = vector.extract_strided_slice %397 {offsets = [0, 0], sizes = [8, 48], strides = [1, 1]} : vector<8x64xf32> to vector<8x48xf32>
    %cst_132 = arith.constant 5.000000e-01 : f32
    %399 = vector.broadcast %cst_132 : f32 to vector<8x48xf32>
    %400 = arith.mulf %399, %398 : vector<8x48xf32>
    %401 = math.tanh %400 : vector<8x48xf32>
    %cst_133 = arith.constant 5.000000e-01 : f32
    %402 = vector.broadcast %cst_133 : f32 to vector<8x48xf32>
    %403 = arith.mulf %402, %401 : vector<8x48xf32>
    %cst_134 = arith.constant 5.000000e-01 : f32
    %404 = vector.broadcast %cst_134 : f32 to vector<8x48xf32>
    %405 = arith.addf %403, %404 : vector<8x48xf32>
    %406 = vector.extract_strided_slice %397 {offsets = [0, 48], sizes = [8, 16], strides = [1, 1]} : vector<8x64xf32> to vector<8x16xf32>
    %407 = math.tanh %406 : vector<8x16xf32>
    %408 = vector.extract_strided_slice %405 {offsets = [0, 16], sizes = [8, 16], strides = [1, 1]} : vector<8x48xf32> to vector<8x16xf32>
    %409 = arith.mulf %408, %385 : vector<8x16xf32>
    %410 = vector.extract_strided_slice %405 {offsets = [0, 0], sizes = [8, 16], strides = [1, 1]} : vector<8x48xf32> to vector<8x16xf32>
    %411 = arith.mulf %410, %407 : vector<8x16xf32>
    %412 = arith.addf %409, %411 : vector<8x16xf32>
    %413 = vector.extract_strided_slice %405 {offsets = [0, 32], sizes = [8, 16], strides = [1, 1]} : vector<8x48xf32> to vector<8x16xf32>
    %414 = math.tanh %412 : vector<8x16xf32>
    %415 = arith.mulf %413, %414 : vector<8x16xf32>
    %416 = vector.extract_strided_slice %415 {offsets = [0, 0], sizes = [8, 8], strides = [1, 1]} : vector<8x16xf32> to vector<8x8xf32>
    %c40_135 = arith.constant 40 : index
    %c0_136 = arith.constant 0 : index
    %417 = vector.load %arg3[%c40_135, %c0_136] : memref<64x16xf32, #tpu.memory_space<vmem>>, vector<8x8xf32>
    tpu.vector_store %arg3[%c40_135, %c0_136], %416 {strides = array<i32>} : memref<64x16xf32, #tpu.memory_space<vmem>>, vector<8x8xf32>,
    %418 = vector.extract_strided_slice %415 {offsets = [0, 8], sizes = [8, 8], strides = [1, 1]} : vector<8x16xf32> to vector<8x8xf32>
    %c16_137 = arith.constant 16 : index
    %c0_138 = arith.constant 0 : index
    %419 = vector.load %arg4[%c16_137, %c0_138] : memref<64x16xf32, #tpu.memory_space<vmem>>, vector<8x8xf32>
    tpu.vector_store %arg4[%c16_137, %c0_138], %418 {strides = array<i32>} : memref<64x16xf32, #tpu.memory_space<vmem>>, vector<8x8xf32>,
    %420 = vector.extract_strided_slice %249 {offsets = [48, 0], sizes = [8, 64], strides = [1, 1]} : vector<64x64xf32> to vector<8x64xf32>
    %421 = vector.extract_strided_slice %254 {offsets = [8, 0], sizes = [8, 64], strides = [1, 1]} : vector<64x64xf32> to vector<8x64xf32>
    %422 = arith.addf %420, %421 : vector<8x64xf32>
    %cst_139 = arith.constant dense<0.000000e+00> : vector<8x64xf32>
    %423 = tpu.matmul %415, %255, %cst_139 {dimension_numbers = #tpu.dot_dimension_numbers<[1], [0], [0], [1], [0, 0, 1, 1], [], []>} : vector<8x16xf32>, vector<16x64xf32>, vector<8x64xf32> -> vector<8x64xf32>
    %424 = arith.addf %422, %423 : vector<8x64xf32>
    %425 = vector.extract_strided_slice %424 {offsets = [0, 0], sizes = [8, 48], strides = [1, 1]} : vector<8x64xf32> to vector<8x48xf32>
    %cst_140 = arith.constant 5.000000e-01 : f32
    %426 = vector.broadcast %cst_140 : f32 to vector<8x48xf32>
    %427 = arith.mulf %426, %425 : vector<8x48xf32>
    %428 = math.tanh %427 : vector<8x48xf32>
    %cst_141 = arith.constant 5.000000e-01 : f32
    %429 = vector.broadcast %cst_141 : f32 to vector<8x48xf32>
    %430 = arith.mulf %429, %428 : vector<8x48xf32>
    %cst_142 = arith.constant 5.000000e-01 : f32
    %431 = vector.broadcast %cst_142 : f32 to vector<8x48xf32>
    %432 = arith.addf %430, %431 : vector<8x48xf32>
    %433 = vector.extract_strided_slice %424 {offsets = [0, 48], sizes = [8, 16], strides = [1, 1]} : vector<8x64xf32> to vector<8x16xf32>
    %434 = math.tanh %433 : vector<8x16xf32>
    %435 = vector.extract_strided_slice %432 {offsets = [0, 16], sizes = [8, 16], strides = [1, 1]} : vector<8x48xf32> to vector<8x16xf32>
    %436 = arith.mulf %435, %412 : vector<8x16xf32>
    %437 = vector.extract_strided_slice %432 {offsets = [0, 0], sizes = [8, 16], strides = [1, 1]} : vector<8x48xf32> to vector<8x16xf32>
    %438 = arith.mulf %437, %434 : vector<8x16xf32>
    %439 = arith.addf %436, %438 : vector<8x16xf32>
    %440 = vector.extract_strided_slice %432 {offsets = [0, 32], sizes = [8, 16], strides = [1, 1]} : vector<8x48xf32> to vector<8x16xf32>
    %441 = math.tanh %439 : vector<8x16xf32>
    %442 = arith.mulf %440, %441 : vector<8x16xf32>
    %443 = vector.extract_strided_slice %442 {offsets = [0, 0], sizes = [8, 8], strides = [1, 1]} : vector<8x16xf32> to vector<8x8xf32>
    %c48_143 = arith.constant 48 : index
    %c0_144 = arith.constant 0 : index
    %444 = vector.load %arg3[%c48_143, %c0_144] : memref<64x16xf32, #tpu.memory_space<vmem>>, vector<8x8xf32>
    tpu.vector_store %arg3[%c48_143, %c0_144], %443 {strides = array<i32>} : memref<64x16xf32, #tpu.memory_space<vmem>>, vector<8x8xf32>,
    %445 = vector.extract_strided_slice %442 {offsets = [0, 8], sizes = [8, 8], strides = [1, 1]} : vector<8x16xf32> to vector<8x8xf32>
    %c8_145 = arith.constant 8 : index
    %c0_146 = arith.constant 0 : index
    %446 = vector.load %arg4[%c8_145, %c0_146] : memref<64x16xf32, #tpu.memory_space<vmem>>, vector<8x8xf32>
    tpu.vector_store %arg4[%c8_145, %c0_146], %445 {strides = array<i32>} : memref<64x16xf32, #tpu.memory_space<vmem>>, vector<8x8xf32>,
    %447 = vector.extract_strided_slice %249 {offsets = [56, 0], sizes = [8, 64], strides = [1, 1]} : vector<64x64xf32> to vector<8x64xf32>
    %448 = vector.extract_strided_slice %254 {offsets = [0, 0], sizes = [8, 64], strides = [1, 1]} : vector<64x64xf32> to vector<8x64xf32>
    %449 = arith.addf %447, %448 : vector<8x64xf32>
    %cst_147 = arith.constant dense<0.000000e+00> : vector<8x64xf32>
    %450 = tpu.matmul %442, %255, %cst_147 {dimension_numbers = #tpu.dot_dimension_numbers<[1], [0], [0], [1], [0, 0, 1, 1], [], []>} : vector<8x16xf32>, vector<16x64xf32>, vector<8x64xf32> -> vector<8x64xf32>
    %451 = arith.addf %449, %450 : vector<8x64xf32>
    %452 = vector.extract_strided_slice %451 {offsets = [0, 0], sizes = [8, 48], strides = [1, 1]} : vector<8x64xf32> to vector<8x48xf32>
    %cst_148 = arith.constant 5.000000e-01 : f32
    %453 = vector.broadcast %cst_148 : f32 to vector<8x48xf32>
    %454 = arith.mulf %453, %452 : vector<8x48xf32>
    %455 = math.tanh %454 : vector<8x48xf32>
    %cst_149 = arith.constant 5.000000e-01 : f32
    %456 = vector.broadcast %cst_149 : f32 to vector<8x48xf32>
    %457 = arith.mulf %456, %455 : vector<8x48xf32>
    %cst_150 = arith.constant 5.000000e-01 : f32
    %458 = vector.broadcast %cst_150 : f32 to vector<8x48xf32>
    %459 = arith.addf %457, %458 : vector<8x48xf32>
    %460 = vector.extract_strided_slice %451 {offsets = [0, 48], sizes = [8, 16], strides = [1, 1]} : vector<8x64xf32> to vector<8x16xf32>
    %461 = math.tanh %460 : vector<8x16xf32>
    %462 = vector.extract_strided_slice %459 {offsets = [0, 16], sizes = [8, 16], strides = [1, 1]} : vector<8x48xf32> to vector<8x16xf32>
    %463 = arith.mulf %462, %439 : vector<8x16xf32>
    %464 = vector.extract_strided_slice %459 {offsets = [0, 0], sizes = [8, 16], strides = [1, 1]} : vector<8x48xf32> to vector<8x16xf32>
    %465 = arith.mulf %464, %461 : vector<8x16xf32>
    %466 = arith.addf %463, %465 : vector<8x16xf32>
    %467 = vector.extract_strided_slice %459 {offsets = [0, 32], sizes = [8, 16], strides = [1, 1]} : vector<8x48xf32> to vector<8x16xf32>
    %468 = math.tanh %466 : vector<8x16xf32>
    %469 = arith.mulf %467, %468 : vector<8x16xf32>
    %470 = vector.extract_strided_slice %469 {offsets = [0, 0], sizes = [8, 8], strides = [1, 1]} : vector<8x16xf32> to vector<8x8xf32>
    %c56_151 = arith.constant 56 : index
    %c0_152 = arith.constant 0 : index
    %471 = vector.load %arg3[%c56_151, %c0_152] : memref<64x16xf32, #tpu.memory_space<vmem>>, vector<8x8xf32>
    tpu.vector_store %arg3[%c56_151, %c0_152], %470 {strides = array<i32>} : memref<64x16xf32, #tpu.memory_space<vmem>>, vector<8x8xf32>,
    %472 = vector.extract_strided_slice %469 {offsets = [0, 8], sizes = [8, 8], strides = [1, 1]} : vector<8x16xf32> to vector<8x8xf32>
    %c0_153 = arith.constant 0 : index
    %c0_154 = arith.constant 0 : index
    %473 = vector.load %arg4[%c0_153, %c0_154] : memref<64x16xf32, #tpu.memory_space<vmem>>, vector<8x8xf32>
    tpu.vector_store %arg4[%c0_153, %c0_154], %472 {strides = array<i32>} : memref<64x16xf32, #tpu.memory_space<vmem>>, vector<8x8xf32>,
    %c0_155 = arith.constant 0 : index
    %c0_156 = arith.constant 0 : index
    %474 = vector.load %arg3[%c0_155, %c0_156] : memref<64x16xf32, #tpu.memory_space<vmem>>, vector<64x8xf32>
    %c0_157 = arith.constant 0 : index
    %c0_158 = arith.constant 0 : index
    %475 = vector.load %arg4[%c0_157, %c0_158] : memref<64x16xf32, #tpu.memory_space<vmem>>, vector<64x8xf32>
    %c232 = arith.constant 232 : index
    %c0_159 = arith.constant 0 : index
    %476 = vector.load %arg1[%c232, %c0_159] : memref<312x128xf32, #tpu.memory_space<vmem>>, vector<8x32xf32>
    %cst_160 = arith.constant dense<0.000000e+00> : vector<64x32xf32>
    %477 = tpu.matmul %474, %476, %cst_160 {dimension_numbers = #tpu.dot_dimension_numbers<[1], [0], [0], [1], [0, 0, 1, 1], [], []>} : vector<64x8xf32>, vector<8x32xf32>, vector<64x32xf32> -> vector<64x32xf32>
    %c240 = arith.constant 240 : index
    %c0_161 = arith.constant 0 : index
    %478 = vector.load %arg1[%c240, %c0_161] : memref<312x128xf32, #tpu.memory_space<vmem>>, vector<8x32xf32>
    %cst_162 = arith.constant dense<0.000000e+00> : vector<64x32xf32>
    %479 = tpu.matmul %475, %478, %cst_162 {dimension_numbers = #tpu.dot_dimension_numbers<[1], [0], [0], [1], [0, 0, 1, 1], [], []>} : vector<64x8xf32>, vector<8x32xf32>, vector<64x32xf32> -> vector<64x32xf32>
    %480 = arith.addf %477, %479 : vector<64x32xf32>
    %c224 = arith.constant 224 : index
    %c0_163 = arith.constant 0 : index
    %481 = vector.load %arg1[%c224, %c0_163] : memref<312x128xf32, #tpu.memory_space<vmem>>, vector<1x32xf32>
    %482 = vector.broadcast %481 : vector<1x32xf32> to vector<64x32xf32>
    %483 = arith.addf %480, %482 : vector<64x32xf32>
    %c248 = arith.constant 248 : index
    %c0_164 = arith.constant 0 : index
    %484 = vector.load %arg1[%c248, %c0_164] : memref<312x128xf32, #tpu.memory_space<vmem>>, vector<8x32xf32>
    %cst_165 = arith.constant dense<0.000000e+00> : vector<64x32xf32>
    %485 = tpu.matmul %474, %484, %cst_165 {dimension_numbers = #tpu.dot_dimension_numbers<[1], [0], [0], [1], [0, 0, 1, 1], [], []>} : vector<64x8xf32>, vector<8x32xf32>, vector<64x32xf32> -> vector<64x32xf32>
    %c256 = arith.constant 256 : index
    %c0_166 = arith.constant 0 : index
    %486 = vector.load %arg1[%c256, %c0_166] : memref<312x128xf32, #tpu.memory_space<vmem>>, vector<8x32xf32>
    %cst_167 = arith.constant dense<0.000000e+00> : vector<64x32xf32>
    %487 = tpu.matmul %475, %486, %cst_167 {dimension_numbers = #tpu.dot_dimension_numbers<[1], [0], [0], [1], [0, 0, 1, 1], [], []>} : vector<64x8xf32>, vector<8x32xf32>, vector<64x32xf32> -> vector<64x32xf32>
    %488 = arith.addf %485, %487 : vector<64x32xf32>
    %c216 = arith.constant 216 : index
    %c0_168 = arith.constant 0 : index
    %489 = vector.load %arg1[%c216, %c0_168] : memref<312x128xf32, #tpu.memory_space<vmem>>, vector<8x32xf32>
    %cst_169 = arith.constant 0.000000e+00 : f32
    %490 = vector.broadcast %cst_169 : f32 to vector<8x8xf32>
    %cst_170 = arith.constant 0.000000e+00 : f32
    %491 = vector.broadcast %cst_170 : f32 to vector<8x8xf32>
    %492 = vector.extract_strided_slice %483 {offsets = [0, 0], sizes = [8, 32], strides = [1, 1]} : vector<64x32xf32> to vector<8x32xf32>
    %493 = vector.extract_strided_slice %488 {offsets = [56, 0], sizes = [8, 32], strides = [1, 1]} : vector<64x32xf32> to vector<8x32xf32>
    %494 = arith.addf %492, %493 : vector<8x32xf32>
    %cst_171 = arith.constant dense<0.000000e+00> : vector<8x32xf32>
    %495 = tpu.matmul %490, %489, %cst_171 {dimension_numbers = #tpu.dot_dimension_numbers<[1], [0], [0], [1], [0, 0, 1, 1], [], []>} : vector<8x8xf32>, vector<8x32xf32>, vector<8x32xf32> -> vector<8x32xf32>
    %496 = arith.addf %494, %495 : vector<8x32xf32>
    %497 = vector.extract_strided_slice %496 {offsets = [0, 0], sizes = [8, 24], strides = [1, 1]} : vector<8x32xf32> to vector<8x24xf32>
    %cst_172 = arith.constant 5.000000e-01 : f32
    %498 = vector.broadcast %cst_172 : f32 to vector<8x24xf32>
    %499 = arith.mulf %498, %497 : vector<8x24xf32>
    %500 = math.tanh %499 : vector<8x24xf32>
    %cst_173 = arith.constant 5.000000e-01 : f32
    %501 = vector.broadcast %cst_173 : f32 to vector<8x24xf32>
    %502 = arith.mulf %501, %500 : vector<8x24xf32>
    %cst_174 = arith.constant 5.000000e-01 : f32
    %503 = vector.broadcast %cst_174 : f32 to vector<8x24xf32>
    %504 = arith.addf %502, %503 : vector<8x24xf32>
    %505 = vector.extract_strided_slice %496 {offsets = [0, 24], sizes = [8, 8], strides = [1, 1]} : vector<8x32xf32> to vector<8x8xf32>
    %506 = math.tanh %505 : vector<8x8xf32>
    %507 = vector.extract_strided_slice %504 {offsets = [0, 8], sizes = [8, 8], strides = [1, 1]} : vector<8x24xf32> to vector<8x8xf32>
    %508 = arith.mulf %507, %491 : vector<8x8xf32>
    %509 = vector.extract_strided_slice %504 {offsets = [0, 0], sizes = [8, 8], strides = [1, 1]} : vector<8x24xf32> to vector<8x8xf32>
    %510 = arith.mulf %509, %506 : vector<8x8xf32>
    %511 = arith.addf %508, %510 : vector<8x8xf32>
    %512 = vector.extract_strided_slice %504 {offsets = [0, 16], sizes = [8, 8], strides = [1, 1]} : vector<8x24xf32> to vector<8x8xf32>
    %513 = math.tanh %511 : vector<8x8xf32>
    %514 = arith.mulf %512, %513 : vector<8x8xf32>
    %515 = vector.extract_strided_slice %514 {offsets = [0, 0], sizes = [8, 4], strides = [1, 1]} : vector<8x8xf32> to vector<8x4xf32>
    %c0_175 = arith.constant 0 : index
    %c0_176 = arith.constant 0 : index
    %516 = vector.load %arg3[%c0_175, %c0_176] : memref<64x16xf32, #tpu.memory_space<vmem>>, vector<8x4xf32>
    tpu.vector_store %arg3[%c0_175, %c0_176], %515 {strides = array<i32>} : memref<64x16xf32, #tpu.memory_space<vmem>>, vector<8x4xf32>,
    %517 = vector.extract_strided_slice %514 {offsets = [0, 4], sizes = [8, 4], strides = [1, 1]} : vector<8x8xf32> to vector<8x4xf32>
    %c56_177 = arith.constant 56 : index
    %c0_178 = arith.constant 0 : index
    %518 = vector.load %arg4[%c56_177, %c0_178] : memref<64x16xf32, #tpu.memory_space<vmem>>, vector<8x4xf32>
    tpu.vector_store %arg4[%c56_177, %c0_178], %517 {strides = array<i32>} : memref<64x16xf32, #tpu.memory_space<vmem>>, vector<8x4xf32>,
    %519 = vector.extract_strided_slice %483 {offsets = [8, 0], sizes = [8, 32], strides = [1, 1]} : vector<64x32xf32> to vector<8x32xf32>
    %520 = vector.extract_strided_slice %488 {offsets = [48, 0], sizes = [8, 32], strides = [1, 1]} : vector<64x32xf32> to vector<8x32xf32>
    %521 = arith.addf %519, %520 : vector<8x32xf32>
    %cst_179 = arith.constant dense<0.000000e+00> : vector<8x32xf32>
    %522 = tpu.matmul %514, %489, %cst_179 {dimension_numbers = #tpu.dot_dimension_numbers<[1], [0], [0], [1], [0, 0, 1, 1], [], []>} : vector<8x8xf32>, vector<8x32xf32>, vector<8x32xf32> -> vector<8x32xf32>
    %523 = arith.addf %521, %522 : vector<8x32xf32>
    %524 = vector.extract_strided_slice %523 {offsets = [0, 0], sizes = [8, 24], strides = [1, 1]} : vector<8x32xf32> to vector<8x24xf32>
    %cst_180 = arith.constant 5.000000e-01 : f32
    %525 = vector.broadcast %cst_180 : f32 to vector<8x24xf32>
    %526 = arith.mulf %525, %524 : vector<8x24xf32>
    %527 = math.tanh %526 : vector<8x24xf32>
    %cst_181 = arith.constant 5.000000e-01 : f32
    %528 = vector.broadcast %cst_181 : f32 to vector<8x24xf32>
    %529 = arith.mulf %528, %527 : vector<8x24xf32>
    %cst_182 = arith.constant 5.000000e-01 : f32
    %530 = vector.broadcast %cst_182 : f32 to vector<8x24xf32>
    %531 = arith.addf %529, %530 : vector<8x24xf32>
    %532 = vector.extract_strided_slice %523 {offsets = [0, 24], sizes = [8, 8], strides = [1, 1]} : vector<8x32xf32> to vector<8x8xf32>
    %533 = math.tanh %532 : vector<8x8xf32>
    %534 = vector.extract_strided_slice %531 {offsets = [0, 8], sizes = [8, 8], strides = [1, 1]} : vector<8x24xf32> to vector<8x8xf32>
    %535 = arith.mulf %534, %511 : vector<8x8xf32>
    %536 = vector.extract_strided_slice %531 {offsets = [0, 0], sizes = [8, 8], strides = [1, 1]} : vector<8x24xf32> to vector<8x8xf32>
    %537 = arith.mulf %536, %533 : vector<8x8xf32>
    %538 = arith.addf %535, %537 : vector<8x8xf32>
    %539 = vector.extract_strided_slice %531 {offsets = [0, 16], sizes = [8, 8], strides = [1, 1]} : vector<8x24xf32> to vector<8x8xf32>
    %540 = math.tanh %538 : vector<8x8xf32>
    %541 = arith.mulf %539, %540 : vector<8x8xf32>
    %542 = vector.extract_strided_slice %541 {offsets = [0, 0], sizes = [8, 4], strides = [1, 1]} : vector<8x8xf32> to vector<8x4xf32>
    %c8_183 = arith.constant 8 : index
    %c0_184 = arith.constant 0 : index
    %543 = vector.load %arg3[%c8_183, %c0_184] : memref<64x16xf32, #tpu.memory_space<vmem>>, vector<8x4xf32>
    tpu.vector_store %arg3[%c8_183, %c0_184], %542 {strides = array<i32>} : memref<64x16xf32, #tpu.memory_space<vmem>>, vector<8x4xf32>,
    %544 = vector.extract_strided_slice %541 {offsets = [0, 4], sizes = [8, 4], strides = [1, 1]} : vector<8x8xf32> to vector<8x4xf32>
    %c48_185 = arith.constant 48 : index
    %c0_186 = arith.constant 0 : index
    %545 = vector.load %arg4[%c48_185, %c0_186] : memref<64x16xf32, #tpu.memory_space<vmem>>, vector<8x4xf32>
    tpu.vector_store %arg4[%c48_185, %c0_186], %544 {strides = array<i32>} : memref<64x16xf32, #tpu.memory_space<vmem>>, vector<8x4xf32>,
    %546 = vector.extract_strided_slice %483 {offsets = [16, 0], sizes = [8, 32], strides = [1, 1]} : vector<64x32xf32> to vector<8x32xf32>
    %547 = vector.extract_strided_slice %488 {offsets = [40, 0], sizes = [8, 32], strides = [1, 1]} : vector<64x32xf32> to vector<8x32xf32>
    %548 = arith.addf %546, %547 : vector<8x32xf32>
    %cst_187 = arith.constant dense<0.000000e+00> : vector<8x32xf32>
    %549 = tpu.matmul %541, %489, %cst_187 {dimension_numbers = #tpu.dot_dimension_numbers<[1], [0], [0], [1], [0, 0, 1, 1], [], []>} : vector<8x8xf32>, vector<8x32xf32>, vector<8x32xf32> -> vector<8x32xf32>
    %550 = arith.addf %548, %549 : vector<8x32xf32>
    %551 = vector.extract_strided_slice %550 {offsets = [0, 0], sizes = [8, 24], strides = [1, 1]} : vector<8x32xf32> to vector<8x24xf32>
    %cst_188 = arith.constant 5.000000e-01 : f32
    %552 = vector.broadcast %cst_188 : f32 to vector<8x24xf32>
    %553 = arith.mulf %552, %551 : vector<8x24xf32>
    %554 = math.tanh %553 : vector<8x24xf32>
    %cst_189 = arith.constant 5.000000e-01 : f32
    %555 = vector.broadcast %cst_189 : f32 to vector<8x24xf32>
    %556 = arith.mulf %555, %554 : vector<8x24xf32>
    %cst_190 = arith.constant 5.000000e-01 : f32
    %557 = vector.broadcast %cst_190 : f32 to vector<8x24xf32>
    %558 = arith.addf %556, %557 : vector<8x24xf32>
    %559 = vector.extract_strided_slice %550 {offsets = [0, 24], sizes = [8, 8], strides = [1, 1]} : vector<8x32xf32> to vector<8x8xf32>
    %560 = math.tanh %559 : vector<8x8xf32>
    %561 = vector.extract_strided_slice %558 {offsets = [0, 8], sizes = [8, 8], strides = [1, 1]} : vector<8x24xf32> to vector<8x8xf32>
    %562 = arith.mulf %561, %538 : vector<8x8xf32>
    %563 = vector.extract_strided_slice %558 {offsets = [0, 0], sizes = [8, 8], strides = [1, 1]} : vector<8x24xf32> to vector<8x8xf32>
    %564 = arith.mulf %563, %560 : vector<8x8xf32>
    %565 = arith.addf %562, %564 : vector<8x8xf32>
    %566 = vector.extract_strided_slice %558 {offsets = [0, 16], sizes = [8, 8], strides = [1, 1]} : vector<8x24xf32> to vector<8x8xf32>
    %567 = math.tanh %565 : vector<8x8xf32>
    %568 = arith.mulf %566, %567 : vector<8x8xf32>
    %569 = vector.extract_strided_slice %568 {offsets = [0, 0], sizes = [8, 4], strides = [1, 1]} : vector<8x8xf32> to vector<8x4xf32>
    %c16_191 = arith.constant 16 : index
    %c0_192 = arith.constant 0 : index
    %570 = vector.load %arg3[%c16_191, %c0_192] : memref<64x16xf32, #tpu.memory_space<vmem>>, vector<8x4xf32>
    tpu.vector_store %arg3[%c16_191, %c0_192], %569 {strides = array<i32>} : memref<64x16xf32, #tpu.memory_space<vmem>>, vector<8x4xf32>,
    %571 = vector.extract_strided_slice %568 {offsets = [0, 4], sizes = [8, 4], strides = [1, 1]} : vector<8x8xf32> to vector<8x4xf32>
    %c40_193 = arith.constant 40 : index
    %c0_194 = arith.constant 0 : index
    %572 = vector.load %arg4[%c40_193, %c0_194] : memref<64x16xf32, #tpu.memory_space<vmem>>, vector<8x4xf32>
    tpu.vector_store %arg4[%c40_193, %c0_194], %571 {strides = array<i32>} : memref<64x16xf32, #tpu.memory_space<vmem>>, vector<8x4xf32>,
    %573 = vector.extract_strided_slice %483 {offsets = [24, 0], sizes = [8, 32], strides = [1, 1]} : vector<64x32xf32> to vector<8x32xf32>
    %574 = vector.extract_strided_slice %488 {offsets = [32, 0], sizes = [8, 32], strides = [1, 1]} : vector<64x32xf32> to vector<8x32xf32>
    %575 = arith.addf %573, %574 : vector<8x32xf32>
    %cst_195 = arith.constant dense<0.000000e+00> : vector<8x32xf32>
    %576 = tpu.matmul %568, %489, %cst_195 {dimension_numbers = #tpu.dot_dimension_numbers<[1], [0], [0], [1], [0, 0, 1, 1], [], []>} : vector<8x8xf32>, vector<8x32xf32>, vector<8x32xf32> -> vector<8x32xf32>
    %577 = arith.addf %575, %576 : vector<8x32xf32>
    %578 = vector.extract_strided_slice %577 {offsets = [0, 0], sizes = [8, 24], strides = [1, 1]} : vector<8x32xf32> to vector<8x24xf32>
    %cst_196 = arith.constant 5.000000e-01 : f32
    %579 = vector.broadcast %cst_196 : f32 to vector<8x24xf32>
    %580 = arith.mulf %579, %578 : vector<8x24xf32>
    %581 = math.tanh %580 : vector<8x24xf32>
    %cst_197 = arith.constant 5.000000e-01 : f32
    %582 = vector.broadcast %cst_197 : f32 to vector<8x24xf32>
    %583 = arith.mulf %582, %581 : vector<8x24xf32>
    %cst_198 = arith.constant 5.000000e-01 : f32
    %584 = vector.broadcast %cst_198 : f32 to vector<8x24xf32>
    %585 = arith.addf %583, %584 : vector<8x24xf32>
    %586 = vector.extract_strided_slice %577 {offsets = [0, 24], sizes = [8, 8], strides = [1, 1]} : vector<8x32xf32> to vector<8x8xf32>
    %587 = math.tanh %586 : vector<8x8xf32>
    %588 = vector.extract_strided_slice %585 {offsets = [0, 8], sizes = [8, 8], strides = [1, 1]} : vector<8x24xf32> to vector<8x8xf32>
    %589 = arith.mulf %588, %565 : vector<8x8xf32>
    %590 = vector.extract_strided_slice %585 {offsets = [0, 0], sizes = [8, 8], strides = [1, 1]} : vector<8x24xf32> to vector<8x8xf32>
    %591 = arith.mulf %590, %587 : vector<8x8xf32>
    %592 = arith.addf %589, %591 : vector<8x8xf32>
    %593 = vector.extract_strided_slice %585 {offsets = [0, 16], sizes = [8, 8], strides = [1, 1]} : vector<8x24xf32> to vector<8x8xf32>
    %594 = math.tanh %592 : vector<8x8xf32>
    %595 = arith.mulf %593, %594 : vector<8x8xf32>
    %596 = vector.extract_strided_slice %595 {offsets = [0, 0], sizes = [8, 4], strides = [1, 1]} : vector<8x8xf32> to vector<8x4xf32>
    %c24_199 = arith.constant 24 : index
    %c0_200 = arith.constant 0 : index
    %597 = vector.load %arg3[%c24_199, %c0_200] : memref<64x16xf32, #tpu.memory_space<vmem>>, vector<8x4xf32>
    tpu.vector_store %arg3[%c24_199, %c0_200], %596 {strides = array<i32>} : memref<64x16xf32, #tpu.memory_space<vmem>>, vector<8x4xf32>,
    %598 = vector.extract_strided_slice %595 {offsets = [0, 4], sizes = [8, 4], strides = [1, 1]} : vector<8x8xf32> to vector<8x4xf32>
    %c32_201 = arith.constant 32 : index
    %c0_202 = arith.constant 0 : index
    %599 = vector.load %arg4[%c32_201, %c0_202] : memref<64x16xf32, #tpu.memory_space<vmem>>, vector<8x4xf32>
    tpu.vector_store %arg4[%c32_201, %c0_202], %598 {strides = array<i32>} : memref<64x16xf32, #tpu.memory_space<vmem>>, vector<8x4xf32>,
    %600 = vector.extract_strided_slice %483 {offsets = [32, 0], sizes = [8, 32], strides = [1, 1]} : vector<64x32xf32> to vector<8x32xf32>
    %601 = vector.extract_strided_slice %488 {offsets = [24, 0], sizes = [8, 32], strides = [1, 1]} : vector<64x32xf32> to vector<8x32xf32>
    %602 = arith.addf %600, %601 : vector<8x32xf32>
    %cst_203 = arith.constant dense<0.000000e+00> : vector<8x32xf32>
    %603 = tpu.matmul %595, %489, %cst_203 {dimension_numbers = #tpu.dot_dimension_numbers<[1], [0], [0], [1], [0, 0, 1, 1], [], []>} : vector<8x8xf32>, vector<8x32xf32>, vector<8x32xf32> -> vector<8x32xf32>
    %604 = arith.addf %602, %603 : vector<8x32xf32>
    %605 = vector.extract_strided_slice %604 {offsets = [0, 0], sizes = [8, 24], strides = [1, 1]} : vector<8x32xf32> to vector<8x24xf32>
    %cst_204 = arith.constant 5.000000e-01 : f32
    %606 = vector.broadcast %cst_204 : f32 to vector<8x24xf32>
    %607 = arith.mulf %606, %605 : vector<8x24xf32>
    %608 = math.tanh %607 : vector<8x24xf32>
    %cst_205 = arith.constant 5.000000e-01 : f32
    %609 = vector.broadcast %cst_205 : f32 to vector<8x24xf32>
    %610 = arith.mulf %609, %608 : vector<8x24xf32>
    %cst_206 = arith.constant 5.000000e-01 : f32
    %611 = vector.broadcast %cst_206 : f32 to vector<8x24xf32>
    %612 = arith.addf %610, %611 : vector<8x24xf32>
    %613 = vector.extract_strided_slice %604 {offsets = [0, 24], sizes = [8, 8], strides = [1, 1]} : vector<8x32xf32> to vector<8x8xf32>
    %614 = math.tanh %613 : vector<8x8xf32>
    %615 = vector.extract_strided_slice %612 {offsets = [0, 8], sizes = [8, 8], strides = [1, 1]} : vector<8x24xf32> to vector<8x8xf32>
    %616 = arith.mulf %615, %592 : vector<8x8xf32>
    %617 = vector.extract_strided_slice %612 {offsets = [0, 0], sizes = [8, 8], strides = [1, 1]} : vector<8x24xf32> to vector<8x8xf32>
    %618 = arith.mulf %617, %614 : vector<8x8xf32>
    %619 = arith.addf %616, %618 : vector<8x8xf32>
    %620 = vector.extract_strided_slice %612 {offsets = [0, 16], sizes = [8, 8], strides = [1, 1]} : vector<8x24xf32> to vector<8x8xf32>
    %621 = math.tanh %619 : vector<8x8xf32>
    %622 = arith.mulf %620, %621 : vector<8x8xf32>
    %623 = vector.extract_strided_slice %622 {offsets = [0, 0], sizes = [8, 4], strides = [1, 1]} : vector<8x8xf32> to vector<8x4xf32>
    %c32_207 = arith.constant 32 : index
    %c0_208 = arith.constant 0 : index
    %624 = vector.load %arg3[%c32_207, %c0_208] : memref<64x16xf32, #tpu.memory_space<vmem>>, vector<8x4xf32>
    tpu.vector_store %arg3[%c32_207, %c0_208], %623 {strides = array<i32>} : memref<64x16xf32, #tpu.memory_space<vmem>>, vector<8x4xf32>,
    %625 = vector.extract_strided_slice %622 {offsets = [0, 4], sizes = [8, 4], strides = [1, 1]} : vector<8x8xf32> to vector<8x4xf32>
    %c24_209 = arith.constant 24 : index
    %c0_210 = arith.constant 0 : index
    %626 = vector.load %arg4[%c24_209, %c0_210] : memref<64x16xf32, #tpu.memory_space<vmem>>, vector<8x4xf32>
    tpu.vector_store %arg4[%c24_209, %c0_210], %625 {strides = array<i32>} : memref<64x16xf32, #tpu.memory_space<vmem>>, vector<8x4xf32>,
    %627 = vector.extract_strided_slice %483 {offsets = [40, 0], sizes = [8, 32], strides = [1, 1]} : vector<64x32xf32> to vector<8x32xf32>
    %628 = vector.extract_strided_slice %488 {offsets = [16, 0], sizes = [8, 32], strides = [1, 1]} : vector<64x32xf32> to vector<8x32xf32>
    %629 = arith.addf %627, %628 : vector<8x32xf32>
    %cst_211 = arith.constant dense<0.000000e+00> : vector<8x32xf32>
    %630 = tpu.matmul %622, %489, %cst_211 {dimension_numbers = #tpu.dot_dimension_numbers<[1], [0], [0], [1], [0, 0, 1, 1], [], []>} : vector<8x8xf32>, vector<8x32xf32>, vector<8x32xf32> -> vector<8x32xf32>
    %631 = arith.addf %629, %630 : vector<8x32xf32>
    %632 = vector.extract_strided_slice %631 {offsets = [0, 0], sizes = [8, 24], strides = [1, 1]} : vector<8x32xf32> to vector<8x24xf32>
    %cst_212 = arith.constant 5.000000e-01 : f32
    %633 = vector.broadcast %cst_212 : f32 to vector<8x24xf32>
    %634 = arith.mulf %633, %632 : vector<8x24xf32>
    %635 = math.tanh %634 : vector<8x24xf32>
    %cst_213 = arith.constant 5.000000e-01 : f32
    %636 = vector.broadcast %cst_213 : f32 to vector<8x24xf32>
    %637 = arith.mulf %636, %635 : vector<8x24xf32>
    %cst_214 = arith.constant 5.000000e-01 : f32
    %638 = vector.broadcast %cst_214 : f32 to vector<8x24xf32>
    %639 = arith.addf %637, %638 : vector<8x24xf32>
    %640 = vector.extract_strided_slice %631 {offsets = [0, 24], sizes = [8, 8], strides = [1, 1]} : vector<8x32xf32> to vector<8x8xf32>
    %641 = math.tanh %640 : vector<8x8xf32>
    %642 = vector.extract_strided_slice %639 {offsets = [0, 8], sizes = [8, 8], strides = [1, 1]} : vector<8x24xf32> to vector<8x8xf32>
    %643 = arith.mulf %642, %619 : vector<8x8xf32>
    %644 = vector.extract_strided_slice %639 {offsets = [0, 0], sizes = [8, 8], strides = [1, 1]} : vector<8x24xf32> to vector<8x8xf32>
    %645 = arith.mulf %644, %641 : vector<8x8xf32>
    %646 = arith.addf %643, %645 : vector<8x8xf32>
    %647 = vector.extract_strided_slice %639 {offsets = [0, 16], sizes = [8, 8], strides = [1, 1]} : vector<8x24xf32> to vector<8x8xf32>
    %648 = math.tanh %646 : vector<8x8xf32>
    %649 = arith.mulf %647, %648 : vector<8x8xf32>
    %650 = vector.extract_strided_slice %649 {offsets = [0, 0], sizes = [8, 4], strides = [1, 1]} : vector<8x8xf32> to vector<8x4xf32>
    %c40_215 = arith.constant 40 : index
    %c0_216 = arith.constant 0 : index
    %651 = vector.load %arg3[%c40_215, %c0_216] : memref<64x16xf32, #tpu.memory_space<vmem>>, vector<8x4xf32>
    tpu.vector_store %arg3[%c40_215, %c0_216], %650 {strides = array<i32>} : memref<64x16xf32, #tpu.memory_space<vmem>>, vector<8x4xf32>,
    %652 = vector.extract_strided_slice %649 {offsets = [0, 4], sizes = [8, 4], strides = [1, 1]} : vector<8x8xf32> to vector<8x4xf32>
    %c16_217 = arith.constant 16 : index
    %c0_218 = arith.constant 0 : index
    %653 = vector.load %arg4[%c16_217, %c0_218] : memref<64x16xf32, #tpu.memory_space<vmem>>, vector<8x4xf32>
    tpu.vector_store %arg4[%c16_217, %c0_218], %652 {strides = array<i32>} : memref<64x16xf32, #tpu.memory_space<vmem>>, vector<8x4xf32>,
    %654 = vector.extract_strided_slice %483 {offsets = [48, 0], sizes = [8, 32], strides = [1, 1]} : vector<64x32xf32> to vector<8x32xf32>
    %655 = vector.extract_strided_slice %488 {offsets = [8, 0], sizes = [8, 32], strides = [1, 1]} : vector<64x32xf32> to vector<8x32xf32>
    %656 = arith.addf %654, %655 : vector<8x32xf32>
    %cst_219 = arith.constant dense<0.000000e+00> : vector<8x32xf32>
    %657 = tpu.matmul %649, %489, %cst_219 {dimension_numbers = #tpu.dot_dimension_numbers<[1], [0], [0], [1], [0, 0, 1, 1], [], []>} : vector<8x8xf32>, vector<8x32xf32>, vector<8x32xf32> -> vector<8x32xf32>
    %658 = arith.addf %656, %657 : vector<8x32xf32>
    %659 = vector.extract_strided_slice %658 {offsets = [0, 0], sizes = [8, 24], strides = [1, 1]} : vector<8x32xf32> to vector<8x24xf32>
    %cst_220 = arith.constant 5.000000e-01 : f32
    %660 = vector.broadcast %cst_220 : f32 to vector<8x24xf32>
    %661 = arith.mulf %660, %659 : vector<8x24xf32>
    %662 = math.tanh %661 : vector<8x24xf32>
    %cst_221 = arith.constant 5.000000e-01 : f32
    %663 = vector.broadcast %cst_221 : f32 to vector<8x24xf32>
    %664 = arith.mulf %663, %662 : vector<8x24xf32>
    %cst_222 = arith.constant 5.000000e-01 : f32
    %665 = vector.broadcast %cst_222 : f32 to vector<8x24xf32>
    %666 = arith.addf %664, %665 : vector<8x24xf32>
    %667 = vector.extract_strided_slice %658 {offsets = [0, 24], sizes = [8, 8], strides = [1, 1]} : vector<8x32xf32> to vector<8x8xf32>
    %668 = math.tanh %667 : vector<8x8xf32>
    %669 = vector.extract_strided_slice %666 {offsets = [0, 8], sizes = [8, 8], strides = [1, 1]} : vector<8x24xf32> to vector<8x8xf32>
    %670 = arith.mulf %669, %646 : vector<8x8xf32>
    %671 = vector.extract_strided_slice %666 {offsets = [0, 0], sizes = [8, 8], strides = [1, 1]} : vector<8x24xf32> to vector<8x8xf32>
    %672 = arith.mulf %671, %668 : vector<8x8xf32>
    %673 = arith.addf %670, %672 : vector<8x8xf32>
    %674 = vector.extract_strided_slice %666 {offsets = [0, 16], sizes = [8, 8], strides = [1, 1]} : vector<8x24xf32> to vector<8x8xf32>
    %675 = math.tanh %673 : vector<8x8xf32>
    %676 = arith.mulf %674, %675 : vector<8x8xf32>
    %677 = vector.extract_strided_slice %676 {offsets = [0, 0], sizes = [8, 4], strides = [1, 1]} : vector<8x8xf32> to vector<8x4xf32>
    %c48_223 = arith.constant 48 : index
    %c0_224 = arith.constant 0 : index
    %678 = vector.load %arg3[%c48_223, %c0_224] : memref<64x16xf32, #tpu.memory_space<vmem>>, vector<8x4xf32>
    tpu.vector_store %arg3[%c48_223, %c0_224], %677 {strides = array<i32>} : memref<64x16xf32, #tpu.memory_space<vmem>>, vector<8x4xf32>,
    %679 = vector.extract_strided_slice %676 {offsets = [0, 4], sizes = [8, 4], strides = [1, 1]} : vector<8x8xf32> to vector<8x4xf32>
    %c8_225 = arith.constant 8 : index
    %c0_226 = arith.constant 0 : index
    %680 = vector.load %arg4[%c8_225, %c0_226] : memref<64x16xf32, #tpu.memory_space<vmem>>, vector<8x4xf32>
    tpu.vector_store %arg4[%c8_225, %c0_226], %679 {strides = array<i32>} : memref<64x16xf32, #tpu.memory_space<vmem>>, vector<8x4xf32>,
    %681 = vector.extract_strided_slice %483 {offsets = [56, 0], sizes = [8, 32], strides = [1, 1]} : vector<64x32xf32> to vector<8x32xf32>
    %682 = vector.extract_strided_slice %488 {offsets = [0, 0], sizes = [8, 32], strides = [1, 1]} : vector<64x32xf32> to vector<8x32xf32>
    %683 = arith.addf %681, %682 : vector<8x32xf32>
    %cst_227 = arith.constant dense<0.000000e+00> : vector<8x32xf32>
    %684 = tpu.matmul %676, %489, %cst_227 {dimension_numbers = #tpu.dot_dimension_numbers<[1], [0], [0], [1], [0, 0, 1, 1], [], []>} : vector<8x8xf32>, vector<8x32xf32>, vector<8x32xf32> -> vector<8x32xf32>
    %685 = arith.addf %683, %684 : vector<8x32xf32>
    %686 = vector.extract_strided_slice %685 {offsets = [0, 0], sizes = [8, 24], strides = [1, 1]} : vector<8x32xf32> to vector<8x24xf32>
    %cst_228 = arith.constant 5.000000e-01 : f32
    %687 = vector.broadcast %cst_228 : f32 to vector<8x24xf32>
    %688 = arith.mulf %687, %686 : vector<8x24xf32>
    %689 = math.tanh %688 : vector<8x24xf32>
    %cst_229 = arith.constant 5.000000e-01 : f32
    %690 = vector.broadcast %cst_229 : f32 to vector<8x24xf32>
    %691 = arith.mulf %690, %689 : vector<8x24xf32>
    %cst_230 = arith.constant 5.000000e-01 : f32
    %692 = vector.broadcast %cst_230 : f32 to vector<8x24xf32>
    %693 = arith.addf %691, %692 : vector<8x24xf32>
    %694 = vector.extract_strided_slice %685 {offsets = [0, 24], sizes = [8, 8], strides = [1, 1]} : vector<8x32xf32> to vector<8x8xf32>
    %695 = math.tanh %694 : vector<8x8xf32>
    %696 = vector.extract_strided_slice %693 {offsets = [0, 8], sizes = [8, 8], strides = [1, 1]} : vector<8x24xf32> to vector<8x8xf32>
    %697 = arith.mulf %696, %673 : vector<8x8xf32>
    %698 = vector.extract_strided_slice %693 {offsets = [0, 0], sizes = [8, 8], strides = [1, 1]} : vector<8x24xf32> to vector<8x8xf32>
    %699 = arith.mulf %698, %695 : vector<8x8xf32>
    %700 = arith.addf %697, %699 : vector<8x8xf32>
    %701 = vector.extract_strided_slice %693 {offsets = [0, 16], sizes = [8, 8], strides = [1, 1]} : vector<8x24xf32> to vector<8x8xf32>
    %702 = math.tanh %700 : vector<8x8xf32>
    %703 = arith.mulf %701, %702 : vector<8x8xf32>
    %704 = vector.extract_strided_slice %703 {offsets = [0, 0], sizes = [8, 4], strides = [1, 1]} : vector<8x8xf32> to vector<8x4xf32>
    %c56_231 = arith.constant 56 : index
    %c0_232 = arith.constant 0 : index
    %705 = vector.load %arg3[%c56_231, %c0_232] : memref<64x16xf32, #tpu.memory_space<vmem>>, vector<8x4xf32>
    tpu.vector_store %arg3[%c56_231, %c0_232], %704 {strides = array<i32>} : memref<64x16xf32, #tpu.memory_space<vmem>>, vector<8x4xf32>,
    %706 = vector.extract_strided_slice %703 {offsets = [0, 4], sizes = [8, 4], strides = [1, 1]} : vector<8x8xf32> to vector<8x4xf32>
    %c0_233 = arith.constant 0 : index
    %c0_234 = arith.constant 0 : index
    %707 = vector.load %arg4[%c0_233, %c0_234] : memref<64x16xf32, #tpu.memory_space<vmem>>, vector<8x4xf32>
    tpu.vector_store %arg4[%c0_233, %c0_234], %706 {strides = array<i32>} : memref<64x16xf32, #tpu.memory_space<vmem>>, vector<8x4xf32>,
    %c0_235 = arith.constant 0 : index
    %c0_236 = arith.constant 0 : index
    %708 = vector.load %arg3[%c0_235, %c0_236] : memref<64x16xf32, #tpu.memory_space<vmem>>, vector<64x4xf32>
    %c0_237 = arith.constant 0 : index
    %c0_238 = arith.constant 0 : index
    %709 = vector.load %arg4[%c0_237, %c0_238] : memref<64x16xf32, #tpu.memory_space<vmem>>, vector<64x4xf32>
    %c264 = arith.constant 264 : index
    %c0_239 = arith.constant 0 : index
    %710 = vector.load %arg1[%c264, %c0_239] : memref<312x128xf32, #tpu.memory_space<vmem>>, vector<4x16xf32>
    %cst_240 = arith.constant dense<0.000000e+00> : vector<64x16xf32>
    %711 = tpu.matmul %708, %710, %cst_240 {dimension_numbers = #tpu.dot_dimension_numbers<[1], [0], [0], [1], [0, 0, 1, 1], [], []>} : vector<64x4xf32>, vector<4x16xf32>, vector<64x16xf32> -> vector<64x16xf32>
    %c272 = arith.constant 272 : index
    %c0_241 = arith.constant 0 : index
    %712 = vector.load %arg1[%c272, %c0_241] : memref<312x128xf32, #tpu.memory_space<vmem>>, vector<4x16xf32>
    %cst_242 = arith.constant dense<0.000000e+00> : vector<64x16xf32>
    %713 = tpu.matmul %709, %712, %cst_242 {dimension_numbers = #tpu.dot_dimension_numbers<[1], [0], [0], [1], [0, 0, 1, 1], [], []>} : vector<64x4xf32>, vector<4x16xf32>, vector<64x16xf32> -> vector<64x16xf32>
    %714 = arith.addf %711, %713 : vector<64x16xf32>
    %c280 = arith.constant 280 : index
    %c0_243 = arith.constant 0 : index
    %715 = vector.load %arg1[%c280, %c0_243] : memref<312x128xf32, #tpu.memory_space<vmem>>, vector<1x16xf32>
    %716 = vector.broadcast %715 : vector<1x16xf32> to vector<64x16xf32>
    %717 = arith.addf %714, %716 : vector<64x16xf32>
    %c288 = arith.constant 288 : index
    %c0_244 = arith.constant 0 : index
    %718 = vector.load %arg1[%c288, %c0_244] : memref<312x128xf32, #tpu.memory_space<vmem>>, vector<16x1xf32>
    %cst_245 = arith.constant dense<0.000000e+00> : vector<64x1xf32>
    %719 = tpu.matmul %717, %718, %cst_245 {dimension_numbers = #tpu.dot_dimension_numbers<[1], [0], [0], [1], [0, 0, 1, 1], [], []>} : vector<64x16xf32>, vector<16x1xf32>, vector<64x1xf32> -> vector<64x1xf32>
    %c304 = arith.constant 304 : index
    %c0_246 = arith.constant 0 : index
    %720 = vector.load %arg1[%c304, %c0_246] : memref<312x128xf32, #tpu.memory_space<vmem>>, vector<1x1xf32>
    %721 = vector.broadcast %720 : vector<1x1xf32> to vector<64x1xf32>
    %722 = arith.addf %719, %721 : vector<64x1xf32>
    %c0_247 = arith.constant 0 : index
    %c0_248 = arith.constant 0 : index
    %723 = vector.load %arg2[%c0_247, %c0_248] : memref<64x1xf32, #tpu.memory_space<vmem>>, vector<64x1xf32>
    tpu.vector_store %arg2[%c0_247, %c0_248], %722 {strides = array<i32>} : memref<64x1xf32, #tpu.memory_space<vmem>>, vector<64x1xf32>,
    return
  }
}

</mosaic_0001>

<bundles_post_ra>
// kernel: forward.1
= control target key start
LH: loop header
LB: loop body
LE: loop exit
PB: predicated region body
PF: predicated region fallthrough
CT: control target
= control target key end

     0   :  { %7 = vsyncpa [#allocation5], 0  ;;  %s2679_s12 = smov [#allocation4]   ;;  %s2680_s14 = smov 128   ;;  %s3302_s0 = inlined_call_operand.vmem [shape: f32[64,16], index: 0, kind: input, shape index: {}]   ;;  %s3303_s1 = inlined_call_operand.hbm [shape: f32[312,128], index: 1, kind: input, shape index: {}]   ;;  %s3304_s2 = inlined_call_operand.vmem [shape: f32[64,1], index: 2, kind: output, shape index: {}]  }
   0x1   :  { %s14_s11 = sshll.u32 %s3303_s1, 4  ;;  %s16_s13 = sshll.u32 %s2679_s12, 4  ;;  %s15_s11 = int_to_ptr.hbm [resolvable:$true] %s14_s11  ;;  %s17_s13 = int_to_ptr.vmem [resolvable:$true] %s16_s13 }
   0x2   :  { %s2681_s15 = smov 8  }
   0x3   :  { %22 = dma.hbm_to_vmem [thread:$0]  %s15_s11, 4992, %s17_s13, [#allocation5], %s2680_s14, %s2680_s14, %s2681_s15  }
   0x4   :  { %2677 = dma.done.wait [#allocation5], 4992  }
   0x5   :  { %2678 = vsyncadd [#allocation5], 4294962304  ;;  %v36_v0 = vld [vmem:[#allocation4 + $0x8] sm:$0xff]  ;;  %v35_v1 = vld [vmem:[#allocation4] sm:$0xff]  ;;  %vm39_vm0 = vcmask 130048   ;;  %vm151_vm1 = vcmask 261120  }
   0x6   :  { %78 = vmatpush.msra.mxu0 %v36_v0  ;;  %v27_v2 = vld [vmem:[%s3302_s0] sm:$0xff]  ;;  %2463 = vmatpush.msra.mxu3 %v36_v0  ;;  %v34_v3 = vld [vmem:[%s3302_s0 + $0x38] sm:$0xff]  ;;  %v28_v4 = vld [vmem:[%s3302_s0 + $0x8] sm:$0xff]  ;;  %s2684_s3 = smov 64   ;;  %s2685_s4 = smov 48   ;;  %vm1005_vm2 = vcmask 64512  }
   0x7   :  { %v29_v5 = vld [vmem:[%s3302_s0 + $0x10] sm:$0xff]  ;;  %v30_v6 = vld [vmem:[%s3302_s0 + $0x18] sm:$0xff]  ;;  %v31_v7 = vld [vmem:[%s3302_s0 + $0x20] sm:$0xff]  ;;  %s2686_s5 = smov 80   ;;  %s2687_s6 = smov 16   ;;  %vm1689_vm3 = vcmask 31744  }
   0x8   :  { %79 = vmatpush.msra.mxu0 %v35_v1  ;;  %2464 = vmatpush.msra.mxu3 %v35_v1  ;;  %v32_v8 = vld [vmem:[%s3302_s0 + $0x28] sm:$0xff]  ;;  %v33_v9 = vld [vmem:[%s3302_s0 + $0x30] sm:$0xff]  ;;  %v148_v10 = vld [vmem:[#allocation4 + $0x58] sm:$0xff]  ;;  %s2683_s0 = smov 32   ;;  %s2688_s7 = smov 96   ;;  %vm2122_vm4 = vcmask 1043456  }
   0x9   :  { %2328 = vmatmul.msk.f32.vlgmr.msra.gmra.mxu0 %vm39_vm0, %v27_v2  ;;  %2335 = vmatmul.msk.f32.vlgmr.msra.gmra.mxu3 %vm39_vm0, %v34_v3  ;;  %v220_v11 = vld [vmem:[#allocation4 + $0x78] sm:$0xff]  ;;  %v147_v12 = vld [vmem:[#allocation4 + $0x50] sm:$0xff]  ;;  %v146_v14 = vld [vmem:[#allocation4 + $0x48] sm:$0xff]  ;;  %s2689_s8 = smov 88   ;;  %s2690_s9 = smov 104   ;;  %vm2314_vm5 = vcmask 7168  }
   0xa   :  { %188 = vmatpush.msra.mxu1 %v148_v10  ;;  %233 = vmatpush.msra.mxu2 %v220_v11  ;;  %v219_v13 = vld [vmem:[#allocation4 + $0x70] sm:$0xff]  ;;  %v218_v15 = vld [vmem:[#allocation4 + $0x68] sm:$0xff]  ;;  %v145_v16 = vld [vmem:[#allocation4 + $0x40] sm:$0xff]  ;;  %s2691_s10 = smov 112   ;;  %s2692_s11 = smov 108  }
   0xb   :  { %2465 = vmatpush.msrb.mxu3 %v148_v10  ;;  %v217_v17 = vld [vmem:[#allocation4 + $0x60] sm:$0xff]  ;;  %v2487_v18 = vld [vmem:[#allocation4 + $0x10] ss:$0 sm:$0xff]  ;;  %v2759_v10 = vld [vmem:[#allocation4 + $0x28] sm:$0xff] }
   0xc   :  { %189 = vmatpush.msra.mxu1 %v147_v12  ;;  %234 = vmatpush.msra.mxu2 %v219_v13 }
   0xd   :  { %2466 = vmatpush.msrb.mxu3 %v147_v12  ;;  %v2762_v12 = vld [vmem:[#allocation4 + $0x20] sm:$0xff] }
   0xe   :  { %190 = vmatpush.msra.mxu1 %v146_v14  ;;  %235 = vmatpush.msra.mxu2 %v218_v15 }
   0xf   :  { %2467 = vmatpush.msrb.mxu3 %v146_v14 }
  0x10   :  { %191 = vmatpush.msra.mxu1 %v145_v16  ;;  %236 = vmatpush.msra.mxu2 %v217_v17 }
  0x11   :  { %2329 = vmatmul.msk.f32.gmra.mxu0 %vm39_vm0, %v28_v4  ;;  %2468 = vmatpush.msrb.mxu3 %v145_v16 }
  0x13   :  { %2469 = vmatpush.msra.mxu3 %v220_v11 }
  0x15   :  { %2470 = vmatpush.msra.mxu3 %v219_v13  ;;  %v2765_v13 = vld [vmem:[#allocation4 + $0x18] sm:$0xff] }
  0x17   :  { %2471 = vmatpush.msra.mxu3 %v218_v15  ;;  %v2682_v15 = vmov 0.0  }
  0x19   :  { %2330 = vmatmul.msk.f32.gmra.mxu0 %vm39_vm0, %v29_v5  ;;  %2472 = vmatpush.msra.mxu3 %v217_v17 }
  0x21   :  { %2331 = vmatmul.msk.f32.gmra.mxu0 %vm39_vm0, %v30_v6 }
  0x29   :  { %2332 = vmatmul.msk.f32.gmra.mxu0 %vm39_vm0, %v31_v7 }
  0x31   :  { %2333 = vmatmul.msk.f32.gmra.mxu0 %vm39_vm0, %v32_v8 }
  0x39   :  { %2334 = vmatmul.msk.f32.gmra.mxu0 %vm39_vm0, %v33_v9  ;;  %v2756_v9 = vld [vmem:[#allocation4 + $0x30] sm:$0xff] }
  0x86   :  { %v81_v19 = vpop.f32.mrf.mxu0 }
  0x87   :  { %v82_v20 = vadd.f32 %v2487_v18, %v81_v19 }
  0x89   :  { %v105_v21 = vmul.f32 0.5, %v82_v20 }
  0x8b   :  { %2493 = vtanh.f32 %v105_v21 }
  0x8c   :  { %v102_v55 = vpop.f32.mrf.mxu3 }
  0x8d   :  { %v103_v57 = vadd.f32 %v2487_v18, %v102_v55 }
  0x8e   :  { %v84_v22 = vpop.f32.mrf.mxu0 }
  0x8f   :  { %v85_v23 = vadd.f32 %v2487_v18, %v84_v22  ;;  %v112_v62 = vmul.f32 0.5, %v103_v57 }
  0x91   :  { %v2494_v24 = vpop.eup %2493  ;;  %v106_v25 = vmul.f32 0.5, %v85_v23 }
  0x92   :  { %v121_v26 = vmul.f32 0.5, %v2494_v24 }
  0x93   :  { %2495 = vtanh.f32 %v106_v25 }
  0x94   :  { %v129_v27 = vadd.f32 0.5, %v121_v26 }
  0x96   :  { %v137_v28 = vmul.f32 %v129_v27, %v82_v20  ;;  %v87_v29 = vpop.f32.mrf.mxu0  ;;  %v2785_v20 = vld [vmem:[#allocation4 + $0x38] ss:$0 sm:$0xff] }
  0x97   :  { %v88_v30 = vadd.f32 %v2487_v18, %v87_v29 }
  0x98   :  { %2336 = vmatmul.msk.f32.vlgmr.msra.gmra.mxu1 %vm151_vm1, %v137_v28  ;;  %2344 = vmatmul.msk.f32.vlgmr.msra.gmra.mxu2 %vm151_vm1, %v137_v28 }
  0x99   :  { %v2496_v31 = vpop.eup %2495  ;;  %v107_v32 = vmul.f32 0.5, %v88_v30 }
  0x9a   :  { %v122_v33 = vmul.f32 0.5, %v2496_v31 }
  0x9b   :  { %2497 = vtanh.f32 %v107_v32 }
  0x9c   :  { %v130_v34 = vadd.f32 0.5, %v122_v33 }
  0x9e   :  { %v138_v35 = vmul.f32 %v130_v34, %v85_v23  ;;  %v90_v36 = vpop.f32.mrf.mxu0 }
  0x9f   :  { %v91_v37 = vadd.f32 %v2487_v18, %v90_v36 }
  0xa0   :  { %2337 = vmatmul.msk.f32.gmra.mxu1 %vm151_vm1, %v138_v35  ;;  %2345 = vmatmul.msk.f32.gmra.mxu2 %vm151_vm1, %v138_v35 }
  0xa1   :  { %v2498_v38 = vpop.eup %2497  ;;  %v108_v39 = vmul.f32 0.5, %v91_v37 }
  0xa2   :  { %v123_v40 = vmul.f32 0.5, %v2498_v38 }
  0xa3   :  { %2499 = vtanh.f32 %v108_v39  ;;  %v724_v39 = vld [vmem:[#allocation4 + $0xa0] sm:$0xff] }
  0xa4   :  { %v131_v41 = vadd.f32 0.5, %v123_v40  ;;  %v723_v40 = vld [vmem:[#allocation4 + $0x98] sm:$0xff]  ;;  %830 = vmatpush.msrb.mxu1 %v724_v39 }
  0xa6   :  { %v139_v42 = vmul.f32 %v131_v41, %v88_v30  ;;  %v93_v43 = vpop.f32.mrf.mxu0  ;;  %831 = vmatpush.msrb.mxu1 %v723_v40 }
  0xa7   :  { %v94_v44 = vadd.f32 %v2487_v18, %v93_v43 }
  0xa8   :  { %2338 = vmatmul.msk.f32.gmra.mxu1 %vm151_vm1, %v139_v42  ;;  %2346 = vmatmul.msk.f32.gmra.mxu2 %vm151_vm1, %v139_v42 }
  0xa9   :  { %v2500_v45 = vpop.eup %2499  ;;  %v109_v46 = vmul.f32 0.5, %v94_v44 }
  0xaa   :  { %v124_v47 = vmul.f32 0.5, %v2500_v45 }
  0xab   :  { %2501 = vtanh.f32 %v109_v46 }
  0xac   :  { %v132_v48 = vadd.f32 0.5, %v124_v47 }
  0xae   :  { %v140_v49 = vmul.f32 %v132_v48, %v91_v37  ;;  %v96_v50 = vpop.f32.mrf.mxu0 }
  0xaf   :  { %v97_v51 = vadd.f32 %v2487_v18, %v96_v50 }
  0xb0   :  { %2339 = vmatmul.msk.f32.gmra.mxu1 %vm151_vm1, %v140_v49  ;;  %2347 = vmatmul.msk.f32.gmra.mxu2 %vm151_vm1, %v140_v49 }
  0xb1   :  { %v2502_v52 = vpop.eup %2501  ;;  %v110_v53 = vmul.f32 0.5, %v97_v51 }
  0xb2   :  { %v125_v54 = vmul.f32 0.5, %v2502_v52 }
  0xb3   :  { %2503 = vtanh.f32 %v110_v53 }
  0xb4   :  { %v133_v56 = vadd.f32 0.5, %v125_v54 }
  0xb6   :  { %v141_v58 = vmul.f32 %v133_v56, %v94_v44  ;;  %v99_v59 = vpop.f32.mrf.mxu0 }
  0xb7   :  { %v100_v60 = vadd.f32 %v2487_v18, %v99_v59 }
  0xb8   :  { %2340 = vmatmul.msk.f32.gmra.mxu1 %vm151_vm1, %v141_v58  ;;  %2348 = vmatmul.msk.f32.gmra.mxu2 %vm151_vm1, %v141_v58 }
  0xb9   :  { %v2504_v61 = vpop.eup %2503  ;;  %v111_v63 = vmul.f32 0.5, %v100_v60 }
  0xba   :  { %v126_v0 = vmul.f32 0.5, %v2504_v61 }
  0xbb   :  { %2505 = vtanh.f32 %v111_v63 }
  0xbc   :  { %v134_v1 = vadd.f32 0.5, %v126_v0  ;;  %2507 = vtanh.f32 %v112_v62 }
  0xbe   :  { %v142_v2 = vmul.f32 %v134_v1, %v97_v51 }
  0xc0   :  { %2341 = vmatmul.msk.f32.gmra.mxu1 %vm151_vm1, %v142_v2  ;;  %2349 = vmatmul.msk.f32.gmra.mxu2 %vm151_vm1, %v142_v2 }
  0xc1   :  { %v2506_v3 = vpop.eup %2505 }
  0xc2   :  { %v127_v4 = vmul.f32 0.5, %v2506_v3  ;;  %v2508_v5 = vpop.eup %2507 }
  0xc3   :  { %v128_v7 = vmul.f32 0.5, %v2508_v5 }
  0xc4   :  { %v135_v6 = vadd.f32 0.5, %v127_v4 }
  0xc5   :  { %v136_v11 = vadd.f32 0.5, %v128_v7 }
  0xc6   :  { %v143_v8 = vmul.f32 %v135_v6, %v100_v60 }
  0xc7   :  { %v144_v14 = vmul.f32 %v136_v11, %v103_v57 }
  0xc8   :  { %2342 = vmatmul.msk.f32.vlgmr.msrb.gmra.mxu3 %vm151_vm1, %v143_v8 }
  0xc9   :  { %282 = vmatpush.msrb.mxu3 %v2756_v9 }
  0xcb   :  { %283 = vmatpush.msrb.mxu3 %v2759_v10 }
  0xcd   :  { %284 = vmatpush.msrb.mxu3 %v2762_v12 }
  0xcf   :  { %285 = vmatpush.msrb.mxu3 %v2765_v13 }
  0xd0   :  { %2343 = vmatmul.msk.f32.gmra.mxu3 %vm151_vm1, %v144_v14 }
  0xd8   :  { %2350 = vmatmul.msk.f32.vlgmr.msra.gmra.mxu3 %vm151_vm1, %v143_v8 }
  0xd9   :  { %337 = vmatpush.msra.mxu3 %v2756_v9 }
  0xdb   :  { %338 = vmatpush.msra.mxu3 %v2759_v10 }
  0xdd   :  { %339 = vmatpush.msra.mxu3 %v2762_v12 }
  0xdf   :  { %340 = vmatpush.msra.mxu3 %v2765_v13 }
  0xe0   :  { %2351 = vmatmul.msk.f32.gmra.mxu3 %vm151_vm1, %v144_v14 }
  0xe8   :  { %286 = vmatmul.f32.vlgmr.msrb.gmra.mxu3 %v2682_v15 }
  0xe9   :  { %392 = vmatpush.msrb.mxu3 %v2756_v9 }
  0xeb   :  { %393 = vmatpush.msrb.mxu3 %v2759_v10 }
  0xed   :  { %394 = vmatpush.msrb.mxu3 %v2762_v12 }
  0xef   :  { %395 = vmatpush.msrb.mxu3 %v2765_v13 }
 0x115   :  { %v193_v21 = vpop.f32.mrf.mxu1 }
 0x116   :  { %v194_v22 = vadd.f32 %v2785_v20, %v193_v21 }
 0x11b   :  { %v2823_v63 = vpop.f32.mrf.mxu2 }
 0x11d   :  { %v196_v43 = vpop.f32.mrf.mxu1 }
 0x11e   :  { %v197_v44 = vadd.f32 %v2785_v20, %v196_v43 }
 0x123   :  { %v2825_v0 = vpop.f32.mrf.mxu2 }
 0x125   :  { %v199_v4 = vpop.f32.mrf.mxu1 }
 0x126   :  { %v200_v6 = vadd.f32 %v2785_v20, %v199_v4 }
 0x12b   :  { %v2827_v1 = vpop.f32.mrf.mxu2 }
 0x133   :  { %v2829_v2 = vpop.f32.mrf.mxu2 }
 0x13b   :  { %v250_v3 = vpop.f32.mrf.mxu2 }
 0x143   :  { %v253_v5 = vpop.f32.mrf.mxu2 }
 0x144   :  { %v377_v7 = vadd.f32 %v253_v5, %v200_v6 }
 0x14b   :  { %v2781_v16 = vpop.f32.mrf.mxu3 }
 0x153   :  { %v2783_v17 = vpop.f32.mrf.mxu3 }
 0x15b   :  { %v256_v18 = vpop.f32.mrf.mxu3 }
 0x15c   :  { %v322_v45 = vadd.f32 %v256_v18, %v197_v44 }
 0x163   :  { %v259_v19 = vpop.f32.mrf.mxu3 }
 0x164   :  { %v266_v23 = vadd.f32 %v259_v19, %v194_v22 }
 0x16b   :  { %v287_v24 = vpop.f32.mrf.mxu3 }
 0x16c   :  { %v290_v25 = vadd.f32 %v287_v24, %v266_v23 }
 0x16e   :  { %2509 = vtanh.f32 %v290_v25  ;;  %v291_v27 = vmul.f32 0.5, %v290_v25 }
 0x170   :  { %2511 = vtanh.f32 %v291_v27 }
 0x174   :  { %v2510_v26 = vpop.eup %2509 }
 0x175   :  { %298 = vrot.lane.b32.xlu0 %v2510_v26, %s2683_s0 }
 0x176   :  { %v2512_v28 = vpop.eup %2511 }
 0x177   :  { %v293_v29 = vmul.f32 0.5, %v2512_v28 }
 0x179   :  { %v294_v30 = vadd.f32 0.5, %v293_v29 }
 0x17b   :  { %v296_v33 = vmul.f32 0.0, %v294_v30 }
 0x1e7   :  { %v299_v31 = vpop.permute.xlu0 %298 }
 0x1e8   :  { %v301_v32 = vmul.f32 %v299_v31, %v294_v30 }
 0x1ea   :  { %303 = vrot.lane.b32.xlu0 %v301_v32, %s2683_s0 }
 0x25c   :  { %v304_v34 = vpop.permute.xlu0 %303 }
 0x25d   :  { %v306_v35 = vadd.f32 %v304_v34, %v296_v33  ;;  %v202_v33 = vpop.f32.mrf.mxu1 }
 0x25e   :  { %v203_v34 = vadd.f32 %v2785_v20, %v202_v33 }
 0x25f   :  { %2513 = vtanh.f32 %v306_v35 }
 0x265   :  { %v2514_v36 = vpop.eup %2513 }
 0x266   :  { %309 = vrot.lane.b32.xlu1 %v2514_v36, %s2683_s0 }
 0x2d8   :  { %v310_v37 = vpop.permute.xlu1 %309 }
 0x2d9   :  { %v2791_v38 = vmul.f32 %v310_v37, %v294_v30 }
 0x2db   :  { %314 = vrot.lane.b32.xlu1 %v2791_v38, %s2684_s3 }
 0x34d   :  { %v315_v41 = vpop.permute.xlu1 %314 }
 0x34e   :  { %317 = vst.msk [vmem:[#allocation2] sm:$0xff] %vm39_vm0, %v315_v41  ;;  %2352 = vmatmul.msk.f32.vlgmr.msra.gmra.mxu3 %vm151_vm1, %v315_v41 }
 0x34f   :  { %447 = vmatpush.msra.mxu3 %v2756_v9 }
 0x351   :  { %448 = vmatpush.msra.mxu3 %v2759_v10 }
 0x353   :  { %449 = vmatpush.msra.mxu3 %v2762_v12 }
 0x355   :  { %v2800_v42 = vld [vmem:[#allocation2] sm:$0xff]  ;;  %450 = vmatpush.msra.mxu3 %v2765_v13 }
 0x356   :  { %2367 = vmatmul.msk.f32.vlgmr.msrb.gmra.mxu1 %vm39_vm0, %v2800_v42 }
 0x3d1   :  { %v342_v46 = vpop.f32.mrf.mxu3 }
 0x3d2   :  { %v345_v47 = vadd.f32 %v342_v46, %v322_v45 }
 0x3d4   :  { %2515 = vtanh.f32 %v345_v47  ;;  %v346_v49 = vmul.f32 0.5, %v345_v47 }
 0x3d6   :  { %2517 = vtanh.f32 %v346_v49 }
 0x3da   :  { %v2516_v48 = vpop.eup %2515 }
 0x3db   :  { %353 = vrot.lane.b32.xlu2 %v2516_v48, %s2683_s0 }
 0x3dc   :  { %v2518_v50 = vpop.eup %2517 }
 0x3dd   :  { %v348_v51 = vmul.f32 0.5, %v2518_v50 }
 0x3df   :  { %v349_v52 = vadd.f32 0.5, %v348_v51 }
 0x3e1   :  { %v351_v55 = vmul.f32 %v349_v52, %v306_v35  ;;  %v432_v35 = vadd.f32 %v250_v3, %v203_v34 }
 0x435   :  { %v354_v53 = vpop.permute.xlu2 %353 }
 0x436   :  { %v356_v54 = vmul.f32 %v354_v53, %v349_v52 }
 0x438   :  { %358 = vrot.lane.b32.xlu2 %v356_v54, %s2683_s0 }
 0x492   :  { %v359_v56 = vpop.permute.xlu2 %358 }
 0x493   :  { %v361_v57 = vadd.f32 %v359_v56, %v351_v55  ;;  %v205_v55 = vpop.f32.mrf.mxu1 }
 0x494   :  { %v206_v56 = vadd.f32 %v2785_v20, %v205_v55 }
 0x495   :  { %2519 = vtanh.f32 %v361_v57 }
 0x49b   :  { %v2520_v58 = vpop.eup %2519 }
 0x49c   :  { %364 = vrot.lane.b32.xlu0 %v2520_v58, %s2683_s0 }
 0x50e   :  { %v365_v59 = vpop.permute.xlu0 %364 }
 0x50f   :  { %v2809_v60 = vmul.f32 %v365_v59, %v349_v52 }
 0x511   :  { %369 = vrot.lane.b32.xlu1 %v2809_v60, %s2684_s3 }
 0x583   :  { %v370_v61 = vpop.permute.xlu1 %369 }
 0x584   :  { %372 = vst.msk [vmem:[#allocation2 + $0x8] sm:$0xff] %vm39_vm0, %v370_v61  ;;  %2353 = vmatmul.msk.f32.vlgmr.msrb.gmra.mxu3 %vm151_vm1, %v370_v61 }
 0x585   :  { %502 = vmatpush.msrb.mxu3 %v2756_v9 }
 0x587   :  { %503 = vmatpush.msrb.mxu3 %v2759_v10 }
 0x589   :  { %504 = vmatpush.msrb.mxu3 %v2762_v12 }
 0x58b   :  { %v2818_v62 = vld [vmem:[#allocation2 + $0x8] sm:$0xff]  ;;  %505 = vmatpush.msrb.mxu3 %v2765_v13 }
 0x58c   :  { %2368 = vmatmul.msk.f32.gmra.mxu1 %vm39_vm0, %v2818_v62 }
 0x607   :  { %v397_v8 = vpop.f32.mrf.mxu3 }
 0x608   :  { %v400_v11 = vadd.f32 %v397_v8, %v377_v7 }
 0x60a   :  { %2521 = vtanh.f32 %v400_v11  ;;  %v401_v18 = vmul.f32 0.5, %v400_v11 }
 0x60c   :  { %2523 = vtanh.f32 %v401_v18 }
 0x610   :  { %v2522_v14 = vpop.eup %2521 }
 0x611   :  { %408 = vrot.lane.b32.xlu2 %v2522_v14, %s2683_s0 }
 0x612   :  { %v2524_v19 = vpop.eup %2523 }
 0x613   :  { %v403_v21 = vmul.f32 0.5, %v2524_v19 }
 0x615   :  { %v404_v22 = vadd.f32 0.5, %v403_v21 }
 0x617   :  { %v406_v25 = vmul.f32 %v404_v22, %v361_v57  ;;  %v487_v57 = vadd.f32 %v2829_v2, %v206_v56 }
 0x66b   :  { %v409_v23 = vpop.permute.xlu2 %408 }
 0x66c   :  { %v411_v24 = vmul.f32 %v409_v23, %v404_v22 }
 0x66e   :  { %413 = vrot.lane.b32.xlu0 %v411_v24, %s2683_s0  ;;  %v208_v24 = vpop.f32.mrf.mxu1 }
 0x6e0   :  { %v414_v26 = vpop.permute.xlu0 %413 }
 0x6e1   :  { %v416_v27 = vadd.f32 %v414_v26, %v406_v25  ;;  %v209_v25 = vadd.f32 %v2785_v20, %v208_v24 }
 0x6e3   :  { %2525 = vtanh.f32 %v416_v27  ;;  %v542_v26 = vadd.f32 %v2827_v1, %v209_v25 }
 0x6e9   :  { %v2526_v28 = vpop.eup %2525 }
 0x6ea   :  { %419 = vrot.lane.b32.xlu1 %v2526_v28, %s2683_s0 }
 0x75c   :  { %v420_v29 = vpop.permute.xlu1 %419 }
 0x75d   :  { %v2835_v30 = vmul.f32 %v420_v29, %v404_v22 }
 0x75f   :  { %424 = vrot.lane.b32.xlu2 %v2835_v30, %s2684_s3 }
 0x7b9   :  { %v425_v31 = vpop.permute.xlu2 %424 }
 0x7ba   :  { %427 = vst.msk [vmem:[#allocation2 + $0x10] sm:$0xff] %vm39_vm0, %v425_v31  ;;  %2354 = vmatmul.msk.f32.vlgmr.msra.gmra.mxu3 %vm151_vm1, %v425_v31 }
 0x7bb   :  { %557 = vmatpush.msra.mxu3 %v2756_v9 }
 0x7bd   :  { %558 = vmatpush.msra.mxu3 %v2759_v10 }
 0x7bf   :  { %559 = vmatpush.msra.mxu3 %v2762_v12 }
 0x7c1   :  { %v2844_v32 = vld [vmem:[#allocation2 + $0x10] sm:$0xff]  ;;  %560 = vmatpush.msra.mxu3 %v2765_v13 }
 0x7c2   :  { %2369 = vmatmul.msk.f32.gmra.mxu1 %vm39_vm0, %v2844_v32 }
 0x83d   :  { %v452_v36 = vpop.f32.mrf.mxu3 }
 0x83e   :  { %v455_v37 = vadd.f32 %v452_v36, %v432_v35 }
 0x840   :  { %2527 = vtanh.f32 %v455_v37  ;;  %v456_v40 = vmul.f32 0.5, %v455_v37 }
 0x842   :  { %2529 = vtanh.f32 %v456_v40 }
 0x846   :  { %v2528_v39 = vpop.eup %2527 }
 0x847   :  { %463 = vrot.lane.b32.xlu0 %v2528_v39, %s2683_s0 }
 0x848   :  { %v2530_v41 = vpop.eup %2529 }
 0x849   :  { %v458_v43 = vmul.f32 0.5, %v2530_v41 }
 0x84b   :  { %v459_v44 = vadd.f32 0.5, %v458_v43  ;;  %v212_v43 = vadd.f32 %v2785_v20, %v2781_v16 }
 0x84d   :  { %v461_v47 = vmul.f32 %v459_v44, %v416_v27 }
 0x8b9   :  { %v464_v45 = vpop.permute.xlu0 %463 }
 0x8ba   :  { %v466_v46 = vmul.f32 %v464_v45, %v459_v44 }
 0x8bc   :  { %468 = vrot.lane.b32.xlu1 %v466_v46, %s2683_s0 }
 0x92e   :  { %v469_v48 = vpop.permute.xlu1 %468 }
 0x92f   :  { %v471_v49 = vadd.f32 %v469_v48, %v461_v47 }
 0x931   :  { %2531 = vtanh.f32 %v471_v49 }
 0x937   :  { %v2532_v50 = vpop.eup %2531 }
 0x938   :  { %474 = vrot.lane.b32.xlu2 %v2532_v50, %s2683_s0 }
 0x992   :  { %v475_v51 = vpop.permute.xlu2 %474 }
 0x993   :  { %v2853_v52 = vmul.f32 %v475_v51, %v459_v44  ;;  %v597_v44 = vadd.f32 %v2825_v0, %v212_v43 }
 0x995   :  { %479 = vrot.lane.b32.xlu0 %v2853_v52, %s2684_s3 }
 0xa07   :  { %v480_v53 = vpop.permute.xlu0 %479 }
 0xa08   :  { %482 = vst.msk [vmem:[#allocation2 + $0x18] sm:$0xff] %vm39_vm0, %v480_v53  ;;  %2355 = vmatmul.msk.f32.vlgmr.msrb.gmra.mxu3 %vm151_vm1, %v480_v53 }
 0xa09   :  { %612 = vmatpush.msrb.mxu3 %v2756_v9 }
 0xa0b   :  { %613 = vmatpush.msrb.mxu3 %v2759_v10 }
 0xa0d   :  { %614 = vmatpush.msrb.mxu3 %v2762_v12 }
 0xa0f   :  { %v2862_v54 = vld [vmem:[#allocation2 + $0x18] sm:$0xff]  ;;  %615 = vmatpush.msrb.mxu3 %v2765_v13 }
 0xa10   :  { %2370 = vmatmul.msk.f32.gmra.mxu1 %vm39_vm0, %v2862_v54 }
 0xa8b   :  { %v507_v58 = vpop.f32.mrf.mxu3 }
 0xa8c   :  { %v510_v59 = vadd.f32 %v507_v58, %v487_v57 }
 0xa8e   :  { %2533 = vtanh.f32 %v510_v59  ;;  %v511_v3 = vmul.f32 0.5, %v510_v59 }
 0xa90   :  { %2535 = vtanh.f32 %v511_v3  ;;  %v867_v3 = vld [vmem:[#allocation4 + $0xb8] sm:$0xff] }
 0xa94   :  { %v2534_v61 = vpop.eup %2533 }
 0xa95   :  { %518 = vrot.lane.b32.xlu1 %v2534_v61, %s2683_s0  ;;  %v868_v61 = vld [vmem:[#allocation4 + $0xc0] sm:$0xff] }
 0xa96   :  { %v2536_v4 = vpop.eup %2535 }
 0xa97   :  { %v513_v5 = vmul.f32 0.5, %v2536_v4 }
 0xa99   :  { %v514_v6 = vadd.f32 0.5, %v513_v5 }
 0xa9b   :  { %v516_v11 = vmul.f32 %v514_v6, %v471_v49 }
 0xb07   :  { %v519_v7 = vpop.permute.xlu1 %518 }
 0xb08   :  { %v521_v8 = vmul.f32 %v519_v7, %v514_v6 }
 0xb0a   :  { %523 = vrot.lane.b32.xlu2 %v521_v8, %s2683_s0 }
 0xb64   :  { %v524_v14 = vpop.permute.xlu2 %523 }
 0xb65   :  { %v526_v18 = vadd.f32 %v524_v14, %v516_v11 }
 0xb67   :  { %2537 = vtanh.f32 %v526_v18 }
 0xb6d   :  { %v2538_v2 = vpop.eup %2537 }
 0xb6e   :  { %529 = vrot.lane.b32.xlu0 %v2538_v2, %s2683_s0 }
 0xbe0   :  { %v530_v19 = vpop.permute.xlu0 %529 }
 0xbe1   :  { %v2872_v21 = vmul.f32 %v530_v19, %v514_v6  ;;  %v215_v6 = vadd.f32 %v2785_v20, %v2783_v17 }
 0xbe3   :  { %534 = vrot.lane.b32.xlu1 %v2872_v21, %s2684_s3 }
 0xc55   :  { %v535_v22 = vpop.permute.xlu1 %534 }
 0xc56   :  { %537 = vst.msk [vmem:[#allocation2 + $0x20] sm:$0xff] %vm39_vm0, %v535_v22  ;;  %2356 = vmatmul.msk.f32.vlgmr.msra.gmra.mxu3 %vm151_vm1, %v535_v22 }
 0xc57   :  { %667 = vmatpush.msra.mxu3 %v2756_v9 }
 0xc59   :  { %668 = vmatpush.msra.mxu3 %v2759_v10 }
 0xc5b   :  { %669 = vmatpush.msra.mxu3 %v2762_v12 }
 0xc5d   :  { %v2881_v23 = vld [vmem:[#allocation2 + $0x20] sm:$0xff]  ;;  %670 = vmatpush.msra.mxu3 %v2765_v13 }
 0xc5e   :  { %2371 = vmatmul.msk.f32.gmra.mxu1 %vm39_vm0, %v2881_v23 }
 0xcd9   :  { %v562_v27 = vpop.f32.mrf.mxu3 }
 0xcda   :  { %v565_v28 = vadd.f32 %v562_v27, %v542_v26 }
 0xcdc   :  { %2539 = vtanh.f32 %v565_v28  ;;  %v566_v10 = vmul.f32 0.5, %v565_v28  ;;  %v954_v28 = vld [vmem:[#allocation4 + $0x88] sm:$0xff] }
 0xcdd   :  { %1028 = vmatpush.msra.mxu1 %v954_v28 }
 0xcde   :  { %2541 = vtanh.f32 %v566_v10  ;;  %v725_v10 = vld [vmem:[#allocation4 + $0xa8] sm:$0xff] }
 0xce2   :  { %v2540_v9 = vpop.eup %2539 }
 0xce3   :  { %573 = vrot.lane.b32.xlu2 %v2540_v9, %s2683_s0  ;;  %v726_v9 = vld [vmem:[#allocation4 + $0xb0] sm:$0xff] }
 0xce4   :  { %v2542_v12 = vpop.eup %2541  ;;  %765 = vmatpush.msrb.mxu0 %v726_v9 }
 0xce5   :  { %v568_v29 = vmul.f32 0.5, %v2542_v12 }
 0xce6   :  { %766 = vmatpush.msrb.mxu0 %v725_v10 }
 0xce7   :  { %v569_v31 = vadd.f32 0.5, %v568_v29  ;;  %v953_v29 = vld [vmem:[#allocation4 + $0x80] sm:$0xff] }
 0xce8   :  { %1193 = vmatpush.msra.mxu0 %v954_v28  ;;  %1029 = vmatpush.msra.mxu1 %v953_v29 }
 0xce9   :  { %v571_v34 = vmul.f32 %v569_v31, %v526_v18 }
 0xcea   :  { %1194 = vmatpush.msra.mxu0 %v953_v29  ;;  %1248 = vmatpush.msrb.mxu1 %v954_v28 }
 0xcec   :  { %1249 = vmatpush.msrb.mxu1 %v953_v29 }
 0xd3d   :  { %v574_v13 = vpop.permute.xlu2 %573 }
 0xd3e   :  { %v576_v33 = vmul.f32 %v574_v13, %v569_v31 }
 0xd40   :  { %578 = vrot.lane.b32.xlu0 %v576_v33, %s2683_s0 }
 0xdb2   :  { %v579_v35 = vpop.permute.xlu0 %578 }
 0xdb3   :  { %v581_v36 = vadd.f32 %v579_v35, %v571_v34 }
 0xdb5   :  { %2543 = vtanh.f32 %v581_v36 }
 0xdbb   :  { %v2544_v1 = vpop.eup %2543 }
 0xdbc   :  { %584 = vrot.lane.b32.xlu1 %v2544_v1, %s2683_s0 }
 0xe2e   :  { %v585_v37 = vpop.permute.xlu1 %584 }
 0xe2f   :  { %v2891_v39 = vmul.f32 %v585_v37, %v569_v31 }
 0xe31   :  { %589 = vrot.lane.b32.xlu2 %v2891_v39, %s2684_s3 }
 0xe8b   :  { %v590_v40 = vpop.permute.xlu2 %589 }
 0xe8c   :  { %592 = vst.msk [vmem:[#allocation2 + $0x28] sm:$0xff] %vm39_vm0, %v590_v40  ;;  %2357 = vmatmul.msk.f32.vlgmr.msrb.gmra.mxu3 %vm151_vm1, %v590_v40 }
 0xe8d   :  { %926 = vmatpush.msrb.mxu3 %v868_v61 }
 0xe8f   :  { %927 = vmatpush.msrb.mxu3 %v867_v3 }
 0xe93   :  { %v712_v41 = vld [vmem:[#allocation2 + $0x28] sm:$0xff] }
 0xe94   :  { %2372 = vmatmul.msk.f32.gmra.mxu1 %vm39_vm0, %v712_v41 }
 0xf0f   :  { %v617_v45 = vpop.f32.mrf.mxu3 }
 0xf10   :  { %v620_v46 = vadd.f32 %v617_v45, %v597_v44  ;;  %v833_v44 = vpop.f32.mrf.mxu1 }
 0xf12   :  { %2545 = vtanh.f32 %v620_v46  ;;  %v621_v48 = vmul.f32 0.5, %v620_v46 }
 0xf14   :  { %2547 = vtanh.f32 %v621_v48 }
 0xf18   :  { %v2546_v47 = vpop.eup %2545 }
 0xf19   :  { %628 = vrot.lane.b32.xlu0 %v2546_v47, %s2683_s0  ;;  %v836_v47 = vpop.f32.mrf.mxu1 }
 0xf1a   :  { %v2548_v49 = vpop.eup %2547 }
 0xf1b   :  { %v623_v50 = vmul.f32 0.5, %v2548_v49 }
 0xf1d   :  { %v624_v51 = vadd.f32 0.5, %v623_v50 }
 0xf1f   :  { %v626_v56 = vmul.f32 %v624_v51, %v581_v36 }
 0xf8b   :  { %v629_v53 = vpop.permute.xlu0 %628 }
 0xf8c   :  { %v631_v55 = vmul.f32 %v629_v53, %v624_v51 }
 0xf8e   :  { %633 = vrot.lane.b32.xlu1 %v631_v55, %s2683_s0 }
0x1000   :  { %v634_v57 = vpop.permute.xlu1 %633 }
0x1001   :  { %v636_v16 = vadd.f32 %v634_v57, %v626_v56 }
0x1003   :  { %2549 = vtanh.f32 %v636_v16 }
0x1009   :  { %v2550_v0 = vpop.eup %2549 }
0x100a   :  { %639 = vrot.lane.b32.xlu2 %v2550_v0, %s2683_s0 }
0x1064   :  { %v640_v58 = vpop.permute.xlu2 %639 }
0x1065   :  { %v642_v59 = vmul.f32 %v640_v58, %v624_v51  ;;  %v839_v51 = vpop.f32.mrf.mxu1 }
0x1067   :  { %644 = vrot.lane.b32.xlu0 %v642_v59, %s2684_s3 }
0x106d   :  { %v842_v57 = vpop.f32.mrf.mxu1 }
0x10d9   :  { %v645_v4 = vpop.permute.xlu0 %644 }
0x10da   :  { %647 = vst.msk [vmem:[#allocation2 + $0x30] sm:$0xff] %vm39_vm0, %v645_v4  ;;  %2358 = vmatmul.msk.f32.vlgmr.msra.gmra.mxu3 %vm151_vm1, %v645_v4  ;;  %v2981_v4 = vld [vmem:[#allocation4 + $0x90] ss:$0 sm:$0xff] }
0x10db   :  { %972 = vmatpush.msra.mxu3 %v954_v28 }
0x10dd   :  { %973 = vmatpush.msra.mxu3 %v953_v29 }
0x10e1   :  { %v713_v5 = vld [vmem:[#allocation2 + $0x30] sm:$0xff] }
0x10e2   :  { %2373 = vmatmul.msk.f32.gmra.mxu1 %vm39_vm0, %v713_v5  ;;  %2383 = vmatmul.msk.f32.vlgmr.msrb.gmra.mxu3 %vm39_vm0, %v2800_v42  ;;  %v652_v42 = vadd.f32 %v2823_v63, %v215_v6 }
0x10e3   :  { %1138 = vmatpush.msrb.mxu3 %v954_v28 }
0x10e5   :  { %1139 = vmatpush.msrb.mxu3 %v953_v29 }
0x10ea   :  { %2384 = vmatmul.msk.f32.gmra.mxu3 %vm39_vm0, %v2818_v62 }
0x10f2   :  { %2385 = vmatmul.msk.f32.gmra.mxu3 %vm39_vm0, %v2844_v32 }
0x10fa   :  { %2386 = vmatmul.msk.f32.gmra.mxu3 %vm39_vm0, %v2862_v54 }
0x1102   :  { %2387 = vmatmul.msk.f32.gmra.mxu3 %vm39_vm0, %v2881_v23 }
0x110a   :  { %2388 = vmatmul.msk.f32.gmra.mxu3 %vm39_vm0, %v712_v41 }
0x1112   :  { %2389 = vmatmul.msk.f32.gmra.mxu3 %vm39_vm0, %v713_v5 }
0x115d   :  { %v672_v7 = vpop.f32.mrf.mxu3 }
0x115e   :  { %v675_v62 = vadd.f32 %v672_v7, %v652_v42 }
0x1160   :  { %2551 = vtanh.f32 %v675_v62  ;;  %v676_v32 = vmul.f32 0.5, %v675_v62 }
0x1162   :  { %2553 = vtanh.f32 %v676_v32 }
0x1165   :  { %v2961_v41 = vpop.f32.mrf.mxu3 }
0x1166   :  { %v2552_v8 = vpop.eup %2551 }
0x1167   :  { %683 = vrot.lane.b32.xlu1 %v2552_v8, %s2683_s0 }
0x1168   :  { %v2554_v54 = vpop.eup %2553 }
0x1169   :  { %v678_v11 = vmul.f32 0.5, %v2554_v54 }
0x116b   :  { %v679_v14 = vadd.f32 0.5, %v678_v11 }
0x116d   :  { %v681_v17 = vmul.f32 %v679_v14, %v636_v16  ;;  %v2963_v43 = vpop.f32.mrf.mxu3 }
0x1175   :  { %v2967_v48 = vpop.f32.mrf.mxu3 }
0x117d   :  { %v2971_v55 = vpop.f32.mrf.mxu3 }
0x1185   :  { %v941_v0 = vpop.f32.mrf.mxu3 }
0x118d   :  { %v944_v5 = vpop.f32.mrf.mxu3 }
0x11d9   :  { %v684_v18 = vpop.permute.xlu1 %683 }
0x11da   :  { %v686_v2 = vmul.f32 %v684_v18, %v679_v14 }
0x11dc   :  { %688 = vrot.lane.b32.xlu2 %v686_v2, %s2683_s0 }
0x11e4   :  { %648 = vrot.lane.b32.xlu2 %v642_v59, %s2685_s4  ;;  %v2977_v59 = vpop.f32.mrf.mxu1 }
0x11ec   :  { %483 = vrot.lane.b32.xlu2 %v2853_v52, %s2685_s4  ;;  %v870_v52 = vld [vmem:[#allocation4 + $0xd0] sm:$0xff]  ;;  %v848_v42 = vpop.f32.mrf.mxu1 }
0x11ed   :  { %885 = vmatpush.msrb.mxu2 %v870_v52 }
0x11f4   :  { %v851_v2 = vpop.f32.mrf.mxu1 }
0x1236   :  { %v689_v20 = vpop.permute.xlu2 %688 }
0x1237   :  { %v691_v63 = vadd.f32 %v689_v20, %v681_v17 }
0x1239   :  { %2555 = vtanh.f32 %v691_v63  ;;  %v947_v63 = vpop.f32.mrf.mxu3 }
0x123e   :  { %v649_v19 = vpop.permute.xlu2 %648 }
0x123f   :  { %v2556_v22 = vpop.eup %2555  ;;  %651 = vst.msk [vmem:[#allocation3 + $0x8] sm:$0xff] %vm39_vm0, %v649_v19 }
0x1240   :  { %694 = vrot.lane.b32.xlu0 %v2556_v22, %s2683_s0 }
0x1246   :  { %v484_v23 = vpop.permute.xlu2 %483  ;;  %v716_v34 = vld [vmem:[#allocation3 + $0x8] sm:$0xff] }
0x1247   :  { %486 = vst.msk [vmem:[#allocation3 + $0x20] sm:$0xff] %vm39_vm0, %v484_v23 }
0x1248   :  { %593 = vrot.lane.b32.xlu0 %v2891_v39, %s2685_s4 }
0x124e   :  { %v719_v1 = vld [vmem:[#allocation3 + $0x20] sm:$0xff] }
0x1250   :  { %428 = vrot.lane.b32.xlu0 %v2835_v30, %s2685_s4 }
0x1258   :  { %318 = vrot.lane.b32.xlu0 %v2791_v38, %s2685_s4  ;;  %v869_v38 = vld [vmem:[#allocation4 + $0xc8] sm:$0xff] }
0x1259   :  { %886 = vmatpush.msrb.mxu2 %v869_v38 }
0x125b   :  { %1083 = vmatpush.msra.mxu2 %v954_v28 }
0x125d   :  { %1084 = vmatpush.msra.mxu2 %v953_v29 }
0x12b2   :  { %v695_v24 = vpop.permute.xlu0 %694 }
0x12b3   :  { %v697_v25 = vmul.f32 %v695_v24, %v679_v14 }
0x12b5   :  { %699 = vrot.lane.b32.xlu2 %v697_v25, %s2684_s3  ;;  %703 = vrot.lane.b32.xlu1 %v697_v25, %s2685_s4 }
0x12ba   :  { %v594_v26 = vpop.permute.xlu0 %593 }
0x12bb   :  { %596 = vst.msk [vmem:[#allocation3 + $0x10] sm:$0xff] %vm39_vm0, %v594_v26 }
0x12bd   :  { %538 = vrot.lane.b32.xlu1 %v2872_v21, %s2685_s4 }
0x12c2   :  { %v429_v27 = vpop.permute.xlu0 %428  ;;  %v717_v35 = vld [vmem:[#allocation3 + $0x10] sm:$0xff] }
0x12c3   :  { %431 = vst.msk [vmem:[#allocation3 + $0x28] sm:$0xff] %vm39_vm0, %v429_v27 }
0x12c5   :  { %373 = vrot.lane.b32.xlu1 %v2809_v60, %s2685_s4 }
0x12ca   :  { %v319_v30 = vpop.permute.xlu0 %318  ;;  %v720_v37 = vld [vmem:[#allocation3 + $0x28] sm:$0xff] }
0x12cb   :  { %321 = vst.msk [vmem:[#allocation3 + $0x38] sm:$0xff] %vm39_vm0, %v319_v30 }
0x12d2   :  { %v722_v40 = vld [vmem:[#allocation3 + $0x38] sm:$0xff] }
0x130f   :  { %v700_v21 = vpop.permute.xlu2 %699 }
0x1310   :  { %702 = vst.msk [vmem:[#allocation2 + $0x38] sm:$0xff] %vm39_vm0, %v700_v21 }
0x1317   :  { %v714_v12 = vld [vmem:[#allocation2 + $0x38] sm:$0xff] }
0x1318   :  { %2374 = vmatmul.msk.f32.gmra.mxu1 %vm39_vm0, %v714_v12  ;;  %2390 = vmatmul.msk.f32.gmra.mxu3 %vm39_vm0, %v714_v12 }
0x1320   :  { %974 = vmatmul.f32.vlgmr.msra.gmra.mxu3 %v2682_v15 }
0x1321   :  { %1358 = vmatpush.msra.mxu3 %v954_v28 }
0x1323   :  { %1359 = vmatpush.msra.mxu3 %v953_v29 }
0x1327   :  { %v704_v60 = vpop.permute.xlu1 %703 }
0x1328   :  { %706 = vst.msk [vmem:[#allocation3] sm:$0xff] %vm39_vm0, %v704_v60 }
0x132f   :  { %v539_v31 = vpop.permute.xlu1 %538  ;;  %v715_v13 = vld [vmem:[#allocation3] sm:$0xff] }
0x1330   :  { %541 = vst.msk [vmem:[#allocation3 + $0x18] sm:$0xff] %vm39_vm0, %v539_v31  ;;  %2359 = vmatmul.msk.f32.vlgmr.msrb.gmra.mxu0 %vm39_vm0, %v715_v13  ;;  %2375 = vmatmul.msk.f32.vlgmr.msrb.gmra.mxu2 %vm39_vm0, %v715_v13 }
0x1331   :  { %1303 = vmatpush.msrb.mxu2 %v954_v28 }
0x1333   :  { %1304 = vmatpush.msrb.mxu2 %v953_v29 }
0x1337   :  { %v374_v33 = vpop.permute.xlu1 %373  ;;  %v718_v36 = vld [vmem:[#allocation3 + $0x18] sm:$0xff] }
0x1338   :  { %376 = vst.msk [vmem:[#allocation3 + $0x30] sm:$0xff] %vm39_vm0, %v374_v33  ;;  %2360 = vmatmul.msk.f32.gmra.mxu0 %vm39_vm0, %v716_v34  ;;  %2376 = vmatmul.msk.f32.gmra.mxu2 %vm39_vm0, %v716_v34 }
0x133f   :  { %v721_v39 = vld [vmem:[#allocation3 + $0x30] sm:$0xff] }
0x1340   :  { %2361 = vmatmul.msk.f32.gmra.mxu0 %vm39_vm0, %v717_v35  ;;  %2377 = vmatmul.msk.f32.gmra.mxu2 %vm39_vm0, %v717_v35 }
0x1348   :  { %2362 = vmatmul.msk.f32.gmra.mxu0 %vm39_vm0, %v718_v36  ;;  %2378 = vmatmul.msk.f32.gmra.mxu2 %vm39_vm0, %v718_v36 }
0x1350   :  { %2363 = vmatmul.msk.f32.gmra.mxu0 %vm39_vm0, %v719_v1  ;;  %2379 = vmatmul.msk.f32.gmra.mxu2 %vm39_vm0, %v719_v1 }
0x1358   :  { %2364 = vmatmul.msk.f32.gmra.mxu0 %vm39_vm0, %v720_v37  ;;  %2380 = vmatmul.msk.f32.gmra.mxu2 %vm39_vm0, %v720_v37 }
0x1360   :  { %2365 = vmatmul.msk.f32.gmra.mxu0 %vm39_vm0, %v721_v39  ;;  %2381 = vmatmul.msk.f32.gmra.mxu2 %vm39_vm0, %v721_v39 }
0x1368   :  { %2366 = vmatmul.msk.f32.gmra.mxu0 %vm39_vm0, %v722_v40  ;;  %2382 = vmatmul.msk.f32.gmra.mxu2 %vm39_vm0, %v722_v40 }
0x139b   :  { %v950_v30 = vpop.f32.mrf.mxu3 }
0x13a3   :  { %v975_v12 = vpop.f32.mrf.mxu3 }
0x13ad   :  { %v768_v45 = vpop.f32.mrf.mxu0 }
0x13ae   :  { %v834_v28 = vadd.f32 %v833_v44, %v768_v45 }
0x13b0   :  { %v859_v10 = vadd.f32 %v2981_v4, %v834_v28 }
0x13b3   :  { %v2965_v46 = vpop.f32.mrf.mxu2 }
0x13b5   :  { %v771_v49 = vpop.f32.mrf.mxu0 }
0x13b6   :  { %v837_v52 = vadd.f32 %v836_v47, %v771_v49 }
0x13b8   :  { %v860_v26 = vadd.f32 %v2981_v4, %v837_v52 }
0x13bb   :  { %v2969_v50 = vpop.f32.mrf.mxu2 }
0x13bd   :  { %v774_v53 = vpop.f32.mrf.mxu0 }
0x13be   :  { %v840_v11 = vadd.f32 %v839_v51, %v774_v53  ;;  %v3006_v51 = vpop.f32.mrf.mxu1 }
0x13c0   :  { %v861_v17 = vadd.f32 %v2981_v4, %v840_v11 }
0x13c3   :  { %v2973_v56 = vpop.f32.mrf.mxu2 }
0x13c5   :  { %v777_v16 = vpop.f32.mrf.mxu0 }
0x13c6   :  { %v843_v3 = vadd.f32 %v842_v57, %v777_v16 }
0x13c8   :  { %v862_v7 = vadd.f32 %v2981_v4, %v843_v3 }
0x13cb   :  { %v2975_v58 = vpop.f32.mrf.mxu2 }
0x13cd   :  { %v2979_v61 = vpop.f32.mrf.mxu0 }
0x13d3   :  { %v900_v6 = vpop.f32.mrf.mxu2 }
0x13d4   :  { %v942_v62 = vadd.f32 %v941_v0, %v900_v6 }
0x13d5   :  { %v783_v8 = vpop.f32.mrf.mxu0 }
0x13d6   :  { %v849_v32 = vadd.f32 %v848_v42, %v783_v8  ;;  %v2984_v54 = vadd.f32 %v942_v62, %v862_v7 }
0x13d8   :  { %v2987_v14 = vadd.f32 %v2981_v4, %v849_v32 }
0x13db   :  { %v903_v18 = vpop.f32.mrf.mxu2 }
0x13dc   :  { %v945_v20 = vadd.f32 %v944_v5, %v903_v18 }
0x13dd   :  { %v786_v19 = vpop.f32.mrf.mxu0 }
0x13de   :  { %v852_v22 = vadd.f32 %v851_v2, %v786_v19  ;;  %v2990_v23 = vadd.f32 %v945_v20, %v861_v17 }
0x13e0   :  { %v2993_v24 = vadd.f32 %v2981_v4, %v852_v22 }
0x13e3   :  { %v906_v25 = vpop.f32.mrf.mxu2 }
0x13e4   :  { %v948_v27 = vadd.f32 %v947_v63, %v906_v25 }
0x13e6   :  { %v1011_v38 = vadd.f32 %v948_v27, %v860_v26 }
0x13eb   :  { %v909_v9 = vpop.f32.mrf.mxu2 }
0x13ec   :  { %v951_v21 = vadd.f32 %v950_v30, %v909_v9 }
0x13ee   :  { %v955_v60 = vadd.f32 %v951_v21, %v859_v10 }
0x13f0   :  { %v978_v29 = vadd.f32 %v975_v12, %v955_v60 }
0x13f2   :  { %2557 = vtanh.f32 %v978_v29  ;;  %v979_v13 = vmul.f32 0.5, %v978_v29 }
0x13f4   :  { %2559 = vtanh.f32 %v979_v13 }
0x13f8   :  { %v2558_v31 = vpop.eup %2557 }
0x13f9   :  { %986 = vrot.lane.b32.xlu1 %v2558_v31, %s2686_s5 }
0x13fa   :  { %v2560_v33 = vpop.eup %2559 }
0x13fb   :  { %v981_v34 = vmul.f32 0.5, %v2560_v33 }
0x13fd   :  { %v982_v35 = vadd.f32 0.5, %v981_v34 }
0x13ff   :  { %v984_v37 = vmul.f32 0.0, %v982_v35 }
0x146b   :  { %v987_v36 = vpop.permute.xlu1 %986 }
0x146c   :  { %v989_v1 = vmul.f32 %v987_v36, %v982_v35 }
0x146e   :  { %991 = vrot.lane.b32.xlu2 %v989_v1, %s2687_s6 }
0x14c8   :  { %v992_v39 = vpop.permute.xlu2 %991 }
0x14c9   :  { %v994_v40 = vadd.f32 %v992_v39, %v984_v37 }
0x14cb   :  { %2561 = vtanh.f32 %v994_v40 }
0x14d1   :  { %v2562_v44 = vpop.eup %2561 }
0x14d2   :  { %997 = vrot.lane.b32.xlu0 %v2562_v44, %s2687_s6 }
0x1544   :  { %v998_v45 = vpop.permute.xlu0 %997 }
0x1545   :  { %v3000_v47 = vmul.f32 %v998_v45, %v982_v35 }
0x1547   :  { %1002 = vrot.lane.b32.xlu1 %v3000_v47, %s2688_s7 }
0x15b9   :  { %v1003_v49 = vpop.permute.xlu1 %1002 }
0x15ba   :  { %1006 = vst.msk [vmem:[#allocation2] sm:$0xff] %vm1005_vm2, %v1003_v49  ;;  %2391 = vmatmul.msk.f32.vlgmr.msra.gmra.mxu1 %vm39_vm0, %v1003_v49 }
0x1637   :  { %v1031_v53 = vpop.f32.mrf.mxu1 }
0x1638   :  { %v1034_v57 = vadd.f32 %v1031_v53, %v1011_v38  ;;  %v846_v53 = vadd.f32 %v2977_v59, %v2979_v61 }
0x163a   :  { %2563 = vtanh.f32 %v1034_v57  ;;  %v1035_v0 = vmul.f32 0.5, %v1034_v57  ;;  %v3039_v57 = vpop.f32.mrf.mxu0 }
0x163c   :  { %2565 = vtanh.f32 %v1035_v0  ;;  %v939_v0 = vadd.f32 %v2971_v55, %v2975_v58 }
0x1640   :  { %v2564_v16 = vpop.eup %2563 }
0x1641   :  { %1042 = vrot.lane.b32.xlu2 %v2564_v16, %s2686_s5  ;;  %v863_v16 = vadd.f32 %v2981_v4, %v846_v53 }
0x1642   :  { %v2566_v3 = vpop.eup %2565 }
0x1643   :  { %v1037_v5 = vmul.f32 0.5, %v2566_v3  ;;  %v1176_v3 = vadd.f32 %v939_v0, %v863_v16 }
0x1645   :  { %v1038_v6 = vadd.f32 0.5, %v1037_v5 }
0x1647   :  { %v1040_v62 = vmul.f32 %v1038_v6, %v994_v40 }
0x169b   :  { %v1043_v42 = vpop.permute.xlu2 %1042 }
0x169c   :  { %v1045_v7 = vmul.f32 %v1043_v42, %v1038_v6 }
0x169e   :  { %1047 = vrot.lane.b32.xlu0 %v1045_v7, %s2687_s6 }
0x1710   :  { %v1048_v8 = vpop.permute.xlu0 %1047 }
0x1711   :  { %v1050_v32 = vadd.f32 %v1048_v8, %v1040_v62 }
0x1713   :  { %2567 = vtanh.f32 %v1050_v32 }
0x1719   :  { %v2568_v11 = vpop.eup %2567 }
0x171a   :  { %1053 = vrot.lane.b32.xlu1 %v2568_v11, %s2687_s6 }
0x178c   :  { %v1054_v18 = vpop.permute.xlu1 %1053 }
0x178d   :  { %v3011_v2 = vmul.f32 %v1054_v18, %v1038_v6 }
0x178f   :  { %1058 = vrot.lane.b32.xlu2 %v3011_v2, %s2688_s7 }
0x17e9   :  { %v1059_v17 = vpop.permute.xlu2 %1058 }
0x17ea   :  { %1061 = vst.msk [vmem:[#allocation2 + $0x8] sm:$0xff] %vm1005_vm2, %v1059_v17  ;;  %2392 = vmatmul.msk.f32.vlgmr.msra.gmra.mxu2 %vm39_vm0, %v1059_v17 }
0x186d   :  { %v1086_v20 = vpop.f32.mrf.mxu2 }
0x186e   :  { %v1089_v63 = vadd.f32 %v1086_v20, %v2990_v23 }
0x1870   :  { %2569 = vtanh.f32 %v1089_v63  ;;  %v1090_v22 = vmul.f32 0.5, %v1089_v63  ;;  %v1412_v63 = vld [vmem:[#allocation4 + $0xe8] sm:$0xff] }
0x1871   :  { %1518 = vmatpush.msra.mxu1 %v1412_v63 }
0x1872   :  { %2571 = vtanh.f32 %v1090_v22  ;;  %v3053_v22 = vld [vmem:[#allocation2] sm:$0xff] }
0x1876   :  { %v2570_v19 = vpop.eup %2569 }
0x1877   :  { %1097 = vrot.lane.b32.xlu0 %v2570_v19, %s2686_s5 }
0x1878   :  { %v2572_v52 = vpop.eup %2571 }
0x1879   :  { %v1092_v25 = vmul.f32 0.5, %v2572_v52  ;;  %v3057_v52 = vld [vmem:[#allocation2 + $0x8] sm:$0xff] }
0x187b   :  { %v1093_v26 = vadd.f32 0.5, %v1092_v25 }
0x187d   :  { %v1095_v38 = vmul.f32 %v1093_v26, %v1050_v32 }
0x18e9   :  { %v1098_v27 = vpop.permute.xlu0 %1097 }
0x18ea   :  { %v1100_v30 = vmul.f32 %v1098_v27, %v1093_v26 }
0x18ec   :  { %1102 = vrot.lane.b32.xlu1 %v1100_v30, %s2687_s6  ;;  %v936_v30 = vadd.f32 %v2967_v48, %v2973_v56 }
0x195e   :  { %v1103_v28 = vpop.permute.xlu1 %1102 }
0x195f   :  { %v1105_v9 = vadd.f32 %v1103_v28, %v1095_v38  ;;  %v1231_v38 = vadd.f32 %v936_v30, %v2987_v14 }
0x1961   :  { %2573 = vtanh.f32 %v1105_v9 }
0x1967   :  { %v2574_v10 = vpop.eup %2573 }
0x1968   :  { %1108 = vrot.lane.b32.xlu2 %v2574_v10, %s2687_s6 }
0x19c2   :  { %v1109_v23 = vpop.permute.xlu2 %1108 }
0x19c3   :  { %v3021_v21 = vmul.f32 %v1109_v23, %v1093_v26 }
0x19c5   :  { %1113 = vrot.lane.b32.xlu0 %v3021_v21, %s2688_s7 }
0x1a37   :  { %v1114_v12 = vpop.permute.xlu0 %1113 }
0x1a38   :  { %1116 = vst.msk [vmem:[#allocation2 + $0x10] sm:$0xff] %vm1005_vm2, %v1114_v12  ;;  %2393 = vmatmul.msk.f32.vlgmr.msrb.gmra.mxu3 %vm39_vm0, %v1114_v12 }
0x1a3f   :  { %v3061_v25 = vld [vmem:[#allocation2 + $0x10] sm:$0xff] }
0x1abb   :  { %v1141_v60 = vpop.f32.mrf.mxu3 }
0x1abc   :  { %v1144_v29 = vadd.f32 %v1141_v60, %v2984_v54 }
0x1abe   :  { %2575 = vtanh.f32 %v1144_v29  ;;  %v1145_v13 = vmul.f32 0.5, %v1144_v29 }
0x1ac0   :  { %2577 = vtanh.f32 %v1145_v13 }
0x1ac4   :  { %v2576_v31 = vpop.eup %2575 }
0x1ac5   :  { %1152 = vrot.lane.b32.xlu1 %v2576_v31, %s2686_s5 }
0x1ac6   :  { %v2578_v33 = vpop.eup %2577 }
0x1ac7   :  { %v1147_v34 = vmul.f32 0.5, %v2578_v33 }
0x1ac9   :  { %v1148_v35 = vadd.f32 0.5, %v1147_v34 }
0x1acb   :  { %v1150_v37 = vmul.f32 %v1148_v35, %v1105_v9 }
0x1b37   :  { %v1153_v36 = vpop.permute.xlu1 %1152 }
0x1b38   :  { %v1155_v1 = vmul.f32 %v1153_v36, %v1148_v35 }
0x1b3a   :  { %1157 = vrot.lane.b32.xlu2 %v1155_v1, %s2687_s6 }
0x1b94   :  { %v1158_v39 = vpop.permute.xlu2 %1157 }
0x1b95   :  { %v1160_v40 = vadd.f32 %v1158_v39, %v1150_v37  ;;  %v933_v37 = vadd.f32 %v2963_v43, %v2969_v50 }
0x1b97   :  { %2579 = vtanh.f32 %v1160_v40  ;;  %v1286_v39 = vadd.f32 %v933_v37, %v2993_v24 }
0x1b9d   :  { %v2580_v44 = vpop.eup %2579 }
0x1b9e   :  { %1163 = vrot.lane.b32.xlu0 %v2580_v44, %s2687_s6 }
0x1c10   :  { %v1164_v54 = vpop.permute.xlu0 %1163 }
0x1c11   :  { %v3031_v45 = vmul.f32 %v1164_v54, %v1148_v35 }
0x1c13   :  { %1168 = vrot.lane.b32.xlu1 %v3031_v45, %s2688_s7 }
0x1c85   :  { %v1169_v49 = vpop.permute.xlu1 %1168 }
0x1c86   :  { %1171 = vst.msk [vmem:[#allocation2 + $0x18] sm:$0xff] %vm1005_vm2, %v1169_v49  ;;  %2394 = vmatmul.msk.f32.vlgmr.msra.gmra.mxu0 %vm39_vm0, %v1169_v49 }
0x1c8d   :  { %v3065_v26 = vld [vmem:[#allocation2 + $0x18] sm:$0xff] }
0x1d03   :  { %v1196_v5 = vpop.f32.mrf.mxu0 }
0x1d04   :  { %v1199_v6 = vadd.f32 %v1196_v5, %v1176_v3 }
0x1d06   :  { %2581 = vtanh.f32 %v1199_v6  ;;  %v1200_v7 = vmul.f32 0.5, %v1199_v6 }
0x1d08   :  { %2583 = vtanh.f32 %v1200_v7 }
0x1d0c   :  { %v2582_v42 = vpop.eup %2581 }
0x1d0d   :  { %1207 = vrot.lane.b32.xlu2 %v2582_v42, %s2686_s5 }
0x1d0e   :  { %v2584_v62 = vpop.eup %2583 }
0x1d0f   :  { %v1202_v8 = vmul.f32 0.5, %v2584_v62  ;;  %v1554_v62 = vld [vmem:[#allocation4 + $0xf8] sm:$0xff] }
0x1d10   :  { %1612 = vmatpush.msrb.mxu3 %v1554_v62 }
0x1d11   :  { %v1203_v32 = vadd.f32 0.5, %v1202_v8 }
0x1d13   :  { %v1205_v11 = vmul.f32 %v1203_v32, %v1160_v40 }
0x1d67   :  { %v1208_v59 = vpop.permute.xlu2 %1207 }
0x1d68   :  { %v1210_v61 = vmul.f32 %v1208_v59, %v1203_v32  ;;  %v855_v59 = vadd.f32 %v3006_v51, %v3039_v57 }
0x1d6a   :  { %1212 = vrot.lane.b32.xlu0 %v1210_v61, %s2687_s6  ;;  %v866_v61 = vadd.f32 %v2981_v4, %v855_v59 }
0x1ddc   :  { %v1213_v18 = vpop.permute.xlu0 %1212 }
0x1ddd   :  { %v1215_v17 = vadd.f32 %v1213_v18, %v1205_v11  ;;  %v930_v11 = vadd.f32 %v2961_v41, %v2965_v46 }
0x1ddf   :  { %2585 = vtanh.f32 %v1215_v17  ;;  %v1341_v18 = vadd.f32 %v930_v11, %v866_v61 }
0x1de5   :  { %v2586_v55 = vpop.eup %2585 }
0x1de6   :  { %1218 = vrot.lane.b32.xlu1 %v2586_v55, %s2687_s6 }
0x1e58   :  { %v1219_v58 = vpop.permute.xlu1 %1218 }
0x1e59   :  { %v3047_v20 = vmul.f32 %v1219_v58, %v1203_v32 }
0x1e5b   :  { %1223 = vrot.lane.b32.xlu2 %v3047_v20, %s2688_s7 }
0x1eb5   :  { %v1224_v19 = vpop.permute.xlu2 %1223 }
0x1eb6   :  { %1226 = vst.msk [vmem:[#allocation2 + $0x20] sm:$0xff] %vm1005_vm2, %v1224_v19  ;;  %2395 = vmatmul.msk.f32.vlgmr.msrb.gmra.mxu1 %vm39_vm0, %v1224_v19 }
0x1ebd   :  { %v3069_v27 = vld [vmem:[#allocation2 + $0x20] sm:$0xff] }
0x1ebe   :  { %2406 = vmatmul.msk.f32.vlgmr.msra.gmra.mxu1 %vm1005_vm2, %v3053_v22 }
0x1ec6   :  { %2407 = vmatmul.msk.f32.gmra.mxu1 %vm1005_vm2, %v3057_v52 }
0x1ece   :  { %2408 = vmatmul.msk.f32.gmra.mxu1 %vm1005_vm2, %v3061_v25 }
0x1ed6   :  { %2409 = vmatmul.msk.f32.gmra.mxu1 %vm1005_vm2, %v3065_v26 }
0x1ede   :  { %2410 = vmatmul.msk.f32.gmra.mxu1 %vm1005_vm2, %v3069_v27 }
0x1f33   :  { %v1251_v28 = vpop.f32.mrf.mxu1 }
0x1f34   :  { %v1254_v9 = vadd.f32 %v1251_v28, %v1231_v38 }
0x1f36   :  { %2587 = vtanh.f32 %v1254_v9  ;;  %v1255_v23 = vmul.f32 0.5, %v1254_v9  ;;  %v1555_v9 = vld [vmem:[#allocation4 + $0x100] sm:$0xff] }
0x1f37   :  { %1571 = vmatpush.msra.mxu2 %v1555_v9 }
0x1f38   :  { %2589 = vtanh.f32 %v1255_v23 }
0x1f3c   :  { %v2588_v10 = vpop.eup %2587 }
0x1f3d   :  { %1262 = vrot.lane.b32.xlu0 %v2588_v10, %s2686_s5  ;;  %v1413_v10 = vld [vmem:[#allocation4 + $0xf0] sm:$0xff] }
0x1f3e   :  { %v2590_v12 = vpop.eup %2589  ;;  %1453 = vmatpush.msrb.mxu0 %v1413_v10 }
0x1f3f   :  { %v1257_v60 = vmul.f32 0.5, %v2590_v12 }
0x1f41   :  { %v1258_v29 = vadd.f32 0.5, %v1257_v60 }
0x1f43   :  { %v1260_v33 = vmul.f32 %v1258_v29, %v1215_v17 }
0x1faf   :  { %v1263_v31 = vpop.permute.xlu0 %1262 }
0x1fb0   :  { %v1265_v13 = vmul.f32 %v1263_v31, %v1258_v29 }
0x1fb2   :  { %1267 = vrot.lane.b32.xlu1 %v1265_v13, %s2687_s6 }
0x2024   :  { %v1268_v34 = vpop.permute.xlu1 %1267 }
0x2025   :  { %v1270_v48 = vadd.f32 %v1268_v34, %v1260_v33 }
0x2027   :  { %2591 = vtanh.f32 %v1270_v48 }
0x202d   :  { %v2592_v56 = vpop.eup %2591 }
0x202e   :  { %1273 = vrot.lane.b32.xlu2 %v2592_v56, %s2687_s6 }
0x2088   :  { %v1274_v14 = vpop.permute.xlu2 %1273 }
0x2089   :  { %v3079_v35 = vmul.f32 %v1274_v14, %v1258_v29 }
0x208b   :  { %1278 = vrot.lane.b32.xlu0 %v3079_v35, %s2688_s7 }
0x20fd   :  { %v1279_v36 = vpop.permute.xlu0 %1278 }
0x20fe   :  { %1281 = vst.msk [vmem:[#allocation2 + $0x28] sm:$0xff] %vm1005_vm2, %v1279_v36  ;;  %2396 = vmatmul.msk.f32.vlgmr.msrb.gmra.mxu2 %vm39_vm0, %v1279_v36 }
0x2105   :  { %v1401_v1 = vld [vmem:[#allocation2 + $0x28] sm:$0xff] }
0x2106   :  { %2411 = vmatmul.msk.f32.gmra.mxu1 %vm1005_vm2, %v1401_v1 }
0x2181   :  { %v1306_v40 = vpop.f32.mrf.mxu2 }
0x2182   :  { %v1309_v44 = vadd.f32 %v1306_v40, %v1286_v39 }
0x2184   :  { %2593 = vtanh.f32 %v1309_v44  ;;  %v1310_v49 = vmul.f32 0.5, %v1309_v44 }
0x2186   :  { %2595 = vtanh.f32 %v1310_v49 }
0x218a   :  { %v2594_v54 = vpop.eup %2593 }
0x218b   :  { %1317 = vrot.lane.b32.xlu1 %v2594_v54, %s2686_s5  ;;  %v2490_v54 = vld [vmem:[#allocation4 + $0xe0] ss:$0 sm:$0xff] }
0x218c   :  { %v2596_v53 = vpop.eup %2595 }
0x218d   :  { %v1312_v16 = vmul.f32 0.5, %v2596_v53 }
0x218f   :  { %v1313_v0 = vadd.f32 0.5, %v1312_v16 }
0x2191   :  { %v1315_v6 = vmul.f32 %v1313_v0, %v1270_v48 }
0x21fd   :  { %v1318_v3 = vpop.permute.xlu1 %1317 }
0x21fe   :  { %v1320_v5 = vmul.f32 %v1318_v3, %v1313_v0 }
0x2200   :  { %1322 = vrot.lane.b32.xlu2 %v1320_v5, %s2687_s6 }
0x225a   :  { %v1323_v42 = vpop.permute.xlu2 %1322 }
0x225b   :  { %v1325_v43 = vadd.f32 %v1323_v42, %v1315_v6 }
0x225d   :  { %2597 = vtanh.f32 %v1325_v43 }
0x2263   :  { %v2598_v50 = vpop.eup %2597 }
0x2264   :  { %1328 = vrot.lane.b32.xlu0 %v2598_v50, %s2687_s6 }
0x22d6   :  { %v1329_v24 = vpop.permute.xlu0 %1328 }
0x22d7   :  { %v1331_v7 = vmul.f32 %v1329_v24, %v1313_v0 }
0x22d9   :  { %1333 = vrot.lane.b32.xlu1 %v1331_v7, %s2688_s7 }
0x234b   :  { %v1334_v8 = vpop.permute.xlu1 %1333 }
0x234c   :  { %1336 = vst.msk [vmem:[#allocation2 + $0x30] sm:$0xff] %vm1005_vm2, %v1334_v8  ;;  %2397 = vmatmul.msk.f32.vlgmr.msra.gmra.mxu3 %vm39_vm0, %v1334_v8 }
0x2353   :  { %v1402_v32 = vld [vmem:[#allocation2 + $0x30] sm:$0xff] }
0x2354   :  { %2412 = vmatmul.msk.f32.gmra.mxu1 %vm1005_vm2, %v1402_v32  ;;  %2422 = vmatmul.msk.f32.vlgmr.msrb.gmra.mxu3 %vm1005_vm2, %v3053_v22 }
0x235c   :  { %2423 = vmatmul.msk.f32.gmra.mxu3 %vm1005_vm2, %v3057_v52 }
0x2364   :  { %2424 = vmatmul.msk.f32.gmra.mxu3 %vm1005_vm2, %v3061_v25 }
0x236c   :  { %2425 = vmatmul.msk.f32.gmra.mxu3 %vm1005_vm2, %v3065_v26 }
0x2374   :  { %2426 = vmatmul.msk.f32.gmra.mxu3 %vm1005_vm2, %v3069_v27 }
0x237c   :  { %2427 = vmatmul.msk.f32.gmra.mxu3 %vm1005_vm2, %v1401_v1 }
0x2384   :  { %2428 = vmatmul.msk.f32.gmra.mxu3 %vm1005_vm2, %v1402_v32 }
0x23cf   :  { %v1361_v17 = vpop.f32.mrf.mxu3 }
0x23d0   :  { %v1364_v55 = vadd.f32 %v1361_v17, %v1341_v18 }
0x23d2   :  { %2599 = vtanh.f32 %v1364_v55  ;;  %v1365_v63 = vmul.f32 0.5, %v1364_v55 }
0x23d4   :  { %2601 = vtanh.f32 %v1365_v63 }
0x23d7   :  { %v1614_v36 = vpop.f32.mrf.mxu3 }
0x23d8   :  { %v2600_v58 = vpop.eup %2599 }
0x23d9   :  { %1372 = vrot.lane.b32.xlu2 %v2600_v58, %s2686_s5 }
0x23da   :  { %v2602_v19 = vpop.eup %2601 }
0x23db   :  { %v1367_v22 = vmul.f32 0.5, %v2602_v19 }
0x23dd   :  { %v1368_v52 = vadd.f32 0.5, %v1367_v22 }
0x23df   :  { %v1370_v41 = vmul.f32 %v1368_v52, %v1325_v43  ;;  %v1617_v39 = vpop.f32.mrf.mxu3 }
0x23e7   :  { %v1620_v3 = vpop.f32.mrf.mxu3 }
0x2433   :  { %v1373_v25 = vpop.permute.xlu2 %1372 }
0x2434   :  { %v1375_v26 = vmul.f32 %v1373_v25, %v1368_v52 }
0x2436   :  { %1377 = vrot.lane.b32.xlu0 %v1375_v26, %s2687_s6 }
0x243e   :  { %1337 = vrot.lane.b32.xlu0 %v1331_v7, %s2689_s8 }
0x2446   :  { %1172 = vrot.lane.b32.xlu0 %v3031_v45, %s2689_s8 }
0x244e   :  { %1007 = vrot.lane.b32.xlu0 %v3000_v47, %s2689_s8 }
0x24a8   :  { %v1378_v46 = vpop.permute.xlu0 %1377 }
0x24a9   :  { %v1380_v4 = vadd.f32 %v1378_v46, %v1370_v41 }
0x24ab   :  { %2603 = vtanh.f32 %v1380_v4 }
0x24b0   :  { %v1338_v51 = vpop.permute.xlu0 %1337 }
0x24b1   :  { %v2604_v57 = vpop.eup %2603  ;;  %1340 = vst.msk [vmem:[#allocation3 + $0x8] sm:$0xff] %vm1005_vm2, %v1338_v51 }
0x24b2   :  { %1383 = vrot.lane.b32.xlu1 %v2604_v57, %s2687_s6 }
0x24b8   :  { %v1173_v27 = vpop.permute.xlu0 %1172  ;;  %v1405_v60 = vld [vmem:[#allocation3 + $0x8] sm:$0xff] }
0x24b9   :  { %1175 = vst.msk [vmem:[#allocation3 + $0x20] sm:$0xff] %vm1005_vm2, %v1173_v27 }
0x24ba   :  { %1282 = vrot.lane.b32.xlu1 %v3079_v35, %s2689_s8  ;;  %v1520_v35 = vpop.f32.mrf.mxu1 }
0x24c0   :  { %v1008_v30 = vpop.permute.xlu0 %1007  ;;  %v1408_v34 = vld [vmem:[#allocation3 + $0x20] sm:$0xff] }
0x24c1   :  { %1010 = vst.msk [vmem:[#allocation3 + $0x38] sm:$0xff] %vm1005_vm2, %v1008_v30 }
0x24c2   :  { %1117 = vrot.lane.b32.xlu1 %v3021_v21, %s2689_s8  ;;  %v1638_v21 = vld [vmem:[#allocation4 + $0xd8] sm:$0xff]  ;;  %v1523_v37 = vpop.f32.mrf.mxu1 }
0x24c3   :  { %1657 = vmatpush.msra.mxu0 %v1638_v21  ;;  %1713 = vmatpush.msrb.mxu1 %v1638_v21 }
0x24c4   :  { %1768 = vmatpush.msrb.mxu2 %v1638_v21  ;;  %1823 = vmatpush.msra.mxu3 %v1638_v21 }
0x24c5   :  { %1933 = vmatpush.msra.mxu1 %v1638_v21 }
0x24c6   :  { %2043 = vmatpush.msrb.mxu3 %v1638_v21 }
0x24c8   :  { %v1411_v14 = vld [vmem:[#allocation3 + $0x38] sm:$0xff] }
0x24ca   :  { %v1526_v16 = vpop.f32.mrf.mxu1 }
0x24d2   :  { %v1529_v43 = vpop.f32.mrf.mxu1 }
0x24da   :  { %v1532_v32 = vpop.f32.mrf.mxu1 }
0x24e2   :  { %v1535_v63 = vpop.f32.mrf.mxu1 }
0x24ea   :  { %v1538_v57 = vpop.f32.mrf.mxu1 }
0x2524   :  { %v1384_v47 = vpop.permute.xlu1 %1383 }
0x2525   :  { %v1386_v45 = vmul.f32 %v1384_v47, %v1368_v52 }
0x2527   :  { %1388 = vrot.lane.b32.xlu1 %v1386_v45, %s2688_s7  ;;  %1392 = vrot.lane.b32.xlu2 %v1386_v45, %s2689_s8 }
0x252c   :  { %v1283_v38 = vpop.permute.xlu1 %1282 }
0x252d   :  { %1285 = vst.msk [vmem:[#allocation3 + $0x10] sm:$0xff] %vm1005_vm2, %v1283_v38 }
0x252f   :  { %1227 = vrot.lane.b32.xlu2 %v3047_v20, %s2689_s8 }
0x2534   :  { %v1118_v28 = vpop.permute.xlu1 %1117  ;;  %v1406_v31 = vld [vmem:[#allocation3 + $0x10] sm:$0xff] }
0x2535   :  { %1120 = vst.msk [vmem:[#allocation3 + $0x28] sm:$0xff] %vm1005_vm2, %v1118_v28 }
0x2537   :  { %1062 = vrot.lane.b32.xlu2 %v3011_v2, %s2689_s8 }
0x253c   :  { %v1409_v48 = vld [vmem:[#allocation3 + $0x28] sm:$0xff] }
0x2581   :  { %v1393_v23 = vpop.permute.xlu2 %1392 }
0x2582   :  { %1395 = vst.msk [vmem:[#allocation3] sm:$0xff] %vm1005_vm2, %v1393_v23 }
0x2589   :  { %v1228_v20 = vpop.permute.xlu2 %1227  ;;  %v1404_v12 = vld [vmem:[#allocation3] sm:$0xff] }
0x258a   :  { %1230 = vst.msk [vmem:[#allocation3 + $0x18] sm:$0xff] %vm1005_vm2, %v1228_v20  ;;  %2398 = vmatmul.msk.f32.vlgmr.msrb.gmra.mxu0 %vm1005_vm2, %v1404_v12  ;;  %2414 = vmatmul.msk.f32.vlgmr.msra.gmra.mxu2 %vm1005_vm2, %v1404_v12 }
0x258b   :  { %1878 = vmatpush.msrb.mxu0 %v1638_v21  ;;  %1988 = vmatpush.msra.mxu2 %v1638_v21 }
0x2591   :  { %v1063_v2 = vpop.permute.xlu2 %1062  ;;  %v1407_v13 = vld [vmem:[#allocation3 + $0x18] sm:$0xff] }
0x2592   :  { %1065 = vst.msk [vmem:[#allocation3 + $0x30] sm:$0xff] %vm1005_vm2, %v1063_v2  ;;  %2399 = vmatmul.msk.f32.gmra.mxu0 %vm1005_vm2, %v1405_v60  ;;  %2415 = vmatmul.msk.f32.gmra.mxu2 %vm1005_vm2, %v1405_v60 }
0x2599   :  { %v1389_v29 = vpop.permute.xlu1 %1388  ;;  %v1410_v56 = vld [vmem:[#allocation3 + $0x30] sm:$0xff] }
0x259a   :  { %1391 = vst.msk [vmem:[#allocation2 + $0x38] sm:$0xff] %vm1005_vm2, %v1389_v29  ;;  %2400 = vmatmul.msk.f32.gmra.mxu0 %vm1005_vm2, %v1406_v31  ;;  %2416 = vmatmul.msk.f32.gmra.mxu2 %vm1005_vm2, %v1406_v31 }
0x25a1   :  { %v1403_v33 = vld [vmem:[#allocation2 + $0x38] sm:$0xff] }
0x25a2   :  { %2401 = vmatmul.msk.f32.gmra.mxu0 %vm1005_vm2, %v1407_v13  ;;  %2413 = vmatmul.msk.f32.gmra.mxu1 %vm1005_vm2, %v1403_v33 }
0x25a3   :  { %2417 = vmatmul.msk.f32.gmra.mxu2 %vm1005_vm2, %v1407_v13  ;;  %2429 = vmatmul.msk.f32.gmra.mxu3 %vm1005_vm2, %v1403_v33 }
0x25aa   :  { %2402 = vmatmul.msk.f32.gmra.mxu0 %vm1005_vm2, %v1408_v34 }
0x25ab   :  { %2418 = vmatmul.msk.f32.gmra.mxu2 %vm1005_vm2, %v1408_v34 }
0x25b2   :  { %2403 = vmatmul.msk.f32.gmra.mxu0 %vm1005_vm2, %v1409_v48 }
0x25b3   :  { %2419 = vmatmul.msk.f32.gmra.mxu2 %vm1005_vm2, %v1409_v48 }
0x25ba   :  { %2404 = vmatmul.msk.f32.gmra.mxu0 %vm1005_vm2, %v1410_v56 }
0x25bb   :  { %2420 = vmatmul.msk.f32.gmra.mxu2 %vm1005_vm2, %v1410_v56 }
0x25c2   :  { %2405 = vmatmul.msk.f32.gmra.mxu0 %vm1005_vm2, %v1411_v14 }
0x25c3   :  { %2421 = vmatmul.msk.f32.gmra.mxu2 %vm1005_vm2, %v1411_v14 }
0x25ca   :  { %1658 = vmatmul.f32.vlgmr.msra.gmra.mxu0 %v2682_v15  ;;  %v1623_v15 = vpop.f32.mrf.mxu3 }
0x25d2   :  { %v1626_v11 = vpop.f32.mrf.mxu3 }
0x25da   :  { %v1629_v46 = vpop.f32.mrf.mxu3 }
0x25e2   :  { %v1632_v10 = vpop.f32.mrf.mxu3 }
0x2607   :  { %v1455_v1 = vpop.f32.mrf.mxu0 }
0x2608   :  { %v1521_v13 = vadd.f32 %v1520_v35, %v1455_v1 }
0x260a   :  { %v1546_v56 = vadd.f32 %v2490_v54, %v1521_v13 }
0x260d   :  { %v1573_v40 = vpop.f32.mrf.mxu2 }
0x260e   :  { %v1615_v29 = vadd.f32 %v1614_v36, %v1573_v40 }
0x260f   :  { %v1458_v44 = vpop.f32.mrf.mxu0 }
0x2610   :  { %v1524_v49 = vadd.f32 %v1523_v37, %v1458_v44 }
0x2612   :  { %v1547_v53 = vadd.f32 %v2490_v54, %v1524_v49 }
0x2615   :  { %v1576_v0 = vpop.f32.mrf.mxu2 }
0x2616   :  { %v1618_v38 = vadd.f32 %v1617_v39, %v1576_v0 }
0x2617   :  { %v1461_v5 = vpop.f32.mrf.mxu0 }
0x2618   :  { %v1527_v6 = vadd.f32 %v1526_v16, %v1461_v5 }
0x261a   :  { %v1548_v42 = vadd.f32 %v2490_v54, %v1527_v6 }
0x261d   :  { %v1579_v50 = vpop.f32.mrf.mxu2 }
0x261e   :  { %v1621_v26 = vadd.f32 %v1620_v3, %v1579_v50 }
0x261f   :  { %v1464_v24 = vpop.f32.mrf.mxu0  ;;  %v1541_v23 = vpop.f32.mrf.mxu1 }
0x2620   :  { %v1530_v7 = vadd.f32 %v1529_v43, %v1464_v24 }
0x2622   :  { %v1549_v62 = vadd.f32 %v2490_v54, %v1530_v7 }
0x2626   :  { %v1582_v8 = vpop.f32.mrf.mxu2  ;;  %v1635_v34 = vpop.f32.mrf.mxu3 }
0x2627   :  { %v1467_v59 = vpop.f32.mrf.mxu0  ;;  %v1624_v18 = vadd.f32 %v1623_v15, %v1582_v8 }
0x2628   :  { %v1533_v61 = vadd.f32 %v1532_v32, %v1467_v59 }
0x262a   :  { %v1550_v17 = vadd.f32 %v2490_v54, %v1533_v61 }
0x262c   :  { %v3151_v55 = vadd.f32 %v1624_v18, %v1550_v17 }
0x262e   :  { %v1585_v58 = vpop.f32.mrf.mxu2 }
0x262f   :  { %v1627_v19 = vadd.f32 %v1626_v11, %v1585_v58  ;;  %v1470_v22 = vpop.f32.mrf.mxu0 }
0x2630   :  { %v1536_v52 = vadd.f32 %v1535_v63, %v1470_v22 }
0x2631   :  { %v3153_v25 = vadd.f32 %v1627_v19, %v1549_v62 }
0x2632   :  { %v1551_v41 = vadd.f32 %v2490_v54, %v1536_v52 }
0x2634   :  { %v3155_v4 = vadd.f32 %v1621_v26, %v1551_v41 }
0x2636   :  { %v1588_v51 = vpop.f32.mrf.mxu2 }
0x2637   :  { %v1630_v27 = vadd.f32 %v1629_v46, %v1588_v51  ;;  %v1473_v30 = vpop.f32.mrf.mxu0 }
0x2638   :  { %v1539_v47 = vadd.f32 %v1538_v57, %v1473_v30 }
0x2639   :  { %v3157_v45 = vadd.f32 %v1630_v27, %v1548_v42 }
0x263a   :  { %v1552_v28 = vadd.f32 %v2490_v54, %v1539_v47 }
0x263c   :  { %v3159_v9 = vadd.f32 %v1618_v38, %v1552_v28 }
0x263e   :  { %v1591_v21 = vpop.f32.mrf.mxu2 }
0x263f   :  { %v1633_v20 = vadd.f32 %v1632_v10, %v1591_v21  ;;  %v1476_v12 = vpop.f32.mrf.mxu0 }
0x2640   :  { %v1542_v2 = vadd.f32 %v1541_v23, %v1476_v12 }
0x2641   :  { %v1695_v60 = vadd.f32 %v1633_v20, %v1547_v53 }
0x2642   :  { %v1553_v31 = vadd.f32 %v2490_v54, %v1542_v2 }
0x2644   :  { %v3161_v33 = vadd.f32 %v1615_v29, %v1553_v31 }
0x2646   :  { %v1594_v48 = vpop.f32.mrf.mxu2 }
0x2647   :  { %v1636_v14 = vadd.f32 %v1635_v34, %v1594_v48  ;;  %v1659_v37 = vpop.f32.mrf.mxu0 }
0x2649   :  { %v1639_v39 = vadd.f32 %v1636_v14, %v1546_v56 }
0x264b   :  { %v1662_v44 = vadd.f32 %v1659_v37, %v1639_v39 }
0x264d   :  { %2605 = vtanh.f32 %v1662_v44  ;;  %v1663_v16 = vmul.f32 0.5, %v1662_v44 }
0x264f   :  { %2607 = vtanh.f32 %v1663_v16 }
0x2653   :  { %v2606_v49 = vpop.eup %2605 }
0x2654   :  { %1670 = vrot.lane.b32.xlu2 %v2606_v49, %s2690_s9 }
0x2655   :  { %v2608_v53 = vpop.eup %2607 }
0x2656   :  { %v1665_v36 = vmul.f32 0.5, %v2608_v53 }
0x2658   :  { %v1666_v40 = vadd.f32 0.5, %v1665_v36 }
0x265a   :  { %v1668_v0 = vmul.f32 0.0, %v1666_v40 }
0x26ae   :  { %v1671_v35 = vpop.permute.xlu2 %1670 }
0x26af   :  { %v1673_v1 = vmul.f32 %v1671_v35, %v1666_v40 }
0x26b1   :  { %1675 = vrot.lane.b32.xlu0 %v1673_v1, %s2681_s15 }
0x2723   :  { %v1676_v54 = vpop.permute.xlu0 %1675 }
0x2724   :  { %v1678_v3 = vadd.f32 %v1676_v54, %v1668_v0 }
0x2726   :  { %2609 = vtanh.f32 %v1678_v3 }
0x272c   :  { %v2610_v5 = vpop.eup %2609 }
0x272d   :  { %1681 = vrot.lane.b32.xlu1 %v2610_v5, %s2681_s15 }
0x279f   :  { %v1682_v6 = vpop.permute.xlu1 %1681 }
0x27a0   :  { %v3166_v42 = vmul.f32 %v1682_v6, %v1666_v40 }
0x27a2   :  { %1686 = vrot.lane.b32.xlu2 %v3166_v42, %s2691_s10 }
0x27fc   :  { %v1687_v43 = vpop.permute.xlu2 %1686 }
0x27fd   :  { %1690 = vst.msk [vmem:[#allocation2] sm:$0xff] %vm1689_vm3, %v1687_v43  ;;  %2430 = vmatmul.msk.f32.vlgmr.msrb.gmra.mxu1 %vm1005_vm2, %v1687_v43 }
0x287a   :  { %v1715_v50 = vpop.f32.mrf.mxu1 }
0x287b   :  { %v1718_v24 = vadd.f32 %v1715_v50, %v1695_v60 }
0x287d   :  { %2611 = vtanh.f32 %v1718_v24  ;;  %v1719_v7 = vmul.f32 0.5, %v1718_v24 }
0x287f   :  { %2613 = vtanh.f32 %v1719_v7  ;;  %v2096_v7 = vld [vmem:[#allocation4 + $0x108] sm:$0xf] }
0x2880   :  { %2446 = vmatpush.msk.msrb.mxu1 %vm2122_vm4, %v2096_v7  ;;  %v2097_v7 = vld [vmem:[#allocation4 + $0x110] sm:$0xf] }
0x2881   :  { %2437 = vmatpush.msk.msra.mxu0 %vm2122_vm4, %v2097_v7 }
0x2883   :  { %v2612_v15 = vpop.eup %2611 }
0x2884   :  { %1726 = vrot.lane.b32.xlu0 %v2612_v15, %s2690_s9 }
0x2885   :  { %v2614_v62 = vpop.eup %2613 }
0x2886   :  { %v1721_v8 = vmul.f32 0.5, %v2614_v62 }
0x2888   :  { %v1722_v32 = vadd.f32 0.5, %v1721_v8  ;;  %v2080_v8 = vld [vmem:[#allocation2] sm:$0xff] }
0x288a   :  { %v1724_v11 = vmul.f32 %v1722_v32, %v1678_v3 }
0x28f6   :  { %v1727_v59 = vpop.permute.xlu0 %1726 }
0x28f7   :  { %v1729_v61 = vmul.f32 %v1727_v59, %v1722_v32 }
0x28f9   :  { %1731 = vrot.lane.b32.xlu1 %v1729_v61, %s2681_s15 }
0x296b   :  { %v1732_v18 = vpop.permute.xlu1 %1731 }
0x296c   :  { %v1734_v17 = vadd.f32 %v1732_v18, %v1724_v11 }
0x296e   :  { %2615 = vtanh.f32 %v1734_v17 }
0x2974   :  { %v2616_v58 = vpop.eup %2615 }
0x2975   :  { %1737 = vrot.lane.b32.xlu2 %v2616_v58, %s2681_s15 }
0x29cf   :  { %v1738_v63 = vpop.permute.xlu2 %1737 }
0x29d0   :  { %v3175_v19 = vmul.f32 %v1738_v63, %v1722_v32 }
0x29d2   :  { %1742 = vrot.lane.b32.xlu0 %v3175_v19, %s2691_s10 }
0x2a44   :  { %v1743_v22 = vpop.permute.xlu0 %1742 }
0x2a45   :  { %1745 = vst.msk [vmem:[#allocation2 + $0x8] sm:$0xff] %vm1689_vm3, %v1743_v22  ;;  %2431 = vmatmul.msk.f32.vlgmr.msrb.gmra.mxu2 %vm1005_vm2, %v1743_v22 }
0x2a4c   :  { %v2081_v32 = vld [vmem:[#allocation2 + $0x8] sm:$0xff] }
0x2ac8   :  { %v1770_v52 = vpop.f32.mrf.mxu2 }
0x2ac9   :  { %v1773_v26 = vadd.f32 %v1770_v52, %v3157_v45 }
0x2acb   :  { %2617 = vtanh.f32 %v1773_v26  ;;  %v1774_v46 = vmul.f32 0.5, %v1773_v26 }
0x2acd   :  { %2619 = vtanh.f32 %v1774_v46 }
0x2ad1   :  { %v2618_v41 = vpop.eup %2617 }
0x2ad2   :  { %1781 = vrot.lane.b32.xlu1 %v2618_v41, %s2690_s9 }
0x2ad3   :  { %v2620_v51 = vpop.eup %2619 }
0x2ad4   :  { %v1776_v57 = vmul.f32 0.5, %v2620_v51 }
0x2ad6   :  { %v1777_v27 = vadd.f32 0.5, %v1776_v57 }
0x2ad8   :  { %v1779_v38 = vmul.f32 %v1777_v27, %v1734_v17 }
0x2b44   :  { %v1782_v30 = vpop.permute.xlu1 %1781 }
0x2b45   :  { %v1784_v47 = vmul.f32 %v1782_v30, %v1777_v27 }
0x2b47   :  { %1786 = vrot.lane.b32.xlu2 %v1784_v47, %s2681_s15 }
0x2ba1   :  { %v1787_v28 = vpop.permute.xlu2 %1786 }
0x2ba2   :  { %v1789_v10 = vadd.f32 %v1787_v28, %v1779_v38 }
0x2ba4   :  { %2621 = vtanh.f32 %v1789_v10 }
0x2baa   :  { %v2622_v21 = vpop.eup %2621 }
0x2bab   :  { %1792 = vrot.lane.b32.xlu0 %v2622_v21, %s2681_s15 }
0x2c1d   :  { %v1793_v45 = vpop.permute.xlu0 %1792 }
0x2c1e   :  { %v3185_v23 = vmul.f32 %v1793_v45, %v1777_v27 }
0x2c20   :  { %1797 = vrot.lane.b32.xlu1 %v3185_v23, %s2691_s10 }
0x2c92   :  { %v1798_v20 = vpop.permute.xlu1 %1797 }
0x2c93   :  { %1800 = vst.msk [vmem:[#allocation2 + $0x10] sm:$0xff] %vm1689_vm3, %v1798_v20  ;;  %2432 = vmatmul.msk.f32.vlgmr.msra.gmra.mxu3 %vm1005_vm2, %v1798_v20 }
0x2c9a   :  { %v2082_v59 = vld [vmem:[#allocation2 + $0x10] sm:$0xff] }
0x2d16   :  { %v1825_v12 = vpop.f32.mrf.mxu3 }
0x2d17   :  { %v1828_v2 = vadd.f32 %v1825_v12, %v3153_v25 }
0x2d19   :  { %2623 = vtanh.f32 %v1828_v2  ;;  %v1829_v29 = vmul.f32 0.5, %v1828_v2 }
0x2d1b   :  { %2625 = vtanh.f32 %v1829_v29 }
0x2d1f   :  { %v2624_v60 = vpop.eup %2623 }
0x2d20   :  { %1836 = vrot.lane.b32.xlu2 %v2624_v60, %s2690_s9 }
0x2d21   :  { %v2626_v31 = vpop.eup %2625 }
0x2d22   :  { %v1831_v13 = vmul.f32 0.5, %v2626_v31 }
0x2d24   :  { %v1832_v34 = vadd.f32 0.5, %v1831_v13 }
0x2d26   :  { %v1834_v14 = vmul.f32 %v1832_v34, %v1789_v10 }
0x2d7a   :  { %v1837_v48 = vpop.permute.xlu2 %1836 }
0x2d7b   :  { %v1839_v56 = vmul.f32 %v1837_v48, %v1832_v34 }
0x2d7d   :  { %1841 = vrot.lane.b32.xlu0 %v1839_v56, %s2681_s15 }
0x2def   :  { %v1842_v37 = vpop.permute.xlu0 %1841 }
0x2df0   :  { %v1844_v39 = vadd.f32 %v1842_v37, %v1834_v14 }
0x2df2   :  { %2627 = vtanh.f32 %v1844_v39 }
0x2df8   :  { %v2628_v44 = vpop.eup %2627 }
0x2df9   :  { %1847 = vrot.lane.b32.xlu1 %v2628_v44, %s2681_s15 }
0x2e6b   :  { %v1848_v25 = vpop.permute.xlu1 %1847 }
0x2e6c   :  { %v3195_v49 = vmul.f32 %v1848_v25, %v1832_v34 }
0x2e6e   :  { %1852 = vrot.lane.b32.xlu2 %v3195_v49, %s2691_s10 }
0x2ec8   :  { %v1853_v16 = vpop.permute.xlu2 %1852 }
0x2ec9   :  { %1855 = vst.msk [vmem:[#allocation2 + $0x18] sm:$0xff] %vm1689_vm3, %v1853_v16  ;;  %2433 = vmatmul.msk.f32.vlgmr.msrb.gmra.mxu0 %vm1005_vm2, %v1853_v16 }
0x2ed0   :  { %v2083_v61 = vld [vmem:[#allocation2 + $0x18] sm:$0xff] }
0x2f46   :  { %v1880_v53 = vpop.f32.mrf.mxu0 }
0x2f47   :  { %v1883_v36 = vadd.f32 %v1880_v53, %v3151_v55 }
0x2f49   :  { %2629 = vtanh.f32 %v1883_v36  ;;  %v1884_v35 = vmul.f32 0.5, %v1883_v36 }
0x2f4b   :  { %2631 = vtanh.f32 %v1884_v35 }
0x2f4f   :  { %v2630_v40 = vpop.eup %2629 }
0x2f50   :  { %1891 = vrot.lane.b32.xlu0 %v2630_v40, %s2690_s9 }
0x2f51   :  { %v2632_v1 = vpop.eup %2631 }
0x2f52   :  { %v1886_v0 = vmul.f32 0.5, %v2632_v1 }
0x2f54   :  { %v1887_v54 = vadd.f32 0.5, %v1886_v0 }
0x2f56   :  { %v1889_v6 = vmul.f32 %v1887_v54, %v1844_v39 }
0x2fc2   :  { %v1892_v3 = vpop.permute.xlu0 %1891 }
0x2fc3   :  { %v1894_v5 = vmul.f32 %v1892_v3, %v1887_v54 }
0x2fc5   :  { %1896 = vrot.lane.b32.xlu1 %v1894_v5, %s2681_s15 }
0x3037   :  { %v1897_v43 = vpop.permute.xlu1 %1896 }
0x3038   :  { %v1899_v50 = vadd.f32 %v1897_v43, %v1889_v6 }
0x303a   :  { %2633 = vtanh.f32 %v1899_v50 }
0x3040   :  { %v2634_v24 = vpop.eup %2633 }
0x3041   :  { %1902 = vrot.lane.b32.xlu2 %v2634_v24, %s2681_s15 }
0x309b   :  { %v1903_v55 = vpop.permute.xlu2 %1902 }
0x309c   :  { %v3205_v15 = vmul.f32 %v1903_v55, %v1887_v54 }
0x309e   :  { %1907 = vrot.lane.b32.xlu0 %v3205_v15, %s2691_s10 }
0x3110   :  { %v1908_v62 = vpop.permute.xlu0 %1907 }
0x3111   :  { %1910 = vst.msk [vmem:[#allocation2 + $0x20] sm:$0xff] %vm1689_vm3, %v1908_v62  ;;  %2434 = vmatmul.msk.f32.vlgmr.msra.gmra.mxu1 %vm1005_vm2, %v1908_v62 }
0x3118   :  { %v2084_v11 = vld [vmem:[#allocation2 + $0x20] sm:$0xff] }
0x3119   :  { %2447 = vmatmul.msk.f32.vlgmr.msrb.gmra.mxu1 %vm1689_vm3, %v2080_v8 }
0x3121   :  { %2448 = vmatmul.msk.f32.gmra.mxu1 %vm1689_vm3, %v2081_v32 }
0x3129   :  { %2449 = vmatmul.msk.f32.gmra.mxu1 %vm1689_vm3, %v2082_v59 }
0x3131   :  { %2450 = vmatmul.msk.f32.gmra.mxu1 %vm1689_vm3, %v2083_v61 }
0x3139   :  { %2451 = vmatmul.msk.f32.gmra.mxu1 %vm1689_vm3, %v2084_v11 }
0x318e   :  { %v1935_v18 = vpop.f32.mrf.mxu1 }
0x318f   :  { %v1938_v17 = vadd.f32 %v1935_v18, %v3155_v4 }
0x3191   :  { %2635 = vtanh.f32 %v1938_v17  ;;  %v1939_v63 = vmul.f32 0.5, %v1938_v17 }
0x3193   :  { %2637 = vtanh.f32 %v1939_v63 }
0x3197   :  { %v2636_v58 = vpop.eup %2635 }
0x3198   :  { %1946 = vrot.lane.b32.xlu1 %v2636_v58, %s2690_s9 }
0x3199   :  { %v2638_v22 = vpop.eup %2637 }
0x319a   :  { %v1941_v52 = vmul.f32 0.5, %v2638_v22  ;;  %v2246_v22 = vld [vmem:[#allocation4 + $0x128] sm:$0xff] }
0x319b   :  { %2287 = vmatpush.msrb.mxu2 %v2246_v22 }
0x319c   :  { %v1942_v26 = vadd.f32 0.5, %v1941_v52  ;;  %v2245_v52 = vld [vmem:[#allocation4 + $0x120] sm:$0xff] }
0x319d   :  { %2288 = vmatpush.msrb.mxu2 %v2245_v52 }
0x319e   :  { %v1944_v51 = vmul.f32 %v1942_v26, %v1899_v50 }
0x320a   :  { %v1947_v41 = vpop.permute.xlu1 %1946 }
0x320b   :  { %v1949_v46 = vmul.f32 %v1947_v41, %v1942_v26  ;;  %v2491_v41 = vld [vmem:[#allocation4 + $0x118] ss:$0 sm:$0xff] }
0x320d   :  { %1951 = vrot.lane.b32.xlu2 %v1949_v46, %s2681_s15 }
0x3267   :  { %v1952_v57 = vpop.permute.xlu2 %1951 }
0x3268   :  { %v1954_v27 = vadd.f32 %v1952_v57, %v1944_v51 }
0x326a   :  { %2639 = vtanh.f32 %v1954_v27 }
0x3270   :  { %v2640_v30 = vpop.eup %2639 }
0x3271   :  { %1957 = vrot.lane.b32.xlu0 %v2640_v30, %s2681_s15 }
0x32e3   :  { %v1958_v4 = vpop.permute.xlu0 %1957 }
0x32e4   :  { %v1960_v47 = vmul.f32 %v1958_v4, %v1942_v26  ;;  %v2211_v26 = vpop.f32.mrf.mxu1 }
0x32e6   :  { %1962 = vrot.lane.b32.xlu1 %v1960_v47, %s2691_s10 }
0x32ec   :  { %v2214_v57 = vpop.f32.mrf.mxu1 }
0x3358   :  { %v1963_v38 = vpop.permute.xlu1 %1962 }
0x3359   :  { %1965 = vst.msk [vmem:[#allocation2 + $0x28] sm:$0xff] %vm1689_vm3, %v1963_v38  ;;  %2435 = vmatmul.msk.f32.vlgmr.msra.gmra.mxu2 %vm1005_vm2, %v1963_v38  ;;  %v2217_v38 = vpop.f32.mrf.mxu1 }
0x3360   :  { %v2085_v28 = vld [vmem:[#allocation2 + $0x28] sm:$0xff] }
0x3361   :  { %2452 = vmatmul.msk.f32.gmra.mxu1 %vm1689_vm3, %v2085_v28 }
0x33dc   :  { %v1990_v10 = vpop.f32.mrf.mxu2 }
0x33dd   :  { %v1993_v21 = vadd.f32 %v1990_v10, %v3159_v9 }
0x33df   :  { %2641 = vtanh.f32 %v1993_v21  ;;  %v1994_v20 = vmul.f32 0.5, %v1993_v21 }
0x33e1   :  { %2643 = vtanh.f32 %v1994_v20 }
0x33e5   :  { %v2642_v45 = vpop.eup %2641 }
0x33e6   :  { %2001 = vrot.lane.b32.xlu2 %v2642_v45, %s2690_s9  ;;  %v2220_v45 = vpop.f32.mrf.mxu1 }
0x33e7   :  { %v2644_v12 = vpop.eup %2643 }
0x33e8   :  { %v1996_v2 = vmul.f32 0.5, %v2644_v12 }
0x33ea   :  { %v1997_v60 = vadd.f32 0.5, %v1996_v2 }
0x33ec   :  { %v1999_v13 = vmul.f32 %v1997_v60, %v1954_v27 }
0x3440   :  { %v2002_v29 = vpop.permute.xlu2 %2001 }
0x3441   :  { %v2004_v31 = vmul.f32 %v2002_v29, %v1997_v60 }
0x3443   :  { %2006 = vrot.lane.b32.xlu0 %v2004_v31, %s2681_s15 }
0x34b5   :  { %v2007_v34 = vpop.permute.xlu0 %2006 }
0x34b6   :  { %v2009_v48 = vadd.f32 %v2007_v34, %v1999_v13 }
0x34b8   :  { %2645 = vtanh.f32 %v2009_v48 }
0x34be   :  { %v2646_v56 = vpop.eup %2645 }
0x34bf   :  { %2012 = vrot.lane.b32.xlu1 %v2646_v56, %s2681_s15 }
0x3531   :  { %v2013_v9 = vpop.permute.xlu1 %2012 }
0x3532   :  { %v2015_v14 = vmul.f32 %v2013_v9, %v1997_v60  ;;  %v2223_v60 = vpop.f32.mrf.mxu1 }
0x3534   :  { %2017 = vrot.lane.b32.xlu2 %v2015_v14, %s2691_s10 }
0x353a   :  { %v2226_v34 = vpop.f32.mrf.mxu1 }
0x358e   :  { %v2018_v37 = vpop.permute.xlu2 %2017 }
0x358f   :  { %2020 = vst.msk [vmem:[#allocation2 + $0x30] sm:$0xff] %vm1689_vm3, %v2018_v37  ;;  %2436 = vmatmul.msk.f32.vlgmr.msrb.gmra.mxu3 %vm1005_vm2, %v2018_v37 }
0x3596   :  { %v2086_v39 = vld [vmem:[#allocation2 + $0x30] sm:$0xff] }
0x3597   :  { %2453 = vmatmul.msk.f32.gmra.mxu1 %vm1689_vm3, %v2086_v39 }
0x3612   :  { %v2045_v44 = vpop.f32.mrf.mxu3 }
0x3613   :  { %v2048_v25 = vadd.f32 %v2045_v44, %v3161_v33 }
0x3615   :  { %2647 = vtanh.f32 %v2048_v25  ;;  %v2049_v53 = vmul.f32 0.5, %v2048_v25 }
0x3617   :  { %2649 = vtanh.f32 %v2049_v53 }
0x361b   :  { %v2648_v16 = vpop.eup %2647 }
0x361c   :  { %2056 = vrot.lane.b32.xlu0 %v2648_v16, %s2690_s9 }
0x361d   :  { %v2650_v36 = vpop.eup %2649 }
0x361e   :  { %v2051_v40 = vmul.f32 0.5, %v2650_v36 }
0x3620   :  { %v2052_v35 = vadd.f32 0.5, %v2051_v40  ;;  %v2492_v40 = vld [vmem:[#allocation4 + $0x130] ss:$0 sm:$0xff] }
0x3622   :  { %v2054_v33 = vmul.f32 %v2052_v35, %v2009_v48 }
0x368e   :  { %v2057_v1 = vpop.permute.xlu0 %2056 }
0x368f   :  { %v2059_v0 = vmul.f32 %v2057_v1, %v2052_v35 }
0x3691   :  { %2061 = vrot.lane.b32.xlu1 %v2059_v0, %s2681_s15 }
0x3699   :  { %2021 = vrot.lane.b32.xlu1 %v2015_v14, %s2692_s11  ;;  %v2229_v14 = vpop.f32.mrf.mxu1 }
0x36a1   :  { %1856 = vrot.lane.b32.xlu1 %v3195_v49, %s2692_s11 }
0x36a9   :  { %1691 = vrot.lane.b32.xlu1 %v3166_v42, %s2692_s11 }
0x3703   :  { %v2062_v54 = vpop.permute.xlu1 %2061 }
0x3704   :  { %v2064_v3 = vadd.f32 %v2062_v54, %v2054_v33 }
0x3706   :  { %2651 = vtanh.f32 %v2064_v3 }
0x370b   :  { %v2022_v5 = vpop.permute.xlu1 %2021 }
0x370c   :  { %v2652_v6 = vpop.eup %2651  ;;  %2024 = vst.msk [vmem:[#allocation3 + $0x8] sm:$0xff] %vm1689_vm3, %v2022_v5 }
0x370d   :  { %2067 = vrot.lane.b32.xlu2 %v2652_v6, %s2681_s15 }
0x3713   :  { %v1857_v43 = vpop.permute.xlu1 %1856 }
0x3714   :  { %1859 = vst.msk [vmem:[#allocation3 + $0x20] sm:$0xff] %vm1689_vm3, %v1857_v43 }
0x3715   :  { %1966 = vrot.lane.b32.xlu2 %v1960_v47, %s2692_s11 }
0x371b   :  { %v1692_v50 = vpop.permute.xlu1 %1691  ;;  %v2092_v18 = vld [vmem:[#allocation3 + $0x20] sm:$0xff] }
0x371c   :  { %1694 = vst.msk [vmem:[#allocation3 + $0x38] sm:$0xff] %vm1689_vm3, %v1692_v50 }
0x371d   :  { %1801 = vrot.lane.b32.xlu2 %v3185_v23, %s2692_s11 }
0x3723   :  { %v2095_v63 = vld [vmem:[#allocation3 + $0x38] sm:$0xff] }
0x3767   :  { %v2068_v42 = vpop.permute.xlu2 %2067 }
0x3768   :  { %v2070_v49 = vmul.f32 %v2068_v42, %v2052_v35 }
0x376a   :  { %2072 = vrot.lane.b32.xlu2 %v2070_v49, %s2691_s10  ;;  %2076 = vrot.lane.b32.xlu0 %v2070_v49, %s2692_s11 }
0x376f   :  { %v1967_v24 = vpop.permute.xlu2 %1966 }
0x3770   :  { %1969 = vst.msk [vmem:[#allocation3 + $0x10] sm:$0xff] %vm1689_vm3, %v1967_v24 }
0x3772   :  { %1911 = vrot.lane.b32.xlu0 %v3205_v15, %s2692_s11 }
0x3777   :  { %v1802_v55 = vpop.permute.xlu2 %1801  ;;  %v2090_v61 = vld [vmem:[#allocation3 + $0x10] sm:$0xff] }
0x3778   :  { %1804 = vst.msk [vmem:[#allocation3 + $0x28] sm:$0xff] %vm1689_vm3, %v1802_v55 }
0x377a   :  { %1746 = vrot.lane.b32.xlu0 %v3175_v19, %s2692_s11  ;;  %v2089_v19 = vld [vmem:[#allocation3 + $0x8] sm:$0xff] }
0x377f   :  { %v2093_v17 = vld [vmem:[#allocation3 + $0x28] sm:$0xff] }
0x37c4   :  { %v2073_v62 = vpop.permute.xlu2 %2072 }
0x37c5   :  { %2075 = vst.msk [vmem:[#allocation2 + $0x38] sm:$0xff] %vm1689_vm3, %v2073_v62 }
0x37cc   :  { %v2087_v23 = vld [vmem:[#allocation2 + $0x38] sm:$0xff] }
0x37cd   :  { %2454 = vmatmul.msk.f32.gmra.mxu1 %vm1689_vm3, %v2087_v23 }
0x37dc   :  { %v2077_v8 = vpop.permute.xlu0 %2076 }
0x37dd   :  { %2079 = vst.msk [vmem:[#allocation3] sm:$0xff] %vm1689_vm3, %v2077_v8 }
0x37e4   :  { %v1912_v32 = vpop.permute.xlu0 %1911  ;;  %v2088_v59 = vld [vmem:[#allocation3] sm:$0xff] }
0x37e5   :  { %1914 = vst.msk [vmem:[#allocation3 + $0x18] sm:$0xff] %vm1689_vm3, %v1912_v32  ;;  %2438 = vmatmul.msk.f32.vlgmr.msra.gmra.mxu0 %vm1689_vm3, %v2088_v59 }
0x37ec   :  { %v1747_v15 = vpop.permute.xlu0 %1746  ;;  %v2091_v11 = vld [vmem:[#allocation3 + $0x18] sm:$0xff] }
0x37ed   :  { %1749 = vst.msk [vmem:[#allocation3 + $0x30] sm:$0xff] %vm1689_vm3, %v1747_v15  ;;  %2439 = vmatmul.msk.f32.gmra.mxu0 %vm1689_vm3, %v2089_v19 }
0x37f4   :  { %v2094_v58 = vld [vmem:[#allocation3 + $0x30] sm:$0xff] }
0x37f5   :  { %2440 = vmatmul.msk.f32.gmra.mxu0 %vm1689_vm3, %v2090_v61 }
0x37fd   :  { %2441 = vmatmul.msk.f32.gmra.mxu0 %vm1689_vm3, %v2091_v11 }
0x3805   :  { %2442 = vmatmul.msk.f32.gmra.mxu0 %vm1689_vm3, %v2092_v18 }
0x380d   :  { %2443 = vmatmul.msk.f32.gmra.mxu0 %vm1689_vm3, %v2093_v17 }
0x3815   :  { %2444 = vmatmul.msk.f32.gmra.mxu0 %vm1689_vm3, %v2094_v58 }
0x381d   :  { %2445 = vmatmul.msk.f32.gmra.mxu0 %vm1689_vm3, %v2095_v63 }
0x384a   :  { %v2232_v25 = vpop.f32.mrf.mxu1 }
0x3862   :  { %v2143_v46 = vpop.f32.mrf.mxu0 }
0x3863   :  { %v2212_v51 = vadd.f32 %v2211_v26, %v2143_v46 }
0x3865   :  { %v2237_v27 = vadd.f32 %v2491_v41, %v2212_v51 }
0x3867   :  { %2455 = vmatmul.msk.f32.vlgmr.msrb.gmra.mxu2 %vm39_vm0, %v2237_v27 }
0x386a   :  { %v2146_v30 = vpop.f32.mrf.mxu0 }
0x386b   :  { %v2215_v4 = vadd.f32 %v2214_v57, %v2146_v30 }
0x386d   :  { %v2238_v47 = vadd.f32 %v2491_v41, %v2215_v4 }
0x386f   :  { %2456 = vmatmul.msk.f32.gmra.mxu2 %vm39_vm0, %v2238_v47 }
0x3872   :  { %v2149_v28 = vpop.f32.mrf.mxu0 }
0x3873   :  { %v2218_v10 = vadd.f32 %v2217_v38, %v2149_v28 }
0x3875   :  { %v2239_v21 = vadd.f32 %v2491_v41, %v2218_v10 }
0x3877   :  { %2457 = vmatmul.msk.f32.gmra.mxu2 %vm39_vm0, %v2239_v21 }
0x387a   :  { %v2152_v20 = vpop.f32.mrf.mxu0 }
0x387b   :  { %v2221_v12 = vadd.f32 %v2220_v45, %v2152_v20 }
0x387d   :  { %v2240_v2 = vadd.f32 %v2491_v41, %v2221_v12 }
0x387f   :  { %2458 = vmatmul.msk.f32.gmra.mxu2 %vm39_vm0, %v2240_v2 }
0x3882   :  { %v2155_v29 = vpop.f32.mrf.mxu0 }
0x3883   :  { %v2224_v31 = vadd.f32 %v2223_v60, %v2155_v29 }
0x3885   :  { %v2241_v13 = vadd.f32 %v2491_v41, %v2224_v31 }
0x3887   :  { %2459 = vmatmul.msk.f32.gmra.mxu2 %vm39_vm0, %v2241_v13 }
0x388a   :  { %v2158_v48 = vpop.f32.mrf.mxu0 }
0x388b   :  { %v2227_v56 = vadd.f32 %v2226_v34, %v2158_v48 }
0x388d   :  { %v2242_v9 = vadd.f32 %v2491_v41, %v2227_v56 }
0x388f   :  { %2460 = vmatmul.msk.f32.gmra.mxu2 %vm39_vm0, %v2242_v9 }
0x3892   :  { %v2161_v37 = vpop.f32.mrf.mxu0 }
0x3893   :  { %v2230_v39 = vadd.f32 %v2229_v14, %v2161_v37 }
0x3895   :  { %v2243_v44 = vadd.f32 %v2491_v41, %v2230_v39 }
0x3897   :  { %2461 = vmatmul.msk.f32.gmra.mxu2 %vm39_vm0, %v2243_v44 }
0x389a   :  { %v2164_v16 = vpop.f32.mrf.mxu0 }
0x389b   :  { %v2233_v53 = vadd.f32 %v2232_v25, %v2164_v16 }
0x389d   :  { %v2244_v36 = vadd.f32 %v2491_v41, %v2233_v53 }
0x389f   :  { %2462 = vmatmul.msk.f32.gmra.mxu2 %vm39_vm0, %v2244_v36 }
0x38ea   :  { %v2290_v35 = vpop.f32.mrf.mxu2 }
0x38eb   :  { %v2291_v1 = vadd.f32 %v2492_v40, %v2290_v35 }
0x38ed   :  { %2315 = vst.msk [vmem:[%s3304_s2] sm:$0xff] %vm2314_vm5, %v2291_v1 }
0x38f2   :  { %v2293_v0 = vpop.f32.mrf.mxu2 }
0x38f3   :  { %v2294_v33 = vadd.f32 %v2492_v40, %v2293_v0 }
0x38f5   :  { %2316 = vst.msk [vmem:[%s3304_s2 + $0x8] sm:$0xff] %vm2314_vm5, %v2294_v33 }
0x38fa   :  { %v2296_v54 = vpop.f32.mrf.mxu2 }
0x38fb   :  { %v2297_v3 = vadd.f32 %v2492_v40, %v2296_v54 }
0x38fd   :  { %2317 = vst.msk [vmem:[%s3304_s2 + $0x10] sm:$0xff] %vm2314_vm5, %v2297_v3 }
0x3902   :  { %v2299_v5 = vpop.f32.mrf.mxu2 }
0x3903   :  { %v2300_v6 = vadd.f32 %v2492_v40, %v2299_v5 }
0x3905   :  { %2318 = vst.msk [vmem:[%s3304_s2 + $0x18] sm:$0xff] %vm2314_vm5, %v2300_v6 }
0x390a   :  { %v2302_v43 = vpop.f32.mrf.mxu2 }
0x390b   :  { %v2303_v50 = vadd.f32 %v2492_v40, %v2302_v43 }
0x390d   :  { %2319 = vst.msk [vmem:[%s3304_s2 + $0x20] sm:$0xff] %vm2314_vm5, %v2303_v50 }
0x3912   :  { %v2305_v42 = vpop.f32.mrf.mxu2 }
0x3913   :  { %v2306_v49 = vadd.f32 %v2492_v40, %v2305_v42 }
0x3915   :  { %2320 = vst.msk [vmem:[%s3304_s2 + $0x28] sm:$0xff] %vm2314_vm5, %v2306_v49 }
0x391a   :  { %v2308_v24 = vpop.f32.mrf.mxu2 }
0x391b   :  { %v2309_v55 = vadd.f32 %v2492_v40, %v2308_v24 }
0x391d   :  { %2321 = vst.msk [vmem:[%s3304_s2 + $0x30] sm:$0xff] %vm2314_vm5, %v2309_v55 }
0x3922   :  { %v2311_v7 = vpop.f32.mrf.mxu2 }
0x3923   :  { %v2312_v62 = vadd.f32 %v2492_v40, %v2311_v7 }
0x3925   :  { %2322 = vst.msk [vmem:[%s3304_s2 + $0x38] sm:$0xff] %vm2314_vm5, %v2312_v62 }
0x3926   :  { %2327 = vsyncpa [#allocation5], 1 }

</bundles_post_ra>
